<compile_context>
chip_gen: v6e
topology: v6e:2x2x1
jax: 0.10.0
libtpu: 0.0.40
codegen_flags: <defaults>
</compile_context>

<pallas_src>
import jax
import jax.numpy as jnp
from jax import lax
from jax.experimental import pallas as pl
from jax.experimental.pallas import tpu as pltpu

SEQ = 196    # hardcoded loop length in the PyTorch module
HID = 1024   # hardcoded Linear(1024, 1024)


def _default_tile_n():
    """Weight-row tile size per chip generation.

    Single-TensorCore chips (v5e / v6e): NT=1 (tn=1024) -> only 2 grid steps.
    Megacore chips (v7x etc.): NT=2 (tn=512) so the weight stream is split
    across the two TensorCores instead of being duplicated per batch.
    """
    try:
        kind = jax.devices()[0].device_kind.lower()
    except Exception:
        return 512
    single_core = ("lite" in kind) or ("v5e" in kind) or ("v6e" in kind)
    return 1024 if single_core else 512


def extract_image_feature(x, w, b, *, tn=None):
    """x: (B, S, H) f32; w: (N, H) torch Linear layout, pass it as bf16
    (cast once at parameter/load time); b: (N,) f32."""
    B, S, H = x.shape
    N, H_in = w.shape
    assert S == SEQ and H == HID and H_in == H
    if tn is None:
        tn = _default_tile_n()
    assert N % tn == 0
    NT = N // tn

    xf = jnp.asarray(x, jnp.float32)                 # (B, S, H) f32, as-is
    wf = jnp.asarray(w, jnp.bfloat16)                # (N, H) bf16 weight stream
    bf = jnp.asarray(b, jnp.float32).reshape(1, N)   # (1, N) f32 bias

    # Keep the whole batch resident in VMEM while it is small; per-batch block
    # if B grows so the VMEM footprint stays flat (at the cost of NT re-reads).
    x_resident = B <= 8

    def kernel(x_ref, w_ref, b_ref, out_ref, mean_ref):
        bidx = pl.program_id(1) if x_resident else 0
        xb = x_ref[bidx].astype(jnp.bfloat16)        # (S, H) slab, bf16 for MXU
        wb = w_ref[...]                              # (tn, H) bf16 weight tile
        # x[b] @ W_tile^T on the MXU, f32 accumulation (no transposed copy).
        y = lax.dot_general(
            xb, wb,
            dimension_numbers=(((1,), (1,)), ((), ())),
            preferred_element_type=jnp.float32)      # (S, tn)
        y = jnp.maximum(y + b_ref[...], 0.0)         # bias + ReLU (f32, VPU)
        out_ref[...] = y                             # lane-dense (S, tn) store
        # mean over the 196 sequence positions for this batch / column tile
        mean_ref[...] = jnp.mean(y, axis=0, keepdims=True)[None]   # (1,1,tn)

    if x_resident:
        # Constant block index -> fetched once; single buffer (no waste).
        x_spec = pl.BlockSpec((B, S, H), lambda j, bb: (0, 0, 0),
                              pipeline_mode=pl.Buffered(1))
    else:
        x_spec = pl.BlockSpec((1, S, H), lambda j, bb: (bb, 0, 0))

    if NT == 1:
        # Constant weight block index -> single buffer as well.
        w_spec = pl.BlockSpec((tn, H), lambda j, bb: (j, 0),
                              pipeline_mode=pl.Buffered(1))
    else:
        # j is the outer grid axis, so each weight tile is fetched once and
        # reused across the inner batch axis; keep default double-buffering.
        w_spec = pl.BlockSpec((tn, H), lambda j, bb: (j, 0))

    flops = 2 * B * S * N * H + 3 * B * S * N
    bytes_accessed = (xf.size * 4 + wf.size * 2 + bf.size * 4
                      + S * B * N * 4 + B * N * 4)

    out_flat, mean3 = pl.pallas_call(
        kernel,
        out_shape=(
            jax.ShapeDtypeStruct((S, B * N), jnp.float32),   # == (S, B, N)
            jax.ShapeDtypeStruct((B, 1, N), jnp.float32),
        ),
        grid=(NT, B),
        in_specs=[
            x_spec,
            w_spec,
            pl.BlockSpec((1, tn), lambda j, bb: (0, j)),     # bias column tile
        ],
        out_specs=(
            pl.BlockSpec((S, tn), lambda j, bb: (0, bb * NT + j)),
            pl.BlockSpec((1, 1, tn), lambda j, bb: (bb, 0, j)),
        ),
        compiler_params=pltpu.CompilerParams(
            # Megacore split pinned to the weight-tile axis (j); batch axis is
            # a plain sequential loop so the weight stream is never duplicated
            # across TensorCores.
            dimension_semantics=("parallel", "arbitrary"),
        ),
        cost_estimate=pl.CostEstimate(
            flops=flops, transcendentals=0, bytes_accessed=bytes_accessed),
    )(xf, wf, bf)

    output = out_flat.reshape(S, B, N)   # free view, already (s, b, n) order
    mean = mean3.reshape(B, N)           # free view
    return mean, output


if __name__ == "__main__":
    key = jax.random.PRNGKey(0)
    kx, kw, kb = jax.random.split(key, 3)

    B = 2
    x = jax.random.normal(kx, (B, SEQ, HID), dtype=jnp.float32)
    # Deterministic synthetic Linear(1024, 1024) parameters (torch layout)
    w = jax.random.normal(kw, (HID, HID), dtype=jnp.float32) * 0.02   # (out, in)
    bias = jax.random.normal(kb, (HID,), dtype=jnp.float32) * 0.02

    # Parameter/load-time cast: the weight is converted to bf16 exactly once
    # here, not inside the per-call path.
    w_bf16 = jnp.asarray(w, jnp.bfloat16)

    mean, output = extract_image_feature(x, w_bf16, bias)
    jax.block_until_ready((mean, output))

    # Pure-JAX f32 reference matching the PyTorch forward exactly
    xp = jnp.transpose(x, (1, 0, 2))                                  # (S, B, H)
    ref_out = jnp.maximum(jnp.einsum('sbh,oh->sbo', xp, w) + bias, 0.0)
    ref_mean = jnp.mean(ref_out, axis=0)

    assert output.shape == (SEQ, B, HID) and mean.shape == (B, HID)
    # bf16 MXU operands with K=1024 give ~1e-2-level absolute error vs f32 ref
    assert jnp.allclose(output, ref_out, atol=3e-2, rtol=3e-2)
    assert jnp.allclose(mean, ref_mean, atol=1e-2, rtol=1e-2)
    print("KERNEL_OK")
</pallas_src>

<mosaic_0001>
module attributes {stable_mosaic.version = 11 : i64} {
  func.func @kernel(%arg0: i32, %arg1: i32, %arg2: memref<2x196x1024xf32, #tpu.memory_space<vmem>>, %arg3: memref<512x1024xbf16, #tpu.memory_space<vmem>>, %arg4: memref<1x512xf32, #tpu.memory_space<vmem>>, %arg5: memref<196x512xf32, #tpu.memory_space<vmem>>, %arg6: memref<1x1x512xf32, #tpu.memory_space<vmem>>) attributes {dimension_semantics = [#tpu.dimension_semantics<parallel>, #tpu.dimension_semantics<arbitrary>], iteration_bounds = array<i64: 2, 2>, scalar_prefetch = 0 : i64, scratch_operands = 0 : i64, tpu.core_type = #tpu.core_type<tc>, window_params = [{pipeline_mode = #tpu.pipeline_mode<synchronous>, transform_indices = @transform_0, window_bounds = array<i64: 2, 196, 1024>}, {transform_indices = @transform_1, window_bounds = array<i64: 512, 1024>}, {transform_indices = @transform_2, window_bounds = array<i64: 1, 512>}, {transform_indices = @transform_3, window_bounds = array<i64: 196, 512>}, {transform_indices = @transform_4, window_bounds = array<i64: 1, 1, 512>}]} {
    %0 = arith.index_cast %arg1 : i32 to index
    %c0 = arith.constant 0 : index
    %c0_0 = arith.constant 0 : index
    %1 = vector.load %arg2[%0, %c0, %c0_0] : memref<2x196x1024xf32, #tpu.memory_space<vmem>>, vector<1x196x1024xf32>
    %2 = vector.shape_cast %1 : vector<1x196x1024xf32> to vector<196x1024xf32>
    %3 = arith.truncf %2 : vector<196x1024xf32> to vector<196x1024xbf16>
    %c0_1 = arith.constant 0 : index
    %c0_2 = arith.constant 0 : index
    %4 = vector.load %arg3[%c0_1, %c0_2] : memref<512x1024xbf16, #tpu.memory_space<vmem>>, vector<512x1024xbf16>
    %cst = arith.constant dense<0.000000e+00> : vector<196x512xf32>
    %5 = tpu.matmul %3, %4, %cst {dimension_numbers = #tpu.dot_dimension_numbers<[1], [1], [0], [0], [0, 0, 1, 0], [], []>} : vector<196x1024xbf16>, vector<512x1024xbf16>, vector<196x512xf32> -> vector<196x512xf32>
    %c0_3 = arith.constant 0 : index
    %c0_4 = arith.constant 0 : index
    %6 = vector.load %arg4[%c0_3, %c0_4] : memref<1x512xf32, #tpu.memory_space<vmem>>, vector<1x512xf32>
    %7 = vector.broadcast %6 : vector<1x512xf32> to vector<196x512xf32>
    %8 = arith.addf %5, %7 : vector<196x512xf32>
    %cst_5 = arith.constant 0.000000e+00 : f32
    %9 = vector.broadcast %cst_5 : f32 to vector<196x512xf32>
    %10 = arith.maximumf %8, %9 : vector<196x512xf32>
    %c0_6 = arith.constant 0 : index
    %c0_7 = arith.constant 0 : index
    %11 = vector.load %arg5[%c0_6, %c0_7] : memref<196x512xf32, #tpu.memory_space<vmem>>, vector<196x512xf32>
    tpu.vector_store %arg5[%c0_6, %c0_7], %10 {strides = array<i32>} : memref<196x512xf32, #tpu.memory_space<vmem>>, vector<196x512xf32>,
    %cst_8 = arith.constant dense<0.000000e+00> : vector<512xf32>
    %12 = vector.multi_reduction <add>, %10, %cst_8 [0] : vector<196x512xf32> to vector<512xf32>
    %13 = vector.shape_cast %12 : vector<512xf32> to vector<1x512xf32>
    %cst_9 = arith.constant 1.960000e+02 : f32
    %14 = vector.broadcast %cst_9 : f32 to vector<1x512xf32>
    %15 = arith.divf %13, %14 : vector<1x512xf32>
    %16 = vector.shape_cast %15 : vector<1x512xf32> to vector<1x1x512xf32>
    %c0_10 = arith.constant 0 : index
    %c0_11 = arith.constant 0 : index
    %c0_12 = arith.constant 0 : index
    %17 = vector.load %arg6[%c0_10, %c0_11, %c0_12] : memref<1x1x512xf32, #tpu.memory_space<vmem>>, vector<1x1x512xf32>
    tpu.vector_store %arg6[%c0_10, %c0_11, %c0_12], %16 {strides = array<i32>} : memref<1x1x512xf32, #tpu.memory_space<vmem>>, vector<1x1x512xf32>,
    return
  }
  func.func @transform_0(%arg0: i32, %arg1: i32) -> (i32, i32, i32) {
    %c0_i32 = arith.constant 0 : i32
    %c0_i32_0 = arith.constant 0 : i32
    %c0_i32_1 = arith.constant 0 : i32
    %c0_i32_2 = arith.constant 0 : i32
    return %c0_i32, %c0_i32_0, %c0_i32_1 : i32, i32, i32
  }
  func.func @transform_1(%arg0: i32, %arg1: i32) -> (i32, i32) {
    %c0_i32 = arith.constant 0 : i32
    %c0_i32_0 = arith.constant 0 : i32
    return %arg0, %c0_i32 : i32, i32
  }
  func.func @transform_2(%arg0: i32, %arg1: i32) -> (i32, i32) {
    %c0_i32 = arith.constant 0 : i32
    %c0_i32_0 = arith.constant 0 : i32
    return %c0_i32, %arg0 : i32, i32
  }
  func.func @transform_3(%arg0: i32, %arg1: i32) -> (i32, i32) {
    %c2_i32 = arith.constant 2 : i32
    %0 = arith.muli %arg1, %c2_i32 : i32
    %1 = arith.addi %0, %arg0 : i32
    %c0_i32 = arith.constant 0 : i32
    %c0_i32_0 = arith.constant 0 : i32
    return %c0_i32, %1 : i32, i32
  }
  func.func @transform_4(%arg0: i32, %arg1: i32) -> (i32, i32, i32) {
    %c0_i32 = arith.constant 0 : i32
    %c0_i32_0 = arith.constant 0 : i32
    return %arg1, %c0_i32, %arg0 : i32, i32, i32
  }
}

</mosaic_0001>

<bundles_post_ra>
// kernel: tpu_custom_call.1
= control target key start
LH: loop header
LB: loop body
LE: loop exit
PB: predicated region body
PF: predicated region fallthrough
CT: control target
= control target key end

     0   :  { %s6302_s0 = inlined_call_operand.vmem [shape: f32[2,196,1024], index: 0, kind: input, shape index: {}]   ;;  %s6303_s1 = inlined_call_operand.vmem [shape: bf16[1024,1024], index: 1, kind: input, shape index: {}]   ;;  %s6304_s2 = inlined_call_operand.vmem [shape: f32[1,1024], index: 2, kind: input, shape index: {}]   ;;  %s6305_s3 = inlined_call_operand.hbm [shape: f32[196,2048], index: 3, kind: output, shape index: {0}]   ;;  %s6306_s4 = inlined_call_operand.hbm [shape: f32[2,1,1024], index: 4, kind: output, shape index: {1}]  }
   0x1   :  { %6385 = sst [smem:[#allocation113_spill]] %s6302_s0 }
   0x2   :  { %6386 = sst [smem:[#allocation114_spill]] %s6303_s1 }
   0x3   :  { %6387 = sst [smem:[#allocation115_spill]] %s6306_s4 }
   0x4   :  { %10 = vsyncpa [#allocation3], 0 }
   0x5   :  { %12 = vsyncpa [#allocation3 + $0x1], 0 }
   0x6   :  { %13 = vsyncpa [#allocation5], 0 }
   0x7   :  { %15 = vsyncpa [#allocation5 + $0x1], 0  ;;  %s4494_s15 = smov 0   ;;  %s4496_s16 = smov 0  }
   0x8   :  { %s4498_s17 = smov 0   ;;  %s4500_s18 = smov 0  }
   0x9   :  { %s4502_s19 = smov 0   ;;  %s4504_s20 = smov 0  }
   0xa   :  { %s4506_s21 = smov 0   ;;  %s4508_s22 = smov 0  }
   0xb   :  { %s4510_s23 = smov 0   ;;  %s4512_s24 = smov 0  }
   0xc   :  { %s4514_s25 = smov 0  }
   0xd LB: > { %6388 = sst [smem:[#allocation8_spill]] %s4433_s18  ;;  %s3928_s26 = sadd.s32 4294967295, %s4461_s25   ;;  %s4461_s25 = sphi %s4514_s25, %s21_s25   ;;  %s4457_s24 = sphi %s4512_s24, %s6630_s24   ;;  %s4453_s23 = sphi %s4510_s23, %s6629_s23   ;;  %s4449_s22 = sphi %s4508_s22, %s6628_s22   ;;  %s4445_s21 = sphi %s4506_s21, %s6627_s21   ;;  %s4441_s20 = sphi %s4504_s20, %s6626_s20   ;;  %s4437_s19 = sphi %s4502_s19, %s6625_s19   ;;  %s4433_s18 = sphi %s4500_s18, %s6624_s18   ;;  %s4429_s17 = sphi %s4498_s17, %s6623_s17   ;;  %s4425_s16 = sphi %s4496_s16, %s6622_s16   ;;  %s4421_s15 = sphi %s4494_s15, %s6621_s15  }
   0xe   : > { %s3929_s27 = sadd.s32 4294967294, %s4461_s25   ;;  %s30_s28 = sadd.s32 1, %s4453_s23 }
   0xf   : > { %s33_s29 = sadd.s32 1, %s4457_s24  ;;  %p31_p0 = scmp.ge.s32.totalorder %s30_s28, 2 }
  0x10   : > { %s3930_s30 = sshll.u32 %s4453_s23, 1  ;;  %s117_s6 = sadd.s32 1, %s4441_s20 }
  0x11   : > { %s111_s5 = sadd.s32 %s4457_s24, %s3930_s30  ;;  %s6632_s28 = smov (%p31_p0, %s30_s28), 0 }
  0x12   : > { %s6634_s29 = smov (!%p31_p0, %s33_s29), %s4457_s24  ;;  %s3931_s7 = sshll.u32 %s6632_s28, 1 }
  0x13   : > { %p127_p1 = scmp.ne.s32.totalorder %s4441_s20, %s4437_s19  ;;  %p35_p2 = scmp.ge.s32.totalorder %s6634_s29, 2 }
  0x14   : > { %p4562_p3 = scmp.eq.s32.totalorder %s3928_s26, 3  ;;  %p133_p4 = scmp.ne.s32.totalorder %s4437_s19, %s4433_s18 }
  0x15   : > { %p4568_p5 = scmp.eq.s32.totalorder %s3929_s27, 3  ;;  %s6636_s29 = smov (%p35_p2, %s6634_s29), 0 }
  0x16   : > { %p4576_p6 = por %p4562_p3, %p127_p1  ;;  %s113_s12 = sadd.s32 %s3931_s7, %s6636_s29 }
  0x17   : > { %p4582_p7 = por %p4568_p5, %p133_p4  ;;  %s140_s13 = ssub.s32 %s4453_s23, %s6632_s28 }
  0x18   : > { %s114_s14 = ssub.s32 %s111_s5, %s113_s12  ;;  %s141_s26 = ssub.s32 %s4457_s24, %s6636_s29 }
  0x19   : > { %s6392_s11 = scalar_select %p4582_p7, 1, 0 }
  0x1a   : > { %p115_p8 = scmp.eq.s32.totalorder %s114_s14, 0  ;;  %s142_s27 = sor.u32 %s141_s26, %s140_s13 }
  0x1b   : > { %6393 = sst [smem:[#allocation9_spill]] %s6392_s11  ;;  %p143_p9 = scmp.eq.s32.totalorder %s142_s27, 0 }
  0x1c   : > { %s145_s30 = sadd.s32 1, %s4429_s17  ;;  %p155_p10 = scmp.ne.s32.totalorder %s4429_s17, %s4425_s16 }
  0x1d   : > { %s4593_s18 = scalar_select %p115_p8, %s4441_s20, %s117_s6  }
  0x1e   : > { %s4596_s4 = scalar_select %p143_p9, %s4429_s17, %s145_s30  }
  0x1f   : > { %p161_p11 = scmp.ne.s32.totalorder %s4425_s16, %s4421_s15  ;;  %p3934_p12 = scmp.ge.s32.totalorder %s4461_s25, 1 }
  0x20   : > { %p201_p13 = scmp.lt.s32.totalorder %s4461_s25, 5  ;;  %p4606_p0 = por %p155_p10, %p4562_p3 }
  0x21   : > { %p4612_p1 = por %p161_p11, %p4568_p5 }
  0x22   : > { %p202_p2 = pnand %p3934_p12, %p201_p13 }
  0x23   : > { %s6395_s5 = scalar_select %p4612_p1, 1, 0 }
  0x24   : > { %205 = sbr.rel (%p202_p2) target bundleno = 909 (0x38d), region = 32 }
  0x29   : > { %s3936_s6 = sshll.u32 %s4449_s22, 6  ;;  %s6396_s1 = sld [smem:[#allocation114_spill]]  ;;  %vm3629_vm0 = vcmask 1043456  }
  0x2a   : > { %p238_p4 = scmp.lt.s32.totalorder %s3936_s6, 127  ;;  %s4207_s9 = smul.u32 1600, %s4445_s21 }
  0x2b   : > { %s6397_s0 = sld [smem:[#allocation113_spill]]  ;;  %s5183_s30 = sshll.u32 %s4449_s22, 2 }
  0x2c   : > { %s6638_s6 = smov (!%p238_p4, %s3936_s6), 127  ;;  %p245_p3 = scmp.lt.s32.totalorder %s5183_s30, 7 }
  0x2d   : > { %s4206_s7 = sshll.u32 %s6638_s6, 5 }
  0x2e   : > { %s246_s6 = scalar_select %p245_p3, %s5183_s30, 7 }
  0x2f   : > { %s4620_s8 = scalar_lea.vmem %s6396_s1, %s4206_s7 }
  0x30   : > { %v616_v0 = vld [vmem:[%s4620_s8 + $0x1c0] sm:$0xff]  ;;  %v617_v2 = vld [vmem:[%s4620_s8 + $0x1c8] sm:$0xff]  ;;  %s5225_s13 = scalar_lea.vmem %s6304_s2, %s246_s6 }
  0x31   : > { %v620_v1 = vld [vmem:[%s4620_s8 + $0x1e0] sm:$0xff]  ;;  %v621_v4 = vld [vmem:[%s4620_s8 + $0x1e8] sm:$0xff]  ;;  %s4642_s27 = scalar_lea.vmem %s6397_s0, %s4207_s9  ;;  %s227_s9 = sand.u32 1, %s4437_s19  }
  0x32   : > { %v3998_v3 = vcombine.high %v616_v0, %v620_v1  ;;  %v3997_v5 = vcombine.low %v616_v0, %v620_v1  ;;  %v608_v6 = vld [vmem:[%s4620_s8 + $0x180] sm:$0xff]  ;;  %v4000_v8 = vcombine.high %v617_v2, %v621_v4  ;;  %v3999_v9 = vcombine.low %v617_v2, %v621_v4  ;;  %v609_v11 = vld [vmem:[%s4620_s8 + $0x188] sm:$0xff]  ;;  %v259_v35 = vld [vmem:[%s4642_s27 + $0x18] sm:$0xff]  ;;  %s4209_s14 = smul.u32 800, %s227_s9 }
  0x33   : > { %v612_v7 = vld [vmem:[%s4620_s8 + $0x1a0] sm:$0xff]  ;;  %v613_v12 = vld [vmem:[%s4620_s8 + $0x1a8] sm:$0xff]  ;;  %v267_v36 = vld [vmem:[%s4642_s27 + $0x58] sm:$0xff] }
  0x34   : > { %v3990_v10 = vcombine.high %v608_v6, %v612_v7  ;;  %2118 = vmatprep.subr.bf16.mxu0 %v3998_v3  ;;  %v3992_v13 = vcombine.high %v609_v11, %v613_v12  ;;  %2279 = vmatprep.subr.bf16.mxu1 %v4000_v8  ;;  %v600_v14 = vld [vmem:[%s4620_s8 + $0x140] sm:$0xff]  ;;  %v601_v16 = vld [vmem:[%s4620_s8 + $0x148] sm:$0xff]  ;;  %v3989_v18 = vcombine.low %v608_v6, %v612_v7  ;;  %s5645_s26 = scalar_lea.vmem [#allocation2], %s4209_s14  ;;  %s6216_s14 = scalar_lea.sflag [#allocation3], %s227_s9 }
  0x35   : > { %2119 = vmatpush1.bf16.xpose.msra.mxu0 %v3997_v5  ;;  %2280 = vmatpush1.bf16.xpose.msra.mxu1 %v3999_v9  ;;  %v604_v15 = vld [vmem:[%s4620_s8 + $0x160] sm:$0xff]  ;;  %v605_v17 = vld [vmem:[%s4620_s8 + $0x168] sm:$0xff]  ;;  %v3991_v19 = vcombine.low %v609_v11, %v613_v12  ;;  %v4654_v39 = vpack.c.bf16 %v267_v36, %v259_v35  ;;  %s3791_s6 = sshll.u32 %s5645_s26, 4  ;;  %s6203_s6 = int_to_ptr.vmem [resolvable:$true] %s3791_s6 }
  0x36   : > { %2120 = vmatprep.subr.bf16.mxu0 %v3990_v10  ;;  %2281 = vmatprep.subr.bf16.mxu1 %v3992_v13  ;;  %v3982_v20 = vcombine.high %v600_v14, %v604_v15  ;;  %v3984_v21 = vcombine.high %v601_v16, %v605_v17  ;;  %v592_v22 = vld [vmem:[%s4620_s8 + $0x100] sm:$0xff]  ;;  %v593_v24 = vld [vmem:[%s4620_s8 + $0x108] sm:$0xff]  ;;  %v3981_v26 = vcombine.low %v600_v14, %v604_v15 }
  0x37   : > { %v596_v23 = vld [vmem:[%s4620_s8 + $0x120] sm:$0xff]  ;;  %v597_v25 = vld [vmem:[%s4620_s8 + $0x128] sm:$0xff]  ;;  %v3983_v27 = vcombine.low %v601_v16, %v605_v17  ;;  %2311 = vmatprep.mubr.bf16.mxu1 %v4654_v39 }
  0x38   : > { %v3974_v28 = vcombine.high %v592_v22, %v596_v23  ;;  %v3976_v29 = vcombine.high %v593_v24, %v597_v25  ;;  %v584_v30 = vld [vmem:[%s4620_s8 + $0xc0] sm:$0xff]  ;;  %v257_v31 = vld [vmem:[%s4642_s27 + $0x8] sm:$0xff]  ;;  %v3973_v40 = vcombine.low %v592_v22, %v596_v23  ;;  %v3975_v41 = vcombine.low %v593_v24, %v597_v25 }
  0x39   : > { %v265_v32 = vld [vmem:[%s4642_s27 + $0x48] sm:$0xff]  ;;  %v588_v33 = vld [vmem:[%s4620_s8 + $0xe0] sm:$0xff] }
  0x3a   : > { %v4648_v34 = vpack.c.bf16 %v265_v32, %v257_v31  ;;  %v585_v37 = vld [vmem:[%s4620_s8 + $0xc8] sm:$0xff]  ;;  %v3966_v42 = vcombine.high %v584_v30, %v588_v33  ;;  %v576_v44 = vld [vmem:[%s4620_s8 + $0x80] sm:$0xff]  ;;  %v3965_v48 = vcombine.low %v584_v30, %v588_v33 }
  0x3b   : > { %v589_v38 = vld [vmem:[%s4620_s8 + $0xe8] sm:$0xff]  ;;  %v580_v45 = vld [vmem:[%s4620_s8 + $0xa0] sm:$0xff] }
  0x3c   : > { %2150 = vmatprep.mubr.bf16.mxu0 %v4648_v34  ;;  %v3968_v43 = vcombine.high %v585_v37, %v589_v38  ;;  %v577_v46 = vld [vmem:[%s4620_s8 + $0x88] sm:$0xff]  ;;  %v3967_v49 = vcombine.low %v585_v37, %v589_v38  ;;  %v3958_v50 = vcombine.high %v576_v44, %v580_v45  ;;  %v568_v52 = vld [vmem:[%s4620_s8 + $0x40] sm:$0xff]  ;;  %v3957_v56 = vcombine.low %v576_v44, %v580_v45 }
  0x3d   : > { %2121 = vmatpush1.bf16.xpose.msra.mxu0 %v3989_v18  ;;  %2282 = vmatpush1.bf16.xpose.msra.mxu1 %v3991_v19  ;;  %v581_v47 = vld [vmem:[%s4620_s8 + $0xa8] sm:$0xff]  ;;  %v572_v53 = vld [vmem:[%s4620_s8 + $0x60] sm:$0xff] }
  0x3e   : > { %2122 = vmatprep.subr.bf16.mxu0 %v3982_v20  ;;  %2283 = vmatprep.subr.bf16.mxu1 %v3984_v21  ;;  %v3960_v51 = vcombine.high %v577_v46, %v581_v47  ;;  %v569_v54 = vld [vmem:[%s4620_s8 + $0x48] sm:$0xff]  ;;  %v3959_v57 = vcombine.low %v577_v46, %v581_v47  ;;  %v3950_v58 = vcombine.high %v568_v52, %v572_v53  ;;  %v560_v60 = vld [vmem:[%s4620_s8] sm:$0xff] }
  0x3f   : > { %v573_v55 = vld [vmem:[%s4620_s8 + $0x68] sm:$0xff]  ;;  %v564_v61 = vld [vmem:[%s4620_s8 + $0x20] sm:$0xff]  ;;  %v3949_v0 = vcombine.low %v568_v52, %v572_v53 }
  0x40   : > { %v3952_v59 = vcombine.high %v569_v54, %v573_v55  ;;  %v561_v62 = vld [vmem:[%s4620_s8 + $0x8] sm:$0xff]  ;;  %v3951_v1 = vcombine.low %v569_v54, %v573_v55  ;;  %v3942_v2 = vcombine.high %v560_v60, %v564_v61  ;;  %v680_v4 = vld [vmem:[%s4620_s8 + $0x3c0] sm:$0xff]  ;;  %v3941_v8 = vcombine.low %v560_v60, %v564_v61 }
  0x41   : > { %v565_v63 = vld [vmem:[%s4620_s8 + $0x28] sm:$0xff]  ;;  %v684_v5 = vld [vmem:[%s4620_s8 + $0x3e0] sm:$0xff] }
  0x42   : > { %v3944_v3 = vcombine.high %v561_v62, %v565_v63  ;;  %v681_v6 = vld [vmem:[%s4620_s8 + $0x3c8] sm:$0xff]  ;;  %v3943_v9 = vcombine.low %v561_v62, %v565_v63  ;;  %v4062_v10 = vcombine.high %v680_v4, %v684_v5  ;;  %v672_v12 = vld [vmem:[%s4620_s8 + $0x380] sm:$0xff]  ;;  %v4061_v16 = vcombine.low %v680_v4, %v684_v5 }
  0x43   : > { %v685_v7 = vld [vmem:[%s4620_s8 + $0x3e8] sm:$0xff]  ;;  %v676_v13 = vld [vmem:[%s4620_s8 + $0x3a0] sm:$0xff] }
  0x44   : > { %v4064_v11 = vcombine.high %v681_v6, %v685_v7  ;;  %v673_v14 = vld [vmem:[%s4620_s8 + $0x388] sm:$0xff]  ;;  %v4063_v17 = vcombine.low %v681_v6, %v685_v7  ;;  %v4054_v18 = vcombine.high %v672_v12, %v676_v13  ;;  %v664_v20 = vld [vmem:[%s4620_s8 + $0x340] sm:$0xff]  ;;  %v4053_v24 = vcombine.low %v672_v12, %v676_v13  ;;  %v618_v6 = vld [vmem:[%s4620_s8 + $0x1d0] sm:$0xff] }
  0x45   : > { %2123 = vmatpush1.bf16.xpose.msra.mxu0 %v3981_v26  ;;  %2284 = vmatpush1.bf16.xpose.msra.mxu1 %v3983_v27  ;;  %v677_v15 = vld [vmem:[%s4620_s8 + $0x3a8] sm:$0xff]  ;;  %v668_v21 = vld [vmem:[%s4620_s8 + $0x360] sm:$0xff]  ;;  %v622_v7 = vld [vmem:[%s4620_s8 + $0x1f0] sm:$0xff] }
  0x46   : > { %2124 = vmatprep.subr.bf16.mxu0 %v3974_v28  ;;  %2285 = vmatprep.subr.bf16.mxu1 %v3976_v29  ;;  %v4056_v19 = vcombine.high %v673_v14, %v677_v15  ;;  %v665_v22 = vld [vmem:[%s4620_s8 + $0x348] sm:$0xff]  ;;  %v4055_v25 = vcombine.low %v673_v14, %v677_v15  ;;  %v4046_v26 = vcombine.high %v664_v20, %v668_v21  ;;  %v656_v28 = vld [vmem:[%s4620_s8 + $0x300] sm:$0xff] }
  0x47   : > { %v669_v23 = vld [vmem:[%s4620_s8 + $0x368] sm:$0xff]  ;;  %v660_v29 = vld [vmem:[%s4620_s8 + $0x320] sm:$0xff]  ;;  %v4045_v32 = vcombine.low %v664_v20, %v668_v21  ;;  %v4002_v12 = vcombine.high %v618_v6, %v622_v7  ;;  %v611_v20 = vld [vmem:[%s4620_s8 + $0x198] sm:$0xff] }
  0x48   : > { %v4048_v27 = vcombine.high %v665_v22, %v669_v23  ;;  %v657_v30 = vld [vmem:[%s4620_s8 + $0x308] sm:$0xff]  ;;  %v4047_v33 = vcombine.low %v665_v22, %v669_v23  ;;  %v4038_v35 = vcombine.high %v656_v28, %v660_v29  ;;  %v648_v37 = vld [vmem:[%s4620_s8 + $0x2c0] sm:$0xff]  ;;  %v615_v22 = vld [vmem:[%s4620_s8 + $0x1b8] sm:$0xff] }
  0x49   : > { %v661_v31 = vld [vmem:[%s4620_s8 + $0x328] sm:$0xff]  ;;  %v652_v38 = vld [vmem:[%s4620_s8 + $0x2e0] sm:$0xff] }
  0x4a   : > { %v4040_v36 = vcombine.high %v657_v30, %v661_v31  ;;  %v4030_v44 = vcombine.high %v648_v37, %v652_v38  ;;  %v640_v46 = vld [vmem:[%s4620_s8 + $0x280] sm:$0xff]  ;;  %v273_v23 = vld [vmem:[%s4642_s27 + $0x88] sm:$0xff] }
  0x4b   : > { %v644_v47 = vld [vmem:[%s4620_s8 + $0x2a0] sm:$0xff] }
  0x4c   : > { %v4022_v52 = vcombine.high %v640_v46, %v644_v47  ;;  %v632_v54 = vld [vmem:[%s4620_s8 + $0x240] sm:$0xff] }
  0x4d   : > { %2125 = vmatpush1.bf16.xpose.msra.mxu0 %v3973_v40  ;;  %2286 = vmatpush1.bf16.xpose.msra.mxu1 %v3975_v41  ;;  %v649_v40 = vld [vmem:[%s4620_s8 + $0x2c8] sm:$0xff]  ;;  %v636_v55 = vld [vmem:[%s4620_s8 + $0x260] sm:$0xff] }
  0x4e   : > { %2126 = vmatprep.subr.bf16.mxu0 %v3966_v42  ;;  %2287 = vmatprep.subr.bf16.mxu1 %v3968_v43  ;;  %v653_v41 = vld [vmem:[%s4620_s8 + $0x2e8] sm:$0xff]  ;;  %v4037_v42 = vcombine.low %v656_v28, %v660_v29  ;;  %v4039_v43 = vcombine.low %v657_v30, %v661_v31  ;;  %v4014_v60 = vcombine.high %v632_v54, %v636_v55  ;;  %v624_v62 = vld [vmem:[%s4620_s8 + $0x200] sm:$0xff]  ;;  %v283_v28 = vld [vmem:[%s4642_s27 + $0xd8] sm:$0xff] }
  0x4f   : > { %v4032_v45 = vcombine.high %v649_v40, %v653_v41  ;;  %v628_v63 = vld [vmem:[%s4620_s8 + $0x220] sm:$0xff]  ;;  %v3996_v31 = vcombine.high %v611_v20, %v615_v22 }
  0x50   : > { %v4006_v4 = vcombine.high %v624_v62, %v628_v63  ;;  %v256_v14 = vld [vmem:[%s4642_s27] sm:$0xff] }
  0x51   : > { %v264_v15 = vld [vmem:[%s4642_s27 + $0x40] sm:$0xff] }
  0x52   : > { %v4713_v21 = vpack.c.bf16 %v264_v15, %v256_v14  ;;  %v306_v14 = vld [vmem:[%s4642_s27 + $0x190] sm:$0xff] }
  0x53   : > { %v314_v15 = vld [vmem:[%s4642_s27 + $0x1d0] sm:$0xff] }
  0x55   : > { %2127 = vmatpush1.bf16.xpose.msra.mxu0 %v3965_v48  ;;  %2288 = vmatpush1.bf16.xpose.msra.mxu1 %v3967_v49  ;;  %v641_v48 = vld [vmem:[%s4620_s8 + $0x288] sm:$0xff] }
  0x56   : > { %2128 = vmatprep.subr.bf16.mxu0 %v3958_v50  ;;  %2289 = vmatprep.subr.bf16.mxu1 %v3960_v51  ;;  %v645_v49 = vld [vmem:[%s4620_s8 + $0x2a8] sm:$0xff]  ;;  %v4029_v50 = vcombine.low %v648_v37, %v652_v38  ;;  %v4031_v51 = vcombine.low %v649_v40, %v653_v41  ;;  %v274_v37 = vld [vmem:[%s4642_s27 + $0x90] sm:$0xff] }
  0x57   : > { %v4024_v53 = vcombine.high %v641_v48, %v645_v49  ;;  %v282_v38 = vld [vmem:[%s4642_s27 + $0xd0] sm:$0xff] }
  0x58   : > { %v602_v40 = vld [vmem:[%s4620_s8 + $0x150] sm:$0xff] }
  0x59   : > { %v606_v41 = vld [vmem:[%s4620_s8 + $0x170] sm:$0xff] }
  0x5d   : > { %2129 = vmatpush1.bf16.xpose.msra.mxu0 %v3957_v56  ;;  %2290 = vmatpush1.bf16.xpose.msra.mxu1 %v3959_v57  ;;  %v633_v56 = vld [vmem:[%s4620_s8 + $0x248] sm:$0xff] }
  0x5e   : > { %2130 = vmatprep.subr.bf16.mxu0 %v3950_v58  ;;  %2291 = vmatprep.subr.bf16.mxu1 %v3952_v59  ;;  %v637_v57 = vld [vmem:[%s4620_s8 + $0x268] sm:$0xff]  ;;  %v4021_v58 = vcombine.low %v640_v46, %v644_v47  ;;  %v4023_v59 = vcombine.low %v641_v48, %v645_v49  ;;  %v4742_v48 = vpack.c.bf16 %v282_v38, %v274_v37  ;;  %v291_v49 = vld [vmem:[%s4642_s27 + $0x118] sm:$0xff]  ;;  %v320_v37 = vld [vmem:[%s4642_s27 + $0x200] sm:$0xff] }
  0x5f   : > { %v4016_v61 = vcombine.high %v633_v56, %v637_v57  ;;  %v297_v46 = vld [vmem:[%s4642_s27 + $0x148] sm:$0xff]  ;;  %v328_v38 = vld [vmem:[%s4642_s27 + $0x240] sm:$0xff] }
  0x65   : > { %2131 = vmatpush1.bf16.xpose.msra.mxu0 %v3949_v0  ;;  %2292 = vmatpush1.bf16.xpose.msra.mxu1 %v3951_v1  ;;  %v625_v0 = vld [vmem:[%s4620_s8 + $0x208] sm:$0xff] }
  0x66   : > { %2132 = vmatprep.subr.bf16.mxu0 %v3942_v2  ;;  %2293 = vmatprep.subr.bf16.mxu1 %v3944_v3  ;;  %v629_v1 = vld [vmem:[%s4620_s8 + $0x228] sm:$0xff]  ;;  %v4013_v2 = vcombine.low %v632_v54, %v636_v55  ;;  %v4015_v3 = vcombine.low %v633_v56, %v637_v57  ;;  %v288_v56 = vld [vmem:[%s4642_s27 + $0x100] sm:$0xff] }
  0x67   : > { %v4008_v5 = vcombine.high %v625_v0, %v629_v1  ;;  %v296_v57 = vld [vmem:[%s4642_s27 + $0x140] sm:$0xff] }
  0x6d   : > { %2133 = vmatpush1.bf16.xpose.msra.mxu0 %v3941_v8  ;;  %2294 = vmatpush1.bf16.xpose.msra.mxu1 %v3943_v9  ;;  %v619_v8 = vld [vmem:[%s4620_s8 + $0x1d8] sm:$0xff] }
  0x6e   : > { %2134 = vmatprep.subr.bf16.mxu0 %v4062_v10  ;;  %2295 = vmatprep.subr.bf16.mxu1 %v4064_v11  ;;  %v623_v9 = vld [vmem:[%s4620_s8 + $0x1f8] sm:$0xff]  ;;  %v4005_v10 = vcombine.low %v624_v62, %v628_v63  ;;  %v4007_v11 = vcombine.low %v625_v0, %v629_v1  ;;  %v4761_v0 = vpack.c.bf16 %v296_v57, %v288_v56  ;;  %v305_v1 = vld [vmem:[%s4642_s27 + $0x188] sm:$0xff] }
  0x6f   : > { %v4004_v13 = vcombine.high %v619_v8, %v623_v9  ;;  %v4003_v29 = vcombine.low %v619_v8, %v623_v9  ;;  %v595_v62 = vld [vmem:[%s4620_s8 + $0x118] sm:$0xff] }
  0x70   : > { %v599_v63 = vld [vmem:[%s4620_s8 + $0x138] sm:$0xff] }
  0x71   : > { %v3980_v9 = vcombine.high %v595_v62, %v599_v63  ;;  %v347_v56 = vld [vmem:[%s4642_s27 + $0x2d8] sm:$0xff] }
  0x75   : > { %2135 = vmatpush2.bf16.xpose.msra.mxu0 %v4061_v16  ;;  %2296 = vmatpush2.bf16.xpose.msra.mxu1 %v4063_v17  ;;  %v258_v16 = vld [vmem:[%s4642_s27 + $0x10] sm:$0xff] }
  0x76   : > { %2136 = vmatprep.subr.bf16.mxu0 %v4054_v18  ;;  %2297 = vmatprep.subr.bf16.mxu1 %v4056_v19  ;;  %v266_v17 = vld [vmem:[%s4642_s27 + $0x50] sm:$0xff] }
  0x77   : > { %v610_v18 = vld [vmem:[%s4620_s8 + $0x190] sm:$0xff] }
  0x78   : > { %v614_v19 = vld [vmem:[%s4620_s8 + $0x1b0] sm:$0xff] }
  0x79   : > { %v3994_v30 = vcombine.high %v610_v18, %v614_v19  ;;  %v3993_v47 = vcombine.low %v610_v18, %v614_v19  ;;  %v587_v18 = vld [vmem:[%s4620_s8 + $0xd8] sm:$0xff] }
  0x7a   : > { %v591_v19 = vld [vmem:[%s4620_s8 + $0xf8] sm:$0xff] }
  0x7b   : > { %v3971_v57 = vcombine.low %v587_v18, %v591_v19 }
  0x7d   : > { %2137 = vmatpush2.bf16.xpose.msra.mxu0 %v4053_v24  ;;  %2298 = vmatpush2.bf16.xpose.msra.mxu1 %v4055_v25  ;;  %v281_v24 = vld [vmem:[%s4642_s27 + $0xc8] sm:$0xff]  ;;  %v4718_v25 = vpack.c.bf16 %v266_v17, %v258_v16  ;;  %v586_v16 = vld [vmem:[%s4620_s8 + $0xd0] sm:$0xff] }
  0x7e   : > { %2138 = vmatprep.subr.bf16.mxu0 %v4046_v26  ;;  %2299 = vmatprep.subr.bf16.mxu1 %v4048_v27  ;;  %v4001_v26 = vcombine.low %v618_v6, %v622_v7  ;;  %v275_v27 = vld [vmem:[%s4642_s27 + $0x98] sm:$0xff]  ;;  %v590_v17 = vld [vmem:[%s4620_s8 + $0xf0] sm:$0xff] }
  0x7f   : > { %v315_v6 = vld [vmem:[%s4642_s27 + $0x1d8] sm:$0xff] }
  0x85   : > { %2139 = vmatpush2.bf16.xpose.msra.mxu0 %v4045_v32  ;;  %2300 = vmatpush2.bf16.xpose.msra.mxu1 %v4047_v33  ;;  %v4722_v32 = vpack.c.bf16 %v281_v24, %v273_v23  ;;  %v4725_v33 = vpack.c.bf16 %v283_v28, %v275_v27  ;;  %v329_v23 = vld [vmem:[%s4642_s27 + $0x248] sm:$0xff]  ;;  %v323_v27 = vld [vmem:[%s4642_s27 + $0x218] sm:$0xff] }
  0x86   : > { %2140 = vmatprep.subr.bf16.mxu0 %v4038_v35  ;;  %2301 = vmatprep.subr.bf16.mxu1 %v4040_v36  ;;  %v272_v35 = vld [vmem:[%s4642_s27 + $0x80] sm:$0xff]  ;;  %v331_v28 = vld [vmem:[%s4642_s27 + $0x258] sm:$0xff] }
  0x87   : > { %v280_v36 = vld [vmem:[%s4642_s27 + $0xc0] sm:$0xff] }
  0x8d   : > { %2141 = vmatpush2.bf16.xpose.msra.mxu0 %v4037_v42  ;;  %2302 = vmatpush2.bf16.xpose.msra.mxu1 %v4039_v43  ;;  %v603_v42 = vld [vmem:[%s4620_s8 + $0x158] sm:$0xff] }
  0x8e   : > { %2142 = vmatprep.subr.bf16.mxu0 %v4030_v44  ;;  %2303 = vmatprep.subr.bf16.mxu1 %v4032_v45  ;;  %v607_v43 = vld [vmem:[%s4620_s8 + $0x178] sm:$0xff]  ;;  %v4737_v44 = vpack.c.bf16 %v280_v36, %v272_v35  ;;  %v289_v45 = vld [vmem:[%s4642_s27 + $0x108] sm:$0xff]  ;;  %v4797_v36 = vpack.c.bf16 %v331_v28, %v323_v27  ;;  %v360_v27 = vld [vmem:[%s4642_s27 + $0x340] sm:$0xff] }
  0x8f   : > { %v4746_v54 = vpack.c.bf16 %v297_v46, %v289_v45  ;;  %v3987_v7 = vcombine.low %v603_v42, %v607_v43  ;;  %v579_v45 = vld [vmem:[%s4620_s8 + $0x98] sm:$0xff]  ;;  %v354_v28 = vld [vmem:[%s4642_s27 + $0x310] sm:$0xff] }
  0x90   : > { %v583_v46 = vld [vmem:[%s4620_s8 + $0xb8] sm:$0xff] }
  0x95   : > { %2143 = vmatpush2.bf16.xpose.msra.mxu0 %v4029_v50  ;;  %2304 = vmatpush2.bf16.xpose.msra.mxu1 %v4031_v51  ;;  %v299_v50 = vld [vmem:[%s4642_s27 + $0x158] sm:$0xff]  ;;  %v3995_v51 = vcombine.low %v611_v20, %v615_v22  ;;  %v321_v22 = vld [vmem:[%s4642_s27 + $0x208] sm:$0xff] }
  0x96   : > { %2144 = vmatprep.subr.bf16.mxu0 %v4022_v52  ;;  %2305 = vmatprep.subr.bf16.mxu1 %v4024_v53  ;;  %v3986_v52 = vcombine.high %v602_v40, %v606_v41  ;;  %v3988_v53 = vcombine.high %v603_v42, %v607_v43  ;;  %v4749_v55 = vpack.c.bf16 %v299_v50, %v291_v49  ;;  %v578_v42 = vld [vmem:[%s4620_s8 + $0x90] sm:$0xff]  ;;  %v337_v49 = vld [vmem:[%s4642_s27 + $0x288] sm:$0xff] }
  0x97   : > { %v4794_v35 = vpack.c.bf16 %v329_v23, %v321_v22  ;;  %v582_v43 = vld [vmem:[%s4620_s8 + $0xb0] sm:$0xff]  ;;  %v345_v50 = vld [vmem:[%s4642_s27 + $0x2c8] sm:$0xff] }
  0x9d   : > { %2145 = vmatpush2.bf16.xpose.msra.mxu0 %v4021_v58  ;;  %2306 = vmatpush2.bf16.xpose.msra.mxu1 %v4023_v59  ;;  %v290_v58 = vld [vmem:[%s4642_s27 + $0x110] sm:$0xff] }
  0x9e   : > { %2146 = vmatprep.subr.bf16.mxu0 %v4014_v60  ;;  %2307 = vmatprep.subr.bf16.mxu1 %v4016_v61  ;;  %v298_v59 = vld [vmem:[%s4642_s27 + $0x150] sm:$0xff] }
  0x9f   : > { %v594_v60 = vld [vmem:[%s4620_s8 + $0x110] sm:$0xff] }
  0xa0   : > { %v598_v61 = vld [vmem:[%s4620_s8 + $0x130] sm:$0xff] }
  0xa1   : > { %v3978_v8 = vcombine.high %v594_v60, %v598_v61  ;;  %v3977_v24 = vcombine.low %v594_v60, %v598_v61  ;;  %v4818_v60 = vpack.c.bf16 %v345_v50, %v337_v49  ;;  %v379_v49 = vld [vmem:[%s4642_s27 + $0x3d8] sm:$0xff] }
  0xa5   : > { %2147 = vmatpush2.bf16.xpose.msra.mxu0 %v4013_v2  ;;  %2308 = vmatpush2.bf16.xpose.msra.mxu1 %v4015_v3  ;;  %v313_v2 = vld [vmem:[%s4642_s27 + $0x1c8] sm:$0xff]  ;;  %v3985_v3 = vcombine.low %v602_v40, %v606_v41  ;;  %v322_v40 = vld [vmem:[%s4642_s27 + $0x210] sm:$0xff] }
  0xa6   : > { %2148 = vmatprep.subr.bf16.mxu0 %v4006_v4  ;;  %2309 = vmatprep.subr.bf16.mxu1 %v4008_v5  ;;  %v4766_v4 = vpack.c.bf16 %v298_v59, %v290_v58  ;;  %v307_v5 = vld [vmem:[%s4642_s27 + $0x198] sm:$0xff]  ;;  %v330_v41 = vld [vmem:[%s4642_s27 + $0x250] sm:$0xff]  ;;  %v3962_v58 = vcombine.high %v578_v42, %v582_v43  ;;  %v3964_v59 = vcombine.high %v579_v45, %v583_v46 }
  0xad   : > { %2149 = vmatpush2.bf16.xpose.msra.mxu0 %v4005_v10  ;;  %2310 = vmatpush2.bf16.xpose.msra.mxu1 %v4007_v11  ;;  %v4770_v10 = vpack.c.bf16 %v313_v2, %v305_v1  ;;  %v4773_v11 = vpack.c.bf16 %v315_v6, %v307_v5  ;;  %v338_v1 = vld [vmem:[%s4642_s27 + $0x290] sm:$0xff]  ;;  %v571_v6 = vld [vmem:[%s4620_s8 + $0x58] sm:$0xff] }
  0xae   : > { %2440 = vmatprep.subr.bf16.mxu0 %v4002_v12  ;;  %2601 = vmatprep.subr.bf16.mxu1 %v4004_v13  ;;  %v304_v12 = vld [vmem:[%s4642_s27 + $0x180] sm:$0xff]  ;;  %v346_v2 = vld [vmem:[%s4642_s27 + $0x2d0] sm:$0xff] }
  0xaf   : > { %v312_v13 = vld [vmem:[%s4642_s27 + $0x1c0] sm:$0xff]  ;;  %v574_v5 = vld [vmem:[%s4620_s8 + $0x70] sm:$0xff] }
  0xb0   : > { %v4785_v20 = vpack.c.bf16 %v312_v13, %v304_v12  ;;  %v361_v12 = vld [vmem:[%s4642_s27 + $0x348] sm:$0xff]  ;;  %v3961_v13 = vcombine.low %v578_v42, %v582_v43 }
  0xb1   : > { %v377_v42 = vld [vmem:[%s4642_s27 + $0x3c8] sm:$0xff] }
  0xb4   : > { %2151 = vmatmul.mubr.bf16.vlgmr.msra.gmra.mxu0 %v4713_v21  ;;  %2312 = vmatmul.mubr.bf16.vlgmr.msra.gmra.mxu1 %v4718_v25 }
  0xb5   : > { %2441 = vmatpush1.bf16.xpose.msra.mxu0 %v4001_v26  ;;  %2602 = vmatpush1.bf16.xpose.msra.mxu1 %v4003_v29  ;;  %v4790_v26 = vpack.c.bf16 %v314_v15, %v306_v14  ;;  %v3979_v29 = vcombine.low %v595_v62, %v599_v63  ;;  %v336_v62 = vld [vmem:[%s4642_s27 + $0x280] sm:$0xff]  ;;  %v4838_v14 = vpack.c.bf16 %v346_v2, %v338_v1  ;;  %v355_v15 = vld [vmem:[%s4642_s27 + $0x318] sm:$0xff]  ;;  %v682_v1 = vld [vmem:[%s4620_s8 + $0x3d0] sm:$0xff] }
  0xb6   : > { %2442 = vmatprep.subr.bf16.mxu0 %v3994_v30  ;;  %2603 = vmatprep.subr.bf16.mxu1 %v3996_v31  ;;  %v3970_v30 = vcombine.high %v586_v16, %v590_v17  ;;  %v3972_v31 = vcombine.high %v587_v18, %v591_v19  ;;  %v344_v63 = vld [vmem:[%s4642_s27 + $0x2c0] sm:$0xff]  ;;  %v686_v2 = vld [vmem:[%s4620_s8 + $0x3f0] sm:$0xff] }
  0xb7   : > { %2160 = vmatprep.mubr.bf16.mxu0 %v4722_v32  ;;  %2321 = vmatprep.mubr.bf16.mxu1 %v4725_v33 }
  0xbc   : > { %2161 = vmatmul.mubr.bf16.gmra.mxu0 %v4737_v44  ;;  %2322 = vmatmul.mubr.bf16.gmra.mxu1 %v4742_v48 }
  0xbd   : > { %2443 = vmatpush1.bf16.xpose.msra.mxu0 %v3993_v47  ;;  %2604 = vmatpush1.bf16.xpose.msra.mxu1 %v3995_v51  ;;  %v4809_v47 = vpack.c.bf16 %v328_v38, %v320_v37  ;;  %v3969_v51 = vcombine.low %v586_v16, %v590_v17  ;;  %v363_v16 = vld [vmem:[%s4642_s27 + $0x358] sm:$0xff]  ;;  %v3963_v17 = vcombine.low %v579_v45, %v583_v46 }
  0xbe   : > { %2444 = vmatprep.subr.bf16.mxu0 %v3986_v52  ;;  %2605 = vmatprep.subr.bf16.mxu1 %v3988_v53  ;;  %v4814_v52 = vpack.c.bf16 %v330_v41, %v322_v40  ;;  %v339_v53 = vld [vmem:[%s4642_s27 + $0x298] sm:$0xff]  ;;  %v4845_v23 = vpack.c.bf16 %v363_v16, %v355_v15  ;;  %v369_v41 = vld [vmem:[%s4642_s27 + $0x388] sm:$0xff] }
  0xbf   : > { %2170 = vmatprep.mubr.bf16.mxu0 %v4746_v54  ;;  %2331 = vmatprep.mubr.bf16.mxu1 %v4749_v55  ;;  %v4821_v61 = vpack.c.bf16 %v347_v56, %v339_v53  ;;  %v563_v37 = vld [vmem:[%s4620_s8 + $0x18] sm:$0xff]  ;;  %v4866_v56 = vpack.c.bf16 %v377_v42, %v369_v41 }
  0xc0   : > { %v567_v38 = vld [vmem:[%s4620_s8 + $0x38] sm:$0xff] }
  0xc1   : > { %v371_v46 = vld [vmem:[%s4642_s27 + $0x398] sm:$0xff]  ;;  %v3948_v53 = vcombine.high %v563_v37, %v567_v38 }
  0xc2   : > { %v387_v15 = vld [vmem:[%s4642_s27 + $0x418] sm:$0xff] }
  0xc3   : > { %v395_v16 = vld [vmem:[%s4642_s27 + $0x458] sm:$0xff] }
  0xc4   : > { %2171 = vmatmul.mubr.bf16.gmra.mxu0 %v4761_v0  ;;  %2332 = vmatmul.mubr.bf16.gmra.mxu1 %v4766_v4  ;;  %v675_v41 = vld [vmem:[%s4620_s8 + $0x398] sm:$0xff] }
  0xc5   : > { %2445 = vmatpush1.bf16.xpose.msra.mxu0 %v3985_v3  ;;  %2606 = vmatpush1.bf16.xpose.msra.mxu1 %v3987_v7  ;;  %v570_v3 = vld [vmem:[%s4620_s8 + $0x50] sm:$0xff]  ;;  %v575_v7 = vld [vmem:[%s4620_s8 + $0x78] sm:$0xff] }
  0xc6   : > { %2446 = vmatprep.subr.bf16.mxu0 %v3978_v8  ;;  %2607 = vmatprep.subr.bf16.mxu1 %v3980_v9  ;;  %v4833_v8 = vpack.c.bf16 %v344_v63, %v336_v62  ;;  %v353_v9 = vld [vmem:[%s4642_s27 + $0x308] sm:$0xff]  ;;  %v3954_v18 = vcombine.high %v570_v3, %v574_v5  ;;  %v3956_v19 = vcombine.high %v571_v6, %v575_v7  ;;  %v370_v62 = vld [vmem:[%s4642_s27 + $0x390] sm:$0xff]  ;;  %v679_v42 = vld [vmem:[%s4620_s8 + $0x3b8] sm:$0xff] }
  0xc7   : > { %2180 = vmatprep.mubr.bf16.mxu0 %v4770_v10  ;;  %2341 = vmatprep.mubr.bf16.mxu1 %v4773_v11  ;;  %v4842_v22 = vpack.c.bf16 %v361_v12, %v353_v9  ;;  %v3953_v43 = vcombine.low %v570_v3, %v574_v5  ;;  %v3955_v50 = vcombine.low %v571_v6, %v575_v7  ;;  %v378_v63 = vld [vmem:[%s4642_s27 + $0x3d0] sm:$0xff]  ;;  %v683_v3 = vld [vmem:[%s4620_s8 + $0x3d8] sm:$0xff]  ;;  %v385_v7 = vld [vmem:[%s4642_s27 + $0x408] sm:$0xff] }
  0xc8   : > { %v687_v5 = vld [vmem:[%s4620_s8 + $0x3f8] sm:$0xff]  ;;  %v393_v9 = vld [vmem:[%s4642_s27 + $0x448] sm:$0xff] }
  0xcc   : > { %2181 = vmatmul.mubr.bf16.gmra.mxu0 %v4785_v20  ;;  %2342 = vmatmul.mubr.bf16.gmra.mxu1 %v4790_v26 }
  0xcd   : > { %2447 = vmatpush1.bf16.xpose.msra.mxu0 %v3977_v24  ;;  %2608 = vmatpush1.bf16.xpose.msra.mxu1 %v3979_v29  ;;  %v352_v24 = vld [vmem:[%s4642_s27 + $0x300] sm:$0xff]  ;;  %v362_v29 = vld [vmem:[%s4642_s27 + $0x350] sm:$0xff] }
  0xce   : > { %2448 = vmatprep.subr.bf16.mxu0 %v3970_v30  ;;  %2609 = vmatprep.subr.bf16.mxu1 %v3972_v31  ;;  %v562_v30 = vld [vmem:[%s4620_s8 + $0x10] sm:$0xff]  ;;  %v4857_v40 = vpack.c.bf16 %v360_v27, %v352_v24  ;;  %v4862_v45 = vpack.c.bf16 %v362_v29, %v354_v28  ;;  %v4890_v24 = vpack.c.bf16 %v393_v9, %v385_v7  ;;  %v384_v28 = vld [vmem:[%s4642_s27 + $0x400] sm:$0xff] }
  0xcf   : > { %2190 = vmatprep.mubr.bf16.mxu0 %v4794_v35  ;;  %2351 = vmatprep.mubr.bf16.mxu1 %v4797_v36  ;;  %v566_v31 = vld [vmem:[%s4620_s8 + $0x30] sm:$0xff]  ;;  %v4893_v27 = vpack.c.bf16 %v395_v16, %v387_v15  ;;  %v392_v29 = vld [vmem:[%s4642_s27 + $0x440] sm:$0xff]  ;;  %v667_v16 = vld [vmem:[%s4620_s8 + $0x358] sm:$0xff] }
  0xd0   : > { %v3945_v12 = vcombine.low %v562_v30, %v566_v31  ;;  %v670_v15 = vld [vmem:[%s4620_s8 + $0x370] sm:$0xff] }
  0xd4   : > { %2191 = vmatmul.mubr.bf16.gmra.mxu0 %v4809_v47  ;;  %2352 = vmatmul.mubr.bf16.gmra.mxu1 %v4814_v52 }
  0xd5   : > { %2449 = vmatpush1.bf16.xpose.msra.mxu0 %v3969_v51  ;;  %2610 = vmatpush1.bf16.xpose.msra.mxu1 %v3971_v57  ;;  %v3946_v51 = vcombine.high %v562_v30, %v566_v31  ;;  %v4869_v57 = vpack.c.bf16 %v379_v49, %v371_v46  ;;  %v386_v30 = vld [vmem:[%s4642_s27 + $0x410] sm:$0xff]  ;;  %v401_v46 = vld [vmem:[%s4642_s27 + $0x488] sm:$0xff] }
  0xd6   : > { %2450 = vmatprep.subr.bf16.mxu0 %v3962_v58  ;;  %2611 = vmatprep.subr.bf16.mxu1 %v3964_v59  ;;  %v368_v58 = vld [vmem:[%s4642_s27 + $0x380] sm:$0xff]  ;;  %v394_v31 = vld [vmem:[%s4642_s27 + $0x450] sm:$0xff]  ;;  %v409_v49 = vld [vmem:[%s4642_s27 + $0x4c8] sm:$0xff] }
  0xd7   : > { %2200 = vmatprep.mubr.bf16.mxu0 %v4818_v60  ;;  %2361 = vmatprep.mubr.bf16.mxu1 %v4821_v61  ;;  %v376_v59 = vld [vmem:[%s4642_s27 + $0x3c0] sm:$0xff]  ;;  %v4914_v7 = vpack.c.bf16 %v409_v49, %v401_v46  ;;  %v427_v46 = vld [vmem:[%s4642_s27 + $0x558] sm:$0xff]  ;;  %v4059_v49 = vcombine.low %v675_v41, %v679_v42 }
  0xd8   : > { %v4881_v6 = vpack.c.bf16 %v376_v59, %v368_v58  ;;  %v411_v58 = vld [vmem:[%s4642_s27 + $0x4d8] sm:$0xff]  ;;  %v4067_v59 = vcombine.low %v683_v3, %v687_v5 }
  0xd9   : > { %6399 = vst [vmem:[#allocation11_spill] sm:$0xff] %v4914_v7 }
  0xdc   : > { %2201 = vmatmul.mubr.bf16.gmra.mxu0 %v4833_v8  ;;  %2362 = vmatmul.mubr.bf16.gmra.mxu1 %v4838_v14 }
  0xdd   : > { %2451 = vmatpush1.bf16.xpose.msra.mxu0 %v3961_v13  ;;  %2612 = vmatpush1.bf16.xpose.msra.mxu1 %v3963_v17  ;;  %v4886_v13 = vpack.c.bf16 %v378_v63, %v370_v62  ;;  %v3947_v17 = vcombine.low %v563_v37, %v567_v38  ;;  %v674_v37 = vld [vmem:[%s4620_s8 + $0x390] sm:$0xff]  ;;  %v4060_v63 = vcombine.high %v675_v41, %v679_v42 }
  0xde   : > { %2452 = vmatprep.subr.bf16.mxu0 %v3954_v18  ;;  %2613 = vmatprep.subr.bf16.mxu1 %v3956_v19  ;;  %v4066_v18 = vcombine.high %v682_v1, %v686_v2  ;;  %v4068_v19 = vcombine.high %v683_v3, %v687_v5  ;;  %v678_v38 = vld [vmem:[%s4620_s8 + $0x3b0] sm:$0xff] }
  0xdf   : > { %2210 = vmatprep.mubr.bf16.mxu0 %v4842_v22  ;;  %2371 = vmatprep.mubr.bf16.mxu1 %v4845_v23  ;;  %v4058_v62 = vcombine.high %v674_v37, %v678_v38  ;;  %v402_v3 = vld [vmem:[%s4642_s27 + $0x490] sm:$0xff] }
  0xe0   : > { %v410_v5 = vld [vmem:[%s4642_s27 + $0x4d0] sm:$0xff] }
  0xe1   : > { %v418_v41 = vld [vmem:[%s4642_s27 + $0x510] sm:$0xff] }
  0xe2   : > { %v426_v42 = vld [vmem:[%s4642_s27 + $0x550] sm:$0xff] }
  0xe4   : > { %2211 = vmatmul.mubr.bf16.gmra.mxu0 %v4857_v40  ;;  %2372 = vmatmul.mubr.bf16.gmra.mxu1 %v4862_v45 }
  0xe5   : > { %2453 = vmatpush1.bf16.xpose.msra.mxu0 %v3953_v43  ;;  %2614 = vmatpush1.bf16.xpose.msra.mxu1 %v3955_v50  ;;  %v4905_v43 = vpack.c.bf16 %v392_v29, %v384_v28  ;;  %v4065_v50 = vcombine.low %v682_v1, %v686_v2  ;;  %v400_v1 = vld [vmem:[%s4642_s27 + $0x480] sm:$0xff]  ;;  %v425_v28 = vld [vmem:[%s4642_s27 + $0x548] sm:$0xff]  ;;  %v4057_v29 = vcombine.low %v674_v37, %v678_v38 }
  0xe6   : > { %2454 = vmatprep.subr.bf16.mxu0 %v3946_v51  ;;  %2615 = vmatprep.subr.bf16.mxu1 %v3948_v53  ;;  %v4910_v51 = vpack.c.bf16 %v394_v31, %v386_v30  ;;  %v403_v53 = vld [vmem:[%s4642_s27 + $0x498] sm:$0xff]  ;;  %v408_v2 = vld [vmem:[%s4642_s27 + $0x4c0] sm:$0xff]  ;;  %v4934_v30 = vpack.c.bf16 %v410_v5, %v402_v3  ;;  %v433_v5 = vld [vmem:[%s4642_s27 + $0x588] sm:$0xff] }
  0xe7   : > { %2220 = vmatprep.mubr.bf16.mxu0 %v4866_v56  ;;  %2381 = vmatprep.mubr.bf16.mxu1 %v4869_v57  ;;  %v4917_v9 = vpack.c.bf16 %v411_v58, %v403_v53  ;;  %v419_v31 = vld [vmem:[%s4642_s27 + $0x518] sm:$0xff]  ;;  %v416_v37 = vld [vmem:[%s4642_s27 + $0x500] sm:$0xff] }
  0xe8   : > { %6398 = vst [vmem:[#allocation10_spill] sm:$0xff] %v4910_v51  ;;  %6402 = vst [vmem:[#allocation14_spill] sm:$0xff] %v4934_v30  ;;  %v424_v38 = vld [vmem:[%s4642_s27 + $0x540] sm:$0xff] }
  0xe9   : > { %6400 = vst [vmem:[#allocation12_spill] sm:$0xff] %v4917_v9  ;;  %v4953_v3 = vpack.c.bf16 %v424_v38, %v416_v37 }
  0xeb   : > { %6405 = vst [vmem:[#allocation17_spill] sm:$0xff] %v4953_v3 }
  0xec   : > { %2221 = vmatmul.mubr.bf16.gmra.mxu0 %v4881_v6  ;;  %2382 = vmatmul.mubr.bf16.gmra.mxu1 %v4886_v13 }
  0xed   : > { %2455 = vmatpush1.bf16.xpose.msra.mxu0 %v3945_v12  ;;  %2616 = vmatpush1.bf16.xpose.msra.mxu1 %v3947_v17  ;;  %v666_v12 = vld [vmem:[%s4620_s8 + $0x350] sm:$0xff]  ;;  %v671_v17 = vld [vmem:[%s4620_s8 + $0x378] sm:$0xff] }
  0xee   : > { %2456 = vmatprep.subr.bf16.mxu0 %v4066_v18  ;;  %2617 = vmatprep.subr.bf16.mxu1 %v4068_v19  ;;  %v4929_v18 = vpack.c.bf16 %v408_v2, %v400_v1  ;;  %v417_v19 = vld [vmem:[%s4642_s27 + $0x508] sm:$0xff]  ;;  %v4052_v53 = vcombine.high %v667_v16, %v671_v17  ;;  %v659_v1 = vld [vmem:[%s4620_s8 + $0x318] sm:$0xff] }
  0xef   : > { %2230 = vmatprep.mubr.bf16.mxu0 %v4890_v24  ;;  %2391 = vmatprep.mubr.bf16.mxu1 %v4893_v27  ;;  %v4938_v58 = vpack.c.bf16 %v425_v28, %v417_v19  ;;  %v663_v2 = vld [vmem:[%s4620_s8 + $0x338] sm:$0xff]  ;;  %v441_v19 = vld [vmem:[%s4642_s27 + $0x5c8] sm:$0xff]  ;;  %v4049_v28 = vcombine.low %v666_v12, %v670_v15 }
  0xf0   : > { %6401 = vst [vmem:[#allocation13_spill] sm:$0xff] %v4929_v18  ;;  %v4962_v37 = vpack.c.bf16 %v441_v19, %v433_v5  ;;  %v651_v5 = vld [vmem:[%s4620_s8 + $0x2d8] sm:$0xff] }
  0xf1   : > { %6403 = vst [vmem:[#allocation15_spill] sm:$0xff] %v4938_v58  ;;  %v655_v19 = vld [vmem:[%s4620_s8 + $0x2f8] sm:$0xff] }
  0xf2   : > { %6407 = vst [vmem:[#allocation19_spill] sm:$0xff] %v4962_v37 }
  0xf4   : > { %2231 = vmatmul.mubr.bf16.gmra.mxu0 %v4905_v43  ;;  %2392 = vmatmul.mubr.bf16.gmra.mxu1 %v4910_v51 }
  0xf5   : > { %2457 = vmatpush2.bf16.xpose.msra.mxu0 %v4065_v50  ;;  %2618 = vmatpush2.bf16.xpose.msra.mxu1 %v4067_v59  ;;  %v4050_v50 = vcombine.high %v666_v12, %v670_v15  ;;  %v4941_v59 = vpack.c.bf16 %v427_v46, %v419_v31  ;;  %v435_v31 = vld [vmem:[%s4642_s27 + $0x598] sm:$0xff]  ;;  %v432_v12 = vld [vmem:[%s4642_s27 + $0x580] sm:$0xff] }
  0xf6   : > { %2458 = vmatprep.subr.bf16.mxu0 %v4058_v62  ;;  %2619 = vmatprep.subr.bf16.mxu1 %v4060_v63  ;;  %v658_v62 = vld [vmem:[%s4620_s8 + $0x310] sm:$0xff]  ;;  %v443_v46 = vld [vmem:[%s4642_s27 + $0x5d8] sm:$0xff]  ;;  %v440_v15 = vld [vmem:[%s4642_s27 + $0x5c0] sm:$0xff] }
  0xf7   : > { %2240 = vmatprep.mubr.bf16.mxu0 %v4914_v7  ;;  %2401 = vmatprep.mubr.bf16.mxu1 %v4917_v9  ;;  %6404 = vst [vmem:[#allocation16_spill] sm:$0xff] %v4941_v59  ;;  %v662_v63 = vld [vmem:[%s4620_s8 + $0x330] sm:$0xff]  ;;  %v4965_v38 = vpack.c.bf16 %v443_v46, %v435_v31  ;;  %v4977_v31 = vpack.c.bf16 %v440_v15, %v432_v12  ;;  %v643_v15 = vld [vmem:[%s4620_s8 + $0x298] sm:$0xff] }
  0xf8   : > { %v4041_v46 = vcombine.low %v658_v62, %v662_v63  ;;  %v423_v7 = vld [vmem:[%s4642_s27 + $0x538] sm:$0xff] }
  0xf9   : > { %6408 = vst [vmem:[#allocation20_spill] sm:$0xff] %v4965_v38  ;;  %6409 = vst [vmem:[#allocation21_spill] sm:$0xff] %v4977_v31 }
  0xfc   : > { %2241 = vmatmul.mubr.bf16.gmra.mxu0 %v4929_v18  ;;  %2402 = vmatmul.mubr.bf16.gmra.mxu1 %v4934_v30 }
  0xfd   : > { %2459 = vmatpush2.bf16.xpose.msra.mxu0 %v4057_v29  ;;  %2620 = vmatpush2.bf16.xpose.msra.mxu1 %v4059_v49  ;;  %v4958_v29 = vpack.c.bf16 %v426_v42, %v418_v41  ;;  %v4051_v49 = vcombine.low %v667_v16, %v671_v17  ;;  %v434_v16 = vld [vmem:[%s4642_s27 + $0x590] sm:$0xff] }
  0xfe   : > { %2460 = vmatprep.subr.bf16.mxu0 %v4050_v50  ;;  %2621 = vmatprep.subr.bf16.mxu1 %v4052_v53  ;;  %v4042_v50 = vcombine.high %v658_v62, %v662_v63  ;;  %v4044_v53 = vcombine.high %v659_v1, %v663_v2  ;;  %v442_v17 = vld [vmem:[%s4642_s27 + $0x5d0] sm:$0xff]  ;;  %v448_v62 = vld [vmem:[%s4642_s27 + $0x600] sm:$0xf] }
  0xff   : > { %2250 = vmatprep.mubr.bf16.mxu0 %v4938_v58  ;;  %2411 = vmatprep.mubr.bf16.mxu1 %v4941_v59  ;;  %6406 = vst [vmem:[#allocation18_spill] sm:$0xff] %v4958_v29  ;;  %v650_v41 = vld [vmem:[%s4620_s8 + $0x2d0] sm:$0xff] }
 0x100   : > { %v654_v42 = vld [vmem:[%s4620_s8 + $0x2f0] sm:$0xff] }
 0x101   : > { %v450_v63 = vld [vmem:[%s4642_s27 + $0x610] sm:$0xf] }
 0x104   : > { %2251 = vmatmul.mubr.bf16.gmra.mxu0 %v4953_v3  ;;  %2412 = vmatmul.mubr.bf16.gmra.mxu1 %v4958_v29  ;;  %v4034_v29 = vcombine.high %v650_v41, %v654_v42 }
 0x105   : > { %2461 = vmatpush2.bf16.xpose.msra.mxu0 %v4049_v28  ;;  %2622 = vmatpush2.bf16.xpose.msra.mxu1 %v4051_v49  ;;  %v449_v28 = vld [vmem:[%s4642_s27 + $0x608] sm:$0xf]  ;;  %v4981_v49 = vpack.c.bf16 %v442_v17, %v434_v16  ;;  %v647_v16 = vld [vmem:[%s4620_s8 + $0x2b8] sm:$0xff]  ;;  %v4997_v17 = vpack.c.bf16 %v448_v62, %v448_v62 }
 0x106   : > { %2462 = vmatprep.subr.bf16.mxu0 %v4042_v50  ;;  %2623 = vmatprep.subr.bf16.mxu1 %v4044_v53  ;;  %v451_v50 = vld [vmem:[%s4642_s27 + $0x618] sm:$0xf]  ;;  %v4043_v53 = vcombine.low %v659_v1, %v663_v2  ;;  %v4984_v3 = vpack.c.bf16 %v449_v28, %v449_v28  ;;  %v642_v1 = vld [vmem:[%s4620_s8 + $0x290] sm:$0xff]  ;;  %v261_v28 = vld [vmem:[%s4642_s27 + $0x28] sm:$0xff] }
 0x107   : > { %2260 = vmatprep.mubr.bf16.mxu0 %v4962_v37  ;;  %2421 = vmatprep.mubr.bf16.mxu1 %v4965_v38  ;;  %6410 = vst [vmem:[#allocation22_spill] sm:$0xff] %v4981_v49  ;;  %v4036_v37 = vcombine.high %v651_v5, %v655_v19  ;;  %v4987_v12 = vpack.c.bf16 %v451_v50, %v451_v50  ;;  %v646_v2 = vld [vmem:[%s4620_s8 + $0x2b0] sm:$0xff]  ;;  %6413 = vst [vmem:[#allocation25_spill] sm:$0xff] %v4997_v17 }
 0x108   : > { %6411 = vst [vmem:[#allocation23_spill] sm:$0xff] %v4984_v3  ;;  %v4033_v50 = vcombine.low %v650_v41, %v654_v42  ;;  %v4028_v38 = vcombine.high %v643_v15, %v647_v16  ;;  %v634_v41 = vld [vmem:[%s4620_s8 + $0x250] sm:$0xff] }
 0x109   : > { %6412 = vst [vmem:[#allocation24_spill] sm:$0xff] %v4987_v12  ;;  %v638_v42 = vld [vmem:[%s4620_s8 + $0x270] sm:$0xff] }
 0x10c   : > { %2261 = vmatmul.mubr.bf16.gmra.mxu0 %v4977_v31  ;;  %2422 = vmatmul.mubr.bf16.gmra.mxu1 %v4981_v49  ;;  %v4035_v49 = vcombine.low %v651_v5, %v655_v19  ;;  %v4026_v31 = vcombine.high %v642_v1, %v646_v2  ;;  %v635_v5 = vld [vmem:[%s4620_s8 + $0x258] sm:$0xff] }
 0x10d   : > { %2463 = vmatpush2.bf16.xpose.msra.mxu0 %v4041_v46  ;;  %2624 = vmatpush2.bf16.xpose.msra.mxu1 %v4043_v53  ;;  %v269_v46 = vld [vmem:[%s4642_s27 + $0x68] sm:$0xff]  ;;  %v5002_v53 = vpack.c.bf16 %v450_v63, %v450_v63  ;;  %v639_v19 = vld [vmem:[%s4620_s8 + $0x278] sm:$0xff]  ;;  %v4025_v63 = vcombine.low %v642_v1, %v646_v2  ;;  %v744_v2 = vld [vmem:[%s4620_s8 + $0x5c0] sm:$0xff] }
 0x10e   : > { %2464 = vmatprep.subr.bf16.mxu0 %v4034_v29  ;;  %2625 = vmatprep.subr.bf16.mxu1 %v4036_v37  ;;  %v263_v29 = vld [vmem:[%s4642_s27 + $0x38] sm:$0xff] }
 0x10f   : > { %2270 = vmatprep.mubr.bf16.mxu0 %v4984_v3  ;;  %2431 = vmatprep.mubr.bf16.mxu1 %v4987_v12  ;;  %6414 = vst [vmem:[#allocation26_spill] sm:$0xff] %v5002_v53  ;;  %v271_v37 = vld [vmem:[%s4642_s27 + $0x78] sm:$0xff]  ;;  %v5006_v3 = vpack.c.bf16 %v269_v46, %v261_v28  ;;  %v4027_v28 = vcombine.low %v643_v15, %v647_v16  ;;  %v748_v15 = vld [vmem:[%s4620_s8 + $0x5e0] sm:$0xff]  ;;  %v745_v16 = vld [vmem:[%s4620_s8 + $0x5c8] sm:$0xff] }
 0x110   : > { %v5009_v62 = vpack.c.bf16 %v271_v37, %v263_v29  ;;  %v4018_v46 = vcombine.high %v634_v41, %v638_v42  ;;  %v631_v29 = vld [vmem:[%s4620_s8 + $0x238] sm:$0xff]  ;;  %v4017_v37 = vcombine.low %v634_v41, %v638_v42  ;;  %v4126_v42 = vcombine.high %v744_v2, %v748_v15 }
 0x111   : > { %6415 = vst [vmem:[#allocation27_spill] sm:$0xff] %v5006_v3 }
 0x112   : > { %6416 = vst [vmem:[#allocation28_spill] sm:$0xff] %v5009_v62 }
 0x114   : > { %2271 = vmatmul.mubr.bf16.gmra.mxu0 %v4997_v17  ;;  %2432 = vmatmul.mubr.bf16.gmra.mxu1 %v5002_v53  ;;  %v4125_v53 = vcombine.low %v744_v2, %v748_v15  ;;  %v287_v17 = vld [vmem:[%s4642_s27 + $0xf8] sm:$0xff]  ;;  %v276_v2 = vld [vmem:[%s4642_s27 + $0xa0] sm:$0xff] }
 0x115   : > { %2465 = vmatpush2.bf16.xpose.msra.mxu0 %v4033_v50  ;;  %2626 = vmatpush2.bf16.xpose.msra.mxu1 %v4035_v49  ;;  %v4020_v50 = vcombine.high %v635_v5, %v639_v19  ;;  %v627_v49 = vld [vmem:[%s4620_s8 + $0x218] sm:$0xff]  ;;  %v284_v15 = vld [vmem:[%s4642_s27 + $0xe0] sm:$0xff] }
 0x116   : > { %2466 = vmatprep.subr.bf16.mxu0 %v4026_v31  ;;  %2627 = vmatprep.subr.bf16.mxu1 %v4028_v38  ;;  %v626_v38 = vld [vmem:[%s4620_s8 + $0x210] sm:$0xff]  ;;  %v4012_v1 = vcombine.high %v627_v49, %v631_v29  ;;  %v4011_v41 = vcombine.low %v627_v49, %v631_v29  ;;  %v737_v49 = vld [vmem:[%s4620_s8 + $0x588] sm:$0xff] }
 0x117   : > { %2472 = vmatprep.mubr.bf16.mxu0 %v5006_v3  ;;  %2633 = vmatprep.mubr.bf16.mxu1 %v5009_v62  ;;  %v630_v31 = vld [vmem:[%s4620_s8 + $0x230] sm:$0xff]  ;;  %v4019_v3 = vcombine.low %v635_v5, %v639_v19  ;;  %v260_v19 = vld [vmem:[%s4642_s27 + $0x20] sm:$0xff]  ;;  %v741_v29 = vld [vmem:[%s4620_s8 + $0x5a8] sm:$0xff] }
 0x118   : > { %v4010_v62 = vcombine.high %v626_v38, %v630_v31 }
 0x11d   : > { %2467 = vmatpush2.bf16.xpose.msra.mxu0 %v4025_v63  ;;  %2628 = vmatpush2.bf16.xpose.msra.mxu1 %v4027_v28  ;;  %v749_v63 = vld [vmem:[%s4620_s8 + $0x5e8] sm:$0xff]  ;;  %v4009_v28 = vcombine.low %v626_v38, %v630_v31  ;;  %v740_v31 = vld [vmem:[%s4620_s8 + $0x5a0] sm:$0xff] }
 0x11e   : > { %2468 = vmatprep.subr.bf16.mxu0 %v4018_v46  ;;  %2629 = vmatprep.subr.bf16.mxu1 %v4020_v50  ;;  %v4128_v5 = vcombine.high %v745_v16, %v749_v63  ;;  %v270_v46 = vld [vmem:[%s4642_s27 + $0x70] sm:$0xff]  ;;  %v277_v50 = vld [vmem:[%s4642_s27 + $0xa8] sm:$0xff]  ;;  %v4127_v12 = vcombine.low %v745_v16, %v749_v63 }
 0x11f   : > { %v278_v16 = vld [vmem:[%s4642_s27 + $0xb0] sm:$0xff] }
 0x120   : > { %v286_v63 = vld [vmem:[%s4642_s27 + $0xf0] sm:$0xff] }
 0x125   : > { %2469 = vmatpush2.bf16.xpose.msra.mxu0 %v4017_v37  ;;  %2630 = vmatpush2.bf16.xpose.msra.mxu1 %v4019_v3  ;;  %v268_v3 = vld [vmem:[%s4642_s27 + $0x60] sm:$0xff]  ;;  %v285_v37 = vld [vmem:[%s4642_s27 + $0xe8] sm:$0xff] }
 0x126   : > { %2470 = vmatprep.subr.bf16.mxu0 %v4010_v62  ;;  %2631 = vmatprep.subr.bf16.mxu1 %v4012_v1  ;;  %v262_v62 = vld [vmem:[%s4642_s27 + $0x30] sm:$0xff]  ;;  %v736_v1 = vld [vmem:[%s4620_s8 + $0x580] sm:$0xff]  ;;  %v5033_v38 = vpack.c.bf16 %v268_v3, %v260_v19  ;;  %v4120_v19 = vcombine.high %v737_v49, %v741_v29 }
 0x128   : > { %6417 = vst [vmem:[#allocation29_spill] sm:$0xff] %v5033_v38 }
 0x12d   : > { %2471 = vmatpush2.bf16.xpose.msra.mxu0 %v4009_v28  ;;  %2632 = vmatpush2.bf16.xpose.msra.mxu1 %v4011_v41  ;;  %v5038_v28 = vpack.c.bf16 %v270_v46, %v262_v62  ;;  %v279_v41 = vld [vmem:[%s4642_s27 + $0xb8] sm:$0xff]  ;;  %v293_v62 = vld [vmem:[%s4642_s27 + $0x128] sm:$0xff]  ;;  %v728_v46 = vld [vmem:[%s4620_s8 + $0x540] sm:$0xff] }
 0x12e   : > { %2762 = vmatprep.subr.bf16.mxu0 %v4126_v42  ;;  %2923 = vmatprep.subr.bf16.mxu1 %v4128_v5  ;;  %v5042_v42 = vpack.c.bf16 %v285_v37, %v277_v50  ;;  %v4118_v5 = vcombine.high %v736_v1, %v740_v31  ;;  %v5045_v3 = vpack.c.bf16 %v287_v17, %v279_v41  ;;  %v301_v17 = vld [vmem:[%s4642_s27 + $0x168] sm:$0xff] }
 0x12f   : > { %6418 = vst [vmem:[#allocation30_spill] sm:$0xff] %v5038_v28  ;;  %v5056_v50 = vpack.c.bf16 %v284_v15, %v276_v2  ;;  %v729_v37 = vld [vmem:[%s4620_s8 + $0x548] sm:$0xff]  ;;  %v4117_v41 = vcombine.low %v736_v1, %v740_v31  ;;  %v292_v1 = vld [vmem:[%s4642_s27 + $0x120] sm:$0xff] }
 0x130   : > { %6419 = vst [vmem:[#allocation31_spill] sm:$0xff] %v5042_v42  ;;  %6420 = vst [vmem:[#allocation32_spill] sm:$0xff] %v5045_v3  ;;  %v300_v31 = vld [vmem:[%s4642_s27 + $0x160] sm:$0xff] }
 0x131   : > { %6421 = vst [vmem:[#allocation33_spill] sm:$0xff] %v5056_v50 }
 0x134   : > { %2473 = vmatmul.mubr.bf16.vlgmr.msra.gmra.mxu0 %v5033_v38  ;;  %2634 = vmatmul.mubr.bf16.vlgmr.msra.gmra.mxu1 %v5038_v28  ;;  %v295_v28 = vld [vmem:[%s4642_s27 + $0x138] sm:$0xff]  ;;  %v5066_v38 = vpack.c.bf16 %v301_v17, %v293_v62  ;;  %v5080_v62 = vpack.c.bf16 %v300_v31, %v292_v1  ;;  %v724_v17 = vld [vmem:[%s4620_s8 + $0x520] sm:$0xff] }
 0x135   : > { %2763 = vmatpush1.bf16.xpose.msra.mxu0 %v4125_v53  ;;  %2924 = vmatpush1.bf16.xpose.msra.mxu1 %v4127_v12  ;;  %v732_v53 = vld [vmem:[%s4620_s8 + $0x560] sm:$0xff]  ;;  %v733_v12 = vld [vmem:[%s4620_s8 + $0x568] sm:$0xff] }
 0x136   : > { %2482 = vmatprep.mubr.bf16.mxu0 %v5042_v42  ;;  %2764 = vmatprep.subr.bf16.mxu0 %v4118_v5  ;;  %v5062_v42 = vpack.c.bf16 %v286_v63, %v278_v16  ;;  %v303_v5 = vld [vmem:[%s4642_s27 + $0x178] sm:$0xff]  ;;  %6423 = vst [vmem:[#allocation35_spill] sm:$0xff] %v5066_v38  ;;  %v4110_v2 = vcombine.high %v728_v46, %v732_v53  ;;  %v309_v16 = vld [vmem:[%s4642_s27 + $0x1a8] sm:$0xff]  ;;  %v720_v63 = vld [vmem:[%s4620_s8 + $0x500] sm:$0xff] }
 0x137   : > { %2925 = vmatprep.subr.bf16.mxu1 %v4120_v19  ;;  %2643 = vmatprep.mubr.bf16.mxu1 %v5045_v3  ;;  %v4119_v19 = vcombine.low %v737_v49, %v741_v29  ;;  %v4112_v15 = vcombine.high %v729_v37, %v733_v12  ;;  %v5069_v3 = vpack.c.bf16 %v303_v5, %v295_v28  ;;  %v294_v49 = vld [vmem:[%s4642_s27 + $0x130] sm:$0xff]  ;;  %v317_v28 = vld [vmem:[%s4642_s27 + $0x1e8] sm:$0xff] }
 0x138   : > { %6422 = vst [vmem:[#allocation34_spill] sm:$0xff] %v5062_v42  ;;  %v302_v29 = vld [vmem:[%s4642_s27 + $0x170] sm:$0xff]  ;;  %6425 = vst [vmem:[#allocation37_spill] sm:$0xff] %v5080_v62  ;;  %v725_v5 = vld [vmem:[%s4620_s8 + $0x528] sm:$0xff]  ;;  %v4102_v1 = vcombine.high %v720_v63, %v724_v17 }
 0x139   : > { %6424 = vst [vmem:[#allocation36_spill] sm:$0xff] %v5069_v3 }
 0x13c   : > { %2483 = vmatmul.mubr.bf16.gmra.mxu0 %v5056_v50  ;;  %2644 = vmatmul.mubr.bf16.gmra.mxu1 %v5062_v42  ;;  %v311_v42 = vld [vmem:[%s4642_s27 + $0x1b8] sm:$0xff]  ;;  %v5090_v50 = vpack.c.bf16 %v317_v28, %v309_v16  ;;  %v716_v28 = vld [vmem:[%s4620_s8 + $0x4e0] sm:$0xff] }
 0x13d   : > { %2765 = vmatpush1.bf16.xpose.msra.mxu0 %v4117_v41  ;;  %2926 = vmatpush1.bf16.xpose.msra.mxu1 %v4119_v19  ;;  %v721_v41 = vld [vmem:[%s4620_s8 + $0x508] sm:$0xff]  ;;  %v4109_v19 = vcombine.low %v728_v46, %v732_v53  ;;  %v308_v46 = vld [vmem:[%s4642_s27 + $0x1a0] sm:$0xff] }
 0x13e   : > { %2492 = vmatprep.mubr.bf16.mxu0 %v5066_v38  ;;  %2766 = vmatprep.subr.bf16.mxu0 %v4110_v2  ;;  %v5086_v38 = vpack.c.bf16 %v302_v29, %v294_v49  ;;  %v319_v2 = vld [vmem:[%s4642_s27 + $0x1f8] sm:$0xff]  ;;  %6427 = vst [vmem:[#allocation39_spill] sm:$0xff] %v5090_v50  ;;  %v4104_v31 = vcombine.high %v721_v41, %v725_v5  ;;  %v316_v53 = vld [vmem:[%s4642_s27 + $0x1e0] sm:$0xff]  ;;  %v325_v49 = vld [vmem:[%s4642_s27 + $0x228] sm:$0xff] }
 0x13f   : > { %2927 = vmatprep.subr.bf16.mxu1 %v4112_v15  ;;  %2653 = vmatprep.mubr.bf16.mxu1 %v5069_v3  ;;  %v4111_v15 = vcombine.low %v729_v37, %v733_v12  ;;  %v5093_v3 = vpack.c.bf16 %v319_v2, %v311_v42  ;;  %v310_v37 = vld [vmem:[%s4642_s27 + $0x1b0] sm:$0xff]  ;;  %v333_v42 = vld [vmem:[%s4642_s27 + $0x268] sm:$0xff]  ;;  %v712_v29 = vld [vmem:[%s4620_s8 + $0x4c0] sm:$0xff]  ;;  %v5104_v16 = vpack.c.bf16 %v316_v53, %v308_v46 }
 0x140   : > { %6426 = vst [vmem:[#allocation38_spill] sm:$0xff] %v5086_v38  ;;  %v318_v12 = vld [vmem:[%s4642_s27 + $0x1f0] sm:$0xff]  ;;  %v717_v2 = vld [vmem:[%s4620_s8 + $0x4e8] sm:$0xff]  ;;  %v4094_v46 = vcombine.high %v712_v29, %v716_v28 }
 0x141   : > { %6428 = vst [vmem:[#allocation40_spill] sm:$0xff] %v5093_v3  ;;  %6429 = vst [vmem:[#allocation41_spill] sm:$0xff] %v5104_v16 }
 0x144   : > { %2493 = vmatmul.mubr.bf16.gmra.mxu0 %v5080_v62  ;;  %2654 = vmatmul.mubr.bf16.gmra.mxu1 %v5086_v38  ;;  %v327_v38 = vld [vmem:[%s4642_s27 + $0x238] sm:$0xff]  ;;  %v5114_v62 = vpack.c.bf16 %v333_v42, %v325_v49  ;;  %v708_v42 = vld [vmem:[%s4620_s8 + $0x4a0] sm:$0xff] }
 0x145   : > { %2767 = vmatpush1.bf16.xpose.msra.mxu0 %v4109_v19  ;;  %2928 = vmatpush1.bf16.xpose.msra.mxu1 %v4111_v15  ;;  %v713_v19 = vld [vmem:[%s4620_s8 + $0x4c8] sm:$0xff]  ;;  %v4101_v15 = vcombine.low %v720_v63, %v724_v17  ;;  %v324_v63 = vld [vmem:[%s4642_s27 + $0x220] sm:$0xff] }
 0x146   : > { %2502 = vmatprep.mubr.bf16.mxu0 %v5090_v50  ;;  %2768 = vmatprep.subr.bf16.mxu0 %v4102_v1  ;;  %v5110_v50 = vpack.c.bf16 %v318_v12, %v310_v37  ;;  %v335_v1 = vld [vmem:[%s4642_s27 + $0x278] sm:$0xff]  ;;  %6431 = vst [vmem:[#allocation43_spill] sm:$0xff] %v5114_v62  ;;  %v4096_v53 = vcombine.high %v713_v19, %v717_v2  ;;  %v332_v17 = vld [vmem:[%s4642_s27 + $0x260] sm:$0xff]  ;;  %v341_v37 = vld [vmem:[%s4642_s27 + $0x2a8] sm:$0xff] }
 0x147   : > { %2929 = vmatprep.subr.bf16.mxu1 %v4104_v31  ;;  %2663 = vmatprep.mubr.bf16.mxu1 %v5093_v3  ;;  %v4103_v31 = vcombine.low %v721_v41, %v725_v5  ;;  %v5117_v3 = vpack.c.bf16 %v335_v1, %v327_v38  ;;  %v326_v41 = vld [vmem:[%s4642_s27 + $0x230] sm:$0xff]  ;;  %v349_v38 = vld [vmem:[%s4642_s27 + $0x2e8] sm:$0xff]  ;;  %v704_v12 = vld [vmem:[%s4620_s8 + $0x480] sm:$0xff]  ;;  %v5128_v49 = vpack.c.bf16 %v332_v17, %v324_v63 }
 0x148   : > { %6430 = vst [vmem:[#allocation42_spill] sm:$0xff] %v5110_v50  ;;  %v334_v5 = vld [vmem:[%s4642_s27 + $0x270] sm:$0xff]  ;;  %v709_v1 = vld [vmem:[%s4620_s8 + $0x4a8] sm:$0xff]  ;;  %v4086_v63 = vcombine.high %v704_v12, %v708_v42 }
 0x149   : > { %6432 = vst [vmem:[#allocation44_spill] sm:$0xff] %v5117_v3  ;;  %6433 = vst [vmem:[#allocation45_spill] sm:$0xff] %v5128_v49 }
 0x14c   : > { %2503 = vmatmul.mubr.bf16.gmra.mxu0 %v5104_v16  ;;  %2664 = vmatmul.mubr.bf16.gmra.mxu1 %v5110_v50  ;;  %v343_v50 = vld [vmem:[%s4642_s27 + $0x2b8] sm:$0xff]  ;;  %v5138_v16 = vpack.c.bf16 %v349_v38, %v341_v37  ;;  %v700_v38 = vld [vmem:[%s4620_s8 + $0x460] sm:$0xff] }
 0x14d   : > { %2769 = vmatpush1.bf16.xpose.msra.mxu0 %v4101_v15  ;;  %2930 = vmatpush1.bf16.xpose.msra.mxu1 %v4103_v31  ;;  %v705_v15 = vld [vmem:[%s4620_s8 + $0x488] sm:$0xff]  ;;  %v4093_v31 = vcombine.low %v712_v29, %v716_v28  ;;  %v340_v29 = vld [vmem:[%s4642_s27 + $0x2a0] sm:$0xff] }
 0x14e   : > { %2512 = vmatprep.mubr.bf16.mxu0 %v5114_v62  ;;  %2770 = vmatprep.subr.bf16.mxu0 %v4094_v46  ;;  %v5134_v62 = vpack.c.bf16 %v334_v5, %v326_v41  ;;  %v351_v46 = vld [vmem:[%s4642_s27 + $0x2f8] sm:$0xff]  ;;  %6435 = vst [vmem:[#allocation47_spill] sm:$0xff] %v5138_v16  ;;  %v4088_v17 = vcombine.high %v705_v15, %v709_v1  ;;  %v348_v28 = vld [vmem:[%s4642_s27 + $0x2e0] sm:$0xff]  ;;  %v357_v41 = vld [vmem:[%s4642_s27 + $0x328] sm:$0xff] }
 0x14f   : > { %2931 = vmatprep.subr.bf16.mxu1 %v4096_v53  ;;  %2673 = vmatprep.mubr.bf16.mxu1 %v5117_v3  ;;  %v4095_v53 = vcombine.low %v713_v19, %v717_v2  ;;  %v5141_v3 = vpack.c.bf16 %v351_v46, %v343_v50  ;;  %v342_v19 = vld [vmem:[%s4642_s27 + $0x2b0] sm:$0xff]  ;;  %v365_v50 = vld [vmem:[%s4642_s27 + $0x368] sm:$0xff]  ;;  %v696_v5 = vld [vmem:[%s4620_s8 + $0x440] sm:$0xff]  ;;  %v5152_v37 = vpack.c.bf16 %v348_v28, %v340_v29 }
 0x150   : > { %6434 = vst [vmem:[#allocation46_spill] sm:$0xff] %v5134_v62  ;;  %v350_v2 = vld [vmem:[%s4642_s27 + $0x2f0] sm:$0xff]  ;;  %v701_v46 = vld [vmem:[%s4620_s8 + $0x468] sm:$0xff]  ;;  %v4078_v29 = vcombine.high %v696_v5, %v700_v38 }
 0x151   : > { %6436 = vst [vmem:[#allocation48_spill] sm:$0xff] %v5141_v3  ;;  %6437 = vst [vmem:[#allocation49_spill] sm:$0xff] %v5152_v37 }
 0x154   : > { %2513 = vmatmul.mubr.bf16.gmra.mxu0 %v5128_v49  ;;  %2674 = vmatmul.mubr.bf16.gmra.mxu1 %v5134_v62  ;;  %v359_v62 = vld [vmem:[%s4642_s27 + $0x338] sm:$0xff]  ;;  %v5162_v49 = vpack.c.bf16 %v365_v50, %v357_v41  ;;  %v692_v50 = vld [vmem:[%s4620_s8 + $0x420] sm:$0xff] }
 0x155   : > { %2771 = vmatpush1.bf16.xpose.msra.mxu0 %v4093_v31  ;;  %2932 = vmatpush1.bf16.xpose.msra.mxu1 %v4095_v53  ;;  %v697_v31 = vld [vmem:[%s4620_s8 + $0x448] sm:$0xff]  ;;  %v4085_v53 = vcombine.low %v704_v12, %v708_v42  ;;  %v356_v12 = vld [vmem:[%s4642_s27 + $0x320] sm:$0xff] }
 0x156   : > { %2522 = vmatprep.mubr.bf16.mxu0 %v5138_v16  ;;  %2772 = vmatprep.subr.bf16.mxu0 %v4086_v63  ;;  %v5158_v16 = vpack.c.bf16 %v350_v2, %v342_v19  ;;  %v367_v63 = vld [vmem:[%s4642_s27 + $0x378] sm:$0xff]  ;;  %6439 = vst [vmem:[#allocation51_spill] sm:$0xff] %v5162_v49  ;;  %v4080_v28 = vcombine.high %v697_v31, %v701_v46  ;;  %v364_v42 = vld [vmem:[%s4642_s27 + $0x360] sm:$0xff]  ;;  %v381_v19 = vld [vmem:[%s4642_s27 + $0x3e8] sm:$0xff] }
 0x157   : > { %2933 = vmatprep.subr.bf16.mxu1 %v4088_v17  ;;  %2683 = vmatprep.mubr.bf16.mxu1 %v5141_v3  ;;  %v4087_v17 = vcombine.low %v705_v15, %v709_v1  ;;  %v5165_v3 = vpack.c.bf16 %v367_v63, %v359_v62  ;;  %v358_v15 = vld [vmem:[%s4642_s27 + $0x330] sm:$0xff]  ;;  %v373_v62 = vld [vmem:[%s4642_s27 + $0x3a8] sm:$0xff]  ;;  %v688_v2 = vld [vmem:[%s4620_s8 + $0x400] sm:$0xff]  ;;  %v5176_v41 = vpack.c.bf16 %v364_v42, %v356_v12 }
 0x158   : > { %6438 = vst [vmem:[#allocation50_spill] sm:$0xff] %v5158_v16  ;;  %v366_v1 = vld [vmem:[%s4642_s27 + $0x370] sm:$0xff]  ;;  %v693_v63 = vld [vmem:[%s4620_s8 + $0x428] sm:$0xff]  ;;  %v5189_v12 = vpack.c.bf16 %v381_v19, %v373_v62  ;;  %v4070_v42 = vcombine.high %v688_v2, %v692_v50 }
 0x159   : > { %6440 = vst [vmem:[#allocation52_spill] sm:$0xff] %v5165_v3  ;;  %6441 = vst [vmem:[#allocation53_spill] sm:$0xff] %v5176_v41  ;;  %v389_v62 = vld [vmem:[%s4642_s27 + $0x428] sm:$0xff] }
 0x15a   : > { %6443 = vst [vmem:[#allocation55_spill] sm:$0xff] %v5189_v12  ;;  %v397_v19 = vld [vmem:[%s4642_s27 + $0x468] sm:$0xff] }
 0x15c   : > { %2523 = vmatmul.mubr.bf16.gmra.mxu0 %v5152_v37  ;;  %2684 = vmatmul.mubr.bf16.gmra.mxu1 %v5158_v16  ;;  %v4079_v16 = vcombine.low %v697_v31, %v701_v46  ;;  %v380_v31 = vld [vmem:[%s4642_s27 + $0x3e0] sm:$0xff]  ;;  %v809_v46 = vld [vmem:[%s4620_s8 + $0x7c8] sm:$0xff]  ;;  %v399_v37 = vld [vmem:[%s4642_s27 + $0x478] sm:$0xff] }
 0x15d   : > { %2773 = vmatpush1.bf16.xpose.msra.mxu0 %v4085_v53  ;;  %2934 = vmatpush1.bf16.xpose.msra.mxu1 %v4087_v17  ;;  %v689_v53 = vld [vmem:[%s4620_s8 + $0x408] sm:$0xff]  ;;  %v4077_v17 = vcombine.low %v696_v5, %v700_v38  ;;  %v372_v38 = vld [vmem:[%s4642_s27 + $0x3a0] sm:$0xff] }
 0x15e   : > { %2532 = vmatprep.mubr.bf16.mxu0 %v5162_v49  ;;  %2774 = vmatprep.subr.bf16.mxu0 %v4078_v29  ;;  %v5185_v49 = vpack.c.bf16 %v366_v1, %v358_v15  ;;  %v375_v29 = vld [vmem:[%s4642_s27 + $0x3b8] sm:$0xff]  ;;  %v374_v15 = vld [vmem:[%s4642_s27 + $0x3b0] sm:$0xff]  ;;  %v4071_v59 = vcombine.low %v689_v53, %v693_v63 }
 0x15f   : > { %2935 = vmatprep.subr.bf16.mxu1 %v4080_v28  ;;  %2693 = vmatprep.mubr.bf16.mxu1 %v5165_v3  ;;  %v383_v28 = vld [vmem:[%s4642_s27 + $0x3f8] sm:$0xff]  ;;  %v4072_v3 = vcombine.high %v689_v53, %v693_v63  ;;  %v382_v1 = vld [vmem:[%s4642_s27 + $0x3f0] sm:$0xff]  ;;  %v388_v63 = vld [vmem:[%s4642_s27 + $0x420] sm:$0xff] }
 0x160   : > { %6442 = vst [vmem:[#allocation54_spill] sm:$0xff] %v5185_v49  ;;  %v5193_v5 = vpack.c.bf16 %v383_v28, %v375_v29  ;;  %v5207_v29 = vpack.c.bf16 %v380_v31, %v372_v38  ;;  %v812_v28 = vld [vmem:[%s4620_s8 + $0x7e0] sm:$0xff]  ;;  %v5220_v38 = vpack.c.bf16 %v397_v19, %v389_v62  ;;  %v390_v62 = vld [vmem:[%s4642_s27 + $0x430] sm:$0xff] }
 0x161   : > { %v398_v19 = vld [vmem:[%s4642_s27 + $0x470] sm:$0xff] }
 0x162   : > { %6444 = vst [vmem:[#allocation56_spill] sm:$0xff] %v5193_v5  ;;  %6445 = vst [vmem:[#allocation57_spill] sm:$0xff] %v5207_v29  ;;  %v5252_v30 = vpack.c.bf16 %v398_v19, %v390_v62  ;;  %v406_v62 = vld [vmem:[%s4642_s27 + $0x4b0] sm:$0xff] }
 0x163   : > { %6449 = vst [vmem:[#allocation60_spill] sm:$0xff] %v5220_v38  ;;  %v414_v19 = vld [vmem:[%s4642_s27 + $0x4f0] sm:$0xff] }
 0x164   : > { %2533 = vmatmul.mubr.bf16.gmra.mxu0 %v5176_v41  ;;  %2694 = vmatmul.mubr.bf16.gmra.mxu1 %v5185_v49  ;;  %v5213_v49 = vpack.c.bf16 %v382_v1, %v374_v15  ;;  %v6447_v41 = vlaneseq  ;;  %v396_v15 = vld [vmem:[%s4642_s27 + $0x460] sm:$0xff]  ;;  %6452 = vst [vmem:[#allocation63_spill] sm:$0xff] %v5252_v30 }
 0x165   : > { %2775 = vmatpush1.bf16.xpose.msra.mxu0 %v4077_v17  ;;  %2936 = vmatpush1.bf16.xpose.msra.mxu1 %v4079_v16  ;;  %v808_v17 = vld [vmem:[%s4620_s8 + $0x7c0] sm:$0xff]  ;;  %v813_v16 = vld [vmem:[%s4620_s8 + $0x7e8] sm:$0xff] }
 0x166   : > { %2542 = vmatprep.mubr.bf16.mxu0 %v5189_v12  ;;  %2776 = vmatprep.subr.bf16.mxu0 %v4070_v42  ;;  %v4069_v12 = vcombine.low %v688_v2, %v692_v50  ;;  %6446 = vst [vmem:[#allocation58_spill] sm:$0xff] %v5213_v49  ;;  %v5216_v42 = vshrl.u32 %v6447_v41, 7  ;;  %v4190_v2 = vcombine.high %v808_v17, %v812_v28  ;;  %v816_v1 = vld [vmem:[%s5225_s13] sm:$0xf] }
 0x167   : > { %2937 = vmatprep.subr.bf16.mxu1 %v4072_v3  ;;  %2703 = vmatprep.mubr.bf16.mxu1 %v5193_v5  ;;  %v391_v3 = vld [vmem:[%s4642_s27 + $0x438] sm:$0xff]  ;;  %v4192_v50 = vcombine.high %v809_v46, %v813_v16  ;;  %v800_v41 = vld [vmem:[%s4620_s8 + $0x780] sm:$0xff]  ;;  %v4189_v58 = vcombine.low %v808_v17, %v812_v28 }
 0x168   : > { %6448 = vst [vmem:[#allocation59_spill] sm:$0xff] %v5216_v42  ;;  %v5228_v31 = vpack.c.bf16 %v399_v37, %v391_v3  ;;  %v820_v53 = vsub.s32 0, %v5216_v42  ;;  %v824_v37 = vsub.s32 1, %v5216_v42  ;;  %v413_v3 = vld [vmem:[%s4642_s27 + $0x4e8] sm:$0xff]  ;;  %v4191_v42 = vcombine.low %v809_v46, %v813_v16  ;;  %v404_v46 = vld [vmem:[%s4642_s27 + $0x4a0] sm:$0xff] }
 0x169   : > { %v412_v16 = vld [vmem:[%s4642_s27 + $0x4e0] sm:$0xff] }
 0x16a   : > { %6450 = vst [vmem:[#allocation61_spill] sm:$0xff] %v5228_v31  ;;  %v5250_v5 = vrot.slane %v816_v1, %v820_v53 }
 0x16c   : > { %2543 = vmatmul.mubr.bf16.gmra.mxu0 %v5207_v29  ;;  %2704 = vmatmul.mubr.bf16.gmra.mxu1 %v5213_v49  ;;  %v5242_v49 = vpack.c.bf16 %v396_v15, %v388_v63  ;;  %v804_v29 = vld [vmem:[%s4620_s8 + $0x7a0] sm:$0xff]  ;;  %v5258_v63 = vrot.slane %v816_v1, %v824_v37 }
 0x16d   : > { %2777 = vmatpush1.bf16.xpose.msra.mxu0 %v4069_v12  ;;  %2938 = vmatpush1.bf16.xpose.msra.mxu1 %v4071_v59  ;;  %v405_v12 = vld [vmem:[%s4642_s27 + $0x4a8] sm:$0xff]  ;;  %v4182_v15 = vcombine.high %v800_v41, %v804_v29 }
 0x16e   : > { %2552 = vmatprep.mubr.bf16.mxu0 %v5220_v38  ;;  %2778 = vmatprep.subr.bf16.mxu0 %v4190_v2  ;;  %6451 = vst [vmem:[#allocation62_spill] sm:$0xff] %v5242_v49  ;;  %v5247_v59 = vld [vmem:[%s4620_s8 + $0x788] sm:$0xff]  ;;  %v407_v2 = vld [vmem:[%s4642_s27 + $0x4b8] sm:$0xff]  ;;  %v5256_v18 = vpack.c.bf16 %v413_v3, %v405_v12 }
 0x16f   : > { %2939 = vmatprep.subr.bf16.mxu1 %v4192_v50  ;;  %2713 = vmatprep.mubr.bf16.mxu1 %v5228_v31  ;;  %v805_v38 = vld [vmem:[%s4620_s8 + $0x7a8] sm:$0xff]  ;;  %v415_v50 = vld [vmem:[%s4642_s27 + $0x4f8] sm:$0xff] }
 0x170   : > { %6453 = vst [vmem:[#allocation64_spill] sm:$0xff] %v5256_v18  ;;  %v4184_v31 = vcombine.high %v5247_v59, %v805_v38  ;;  %v5262_v17 = vpack.c.bf16 %v415_v50, %v407_v2  ;;  %v429_v3 = vld [vmem:[%s4642_s27 + $0x568] sm:$0xff]  ;;  %v5279_v50 = vpack.c.bf16 %v412_v16, %v404_v46  ;;  %v431_v46 = vld [vmem:[%s4642_s27 + $0x578] sm:$0xff] }
 0x172   : > { %6454 = vst [vmem:[#allocation65_spill] sm:$0xff] %v5262_v17  ;;  %6456 = vst [vmem:[#allocation67_spill] sm:$0xff] %v5279_v50 }
 0x174   : > { %v2152_v9 = vpop.f32.mrf.mxu0  ;;  %2553 = vmatmul.mubr.bf16.gmra.mxu0 %v5242_v49  ;;  %v2313_v53 = vpop.f32.mrf.mxu1  ;;  %2714 = vmatmul.mubr.bf16.gmra.mxu1 %v5252_v30  ;;  %v5284_v30 = vld [vmem:[%s4620_s8 + $0x748] sm:$0xff]  ;;  %v5292_v49 = vpack.c.bf16 %v414_v19, %v406_v62  ;;  %v5309_v62 = vpack.c.bf16 %v431_v46, %v423_v7  ;;  %v428_v19 = vld [vmem:[%s4642_s27 + $0x560] sm:$0xff]  ;;  %v430_v7 = vld [vmem:[%s4642_s27 + $0x570] sm:$0xff] }
 0x175   : > { %v2153_v28 = vadd.f32 %v2152_v9, %v5250_v5  ;;  %2779 = vmatpush2.bf16.xpose.msra.mxu0 %v4189_v58  ;;  %2940 = vmatpush2.bf16.xpose.msra.mxu1 %v4191_v42  ;;  %v421_v58 = vld [vmem:[%s4642_s27 + $0x528] sm:$0xff]  ;;  %v5277_v42 = vld [vmem:[%s4620_s8 + $0x740] sm:$0xff] }
 0x176   : > { %v2154_v1 = vpop.f32.mrf.mxu0  ;;  %2562 = vmatprep.mubr.bf16.mxu0 %v5256_v18  ;;  %v2315_v12 = vpop.f32.mrf.mxu1  ;;  %2780 = vmatprep.subr.bf16.mxu0 %v4182_v15  ;;  %v796_v18 = vld [vmem:[%s4620_s8 + $0x760] sm:$0xff]  ;;  %6458 = vst [vmem:[#allocation69_spill] sm:$0xff] %v5292_v49  ;;  %v5299_v51 = vpack.c.bf16 %v429_v3, %v421_v58  ;;  %6463 = vst [vmem:[#allocation74_spill] sm:$0xff] %v5309_v62  ;;  %v422_v3 = vld [vmem:[%s4642_s27 + $0x530] sm:$0xff] }
 0x177   : > { %v5271_v37 = vadd.f32 %v2313_v53, %v2153_v28  ;;  %v2155_v9 = vadd.f32 %v2154_v1, %v5258_v63  ;;  %2941 = vmatprep.subr.bf16.mxu1 %v4184_v31  ;;  %2723 = vmatprep.mubr.bf16.mxu1 %v5262_v17  ;;  %v5287_v28 = vld [vmem:[%s4620_s8 + $0x768] sm:$0xff]  ;;  %v4181_v1 = vcombine.low %v800_v41, %v804_v29 }
 0x178   : > { %v2156_v2 = vpop.f32.mrf.mxu0  ;;  %v2317_v31 = vpop.f32.mrf.mxu1  ;;  %v4183_v17 = vcombine.low %v5247_v59, %v805_v38  ;;  %6460 = vst [vmem:[#allocation71_spill] sm:$0xff] %v5299_v51  ;;  %v4174_v41 = vcombine.high %v5277_v42, %v796_v18  ;;  %v4176_v29 = vcombine.high %v5284_v30, %v5287_v28  ;;  %v420_v59 = vld [vmem:[%s4642_s27 + $0x520] sm:$0xff] }
 0x179   : > { %6455 = vst [vmem:[#allocation66_spill] sm:$0xff] %v5271_v37  ;;  %v5289_v53 = vadd.f32 %v2315_v12, %v2155_v9  ;;  %v2157_v15 = vadd.f32 %v2156_v2, %v5250_v5 }
 0x17a   : > { %v5296_v16 = vpop.f32.mrf.mxu0  ;;  %v5303_v9 = vpop.f32.mrf.mxu1 }
 0x17b   : > { %6457 = vst [vmem:[#allocation68_spill] sm:$0xff] %v5289_v53  ;;  %6459 = vst [vmem:[#allocation70_spill] sm:$0xff] %v5296_v16  ;;  %v5301_v37 = vadd.f32 %v2317_v31, %v2157_v15  ;;  %v437_v15 = vld [vmem:[%s4642_s27 + $0x5a8] sm:$0xff]  ;;  %v439_v53 = vld [vmem:[%s4642_s27 + $0x5b8] sm:$0xff] }
 0x17c   : > { %6462 = vst [vmem:[#allocation73_spill] sm:$0xff] %v5303_v9  ;;  %2563 = vmatmul.mubr.bf16.gmra.mxu0 %v5279_v50  ;;  %v2162_v38 = vpop.f32.mrf.mxu0  ;;  %2724 = vmatmul.mubr.bf16.gmra.mxu1 %v5292_v49  ;;  %v2323_v58 = vpop.f32.mrf.mxu1  ;;  %v445_v31 = vld [vmem:[%s4642_s27 + $0x5e8] sm:$0xff]  ;;  %v5326_v49 = vpack.c.bf16 %v428_v19, %v420_v59  ;;  %v5337_v9 = vpack.c.bf16 %v430_v7, %v422_v3  ;;  %v447_v16 = vld [vmem:[%s4642_s27 + $0x5f8] sm:$0xff] }
 0x17d   : > { %6461 = vst [vmem:[#allocation72_spill] sm:$0xff] %v5301_v37  ;;  %2781 = vmatpush2.bf16.xpose.msra.mxu0 %v4181_v1  ;;  %v2163_v12 = vadd.f32 %v2162_v38, %v5250_v5  ;;  %2942 = vmatpush2.bf16.xpose.msra.mxu1 %v4183_v17  ;;  %v5321_v1 = vld [vmem:[%s4620_s8 + $0x700] sm:$0xff]  ;;  %v5331_v50 = vld [vmem:[%s4620_s8 + $0x708] sm:$0xff]  ;;  %v4173_v37 = vcombine.low %v5277_v42, %v796_v18 }
 0x17e   : > { %2572 = vmatprep.mubr.bf16.mxu0 %v5299_v51  ;;  %v2164_v2 = vpop.f32.mrf.mxu0  ;;  %2782 = vmatprep.subr.bf16.mxu0 %v4174_v41  ;;  %v2325_v17 = vpop.f32.mrf.mxu1  ;;  %6465 = vst [vmem:[#allocation76_spill] sm:$0xff] %v5326_v49  ;;  %v788_v51 = vld [vmem:[%s4620_s8 + $0x720] sm:$0xff]  ;;  %v5334_v41 = vld [vmem:[%s4620_s8 + $0x728] sm:$0xff]  ;;  %6466 = vst [vmem:[#allocation77_spill] sm:$0xff] %v5337_v9 }
 0x17f   : > { %2943 = vmatprep.subr.bf16.mxu1 %v4176_v29  ;;  %v2165_v46 = vadd.f32 %v2164_v2, %v5258_v63  ;;  %v5324_v38 = vadd.f32 %v2323_v58, %v2163_v12  ;;  %2733 = vmatprep.mubr.bf16.mxu1 %v5309_v62  ;;  %v4175_v58 = vcombine.low %v5284_v30, %v5287_v28  ;;  %v436_v28 = vld [vmem:[%s4642_s27 + $0x5a0] sm:$0xff] }
 0x180   : > { %v2166_v29 = vpop.f32.mrf.mxu0  ;;  %v2327_v19 = vpop.f32.mrf.mxu1  ;;  %v5346_v2 = vpack.c.bf16 %v445_v31, %v437_v15  ;;  %v4166_v18 = vcombine.high %v5321_v1, %v788_v51  ;;  %v4168_v42 = vcombine.high %v5331_v50, %v5334_v41  ;;  %v444_v15 = vld [vmem:[%s4642_s27 + $0x5e0] sm:$0xff] }
 0x181   : > { %6464 = vst [vmem:[#allocation75_spill] sm:$0xff] %v5324_v38  ;;  %v2167_v12 = vadd.f32 %v2166_v29, %v5250_v5  ;;  %v5342_v59 = vadd.f32 %v2325_v17, %v2165_v46  ;;  %v5358_v46 = vpack.c.bf16 %v447_v16, %v439_v53  ;;  %v438_v29 = vld [vmem:[%s4642_s27 + $0x5b0] sm:$0xff]  ;;  %v776_v16 = vld [vmem:[%s4620_s8 + $0x6c0] sm:$0xff] }
 0x182   : > { %6468 = vst [vmem:[#allocation79_spill] sm:$0xff] %v5346_v2  ;;  %v5348_v62 = vpop.f32.mrf.mxu0  ;;  %v5355_v7 = vpop.f32.mrf.mxu1 }
 0x183   : > { %6467 = vst [vmem:[#allocation78_spill] sm:$0xff] %v5342_v59  ;;  %v5353_v3 = vadd.f32 %v2327_v19, %v2167_v12  ;;  %6470 = vst [vmem:[#allocation81_spill] sm:$0xff] %v5355_v7  ;;  %v446_v12 = vld [vmem:[%s4642_s27 + $0x5f0] sm:$0xff]  ;;  %v4165_v59 = vcombine.low %v5321_v1, %v788_v51 }
 0x184   : > { %2573 = vmatmul.mubr.bf16.gmra.mxu0 %v5326_v49  ;;  %6471 = vst [vmem:[#allocation82_spill] sm:$0xff] %v5358_v46  ;;  %v2172_v30 = vpop.f32.mrf.mxu0  ;;  %2734 = vmatmul.mubr.bf16.gmra.mxu1 %v5337_v9  ;;  %v2333_v17 = vpop.f32.mrf.mxu1  ;;  %v5372_v49 = vpack.c.bf16 %v444_v15, %v436_v28  ;;  %v5379_v38 = vpack.c.bf16 %v446_v12, %v438_v29 }
 0x185   : > { %6469 = vst [vmem:[#allocation80_spill] sm:$0xff] %v5353_v3  ;;  %2783 = vmatpush2.bf16.xpose.msra.mxu0 %v4173_v37  ;;  %v2173_v31 = vadd.f32 %v2172_v30, %v5250_v5  ;;  %2944 = vmatpush2.bf16.xpose.msra.mxu1 %v4175_v58  ;;  %v453_v37 = vld [vmem:[%s4642_s27 + $0x628] sm:$0xf]  ;;  %v780_v58 = vld [vmem:[%s4620_s8 + $0x6e0] sm:$0xff]  ;;  %v4167_v28 = vcombine.low %v5331_v50, %v5334_v41 }
 0x186   : > { %2582 = vmatprep.mubr.bf16.mxu0 %v5346_v2  ;;  %v2174_v53 = vpop.f32.mrf.mxu0  ;;  %2784 = vmatprep.subr.bf16.mxu0 %v4166_v18  ;;  %v2335_v30 = vpop.f32.mrf.mxu1  ;;  %6473 = vst [vmem:[#allocation84_spill] sm:$0xff] %v5372_v49  ;;  %v777_v3 = vld [vmem:[%s4620_s8 + $0x6c8] sm:$0xff]  ;;  %6474 = vst [vmem:[#allocation85_spill] sm:$0xff] %v5379_v38  ;;  %v455_v18 = vld [vmem:[%s4642_s27 + $0x638] sm:$0xf]  ;;  %v5387_v15 = vpack.c.bf16 %v453_v37, %v453_v37 }
 0x187   : > { %2945 = vmatprep.subr.bf16.mxu1 %v4168_v42  ;;  %v2175_v19 = vadd.f32 %v2174_v53, %v5258_v63  ;;  %v5370_v9 = vadd.f32 %v2333_v17, %v2173_v31  ;;  %2743 = vmatprep.mubr.bf16.mxu1 %v5358_v46  ;;  %v781_v2 = vld [vmem:[%s4620_s8 + $0x6e8] sm:$0xff]  ;;  %v4158_v46 = vcombine.high %v776_v16, %v780_v58  ;;  %v452_v50 = vld [vmem:[%s4642_s27 + $0x620] sm:$0xf]  ;;  %v454_v37 = vld [vmem:[%s4642_s27 + $0x630] sm:$0xf] }
 0x188   : > { %v2176_v7 = vpop.f32.mrf.mxu0  ;;  %v2337_v31 = vpop.f32.mrf.mxu1  ;;  %6476 = vst [vmem:[#allocation87_spill] sm:$0xff] %v5387_v15 }
 0x189   : > { %6472 = vst [vmem:[#allocation83_spill] sm:$0xff] %v5370_v9  ;;  %v2177_v42 = vadd.f32 %v2176_v7, %v5250_v5  ;;  %v5383_v53 = vadd.f32 %v2335_v30, %v2175_v19  ;;  %v4160_v9 = vcombine.high %v777_v3, %v781_v2  ;;  %v5396_v7 = vpack.c.bf16 %v455_v18, %v455_v18  ;;  %v768_v30 = vld [vmem:[%s4620_s8 + $0x680] sm:$0xff] }
 0x18a   : > { %v5389_v17 = vpop.f32.mrf.mxu0  ;;  %v5393_v1 = vpop.f32.mrf.mxu1  ;;  %v772_v18 = vld [vmem:[%s4620_s8 + $0x6a0] sm:$0xff] }
 0x18b   : > { %6475 = vst [vmem:[#allocation86_spill] sm:$0xff] %v5383_v53  ;;  %v5391_v51 = vadd.f32 %v2337_v31, %v2177_v42  ;;  %6478 = vst [vmem:[#allocation89_spill] sm:$0xff] %v5393_v1  ;;  %v4159_v53 = vcombine.low %v777_v3, %v781_v2 }
 0x18c   : > { %2583 = vmatmul.mubr.bf16.gmra.mxu0 %v5372_v49  ;;  %6479 = vst [vmem:[#allocation90_spill] sm:$0xff] %v5396_v7  ;;  %v2182_v29 = vpop.f32.mrf.mxu0  ;;  %2744 = vmatmul.mubr.bf16.gmra.mxu1 %v5379_v38  ;;  %v2343_v12 = vpop.f32.mrf.mxu1  ;;  %v5408_v38 = vpack.c.bf16 %v452_v50, %v452_v50  ;;  %v773_v49 = vld [vmem:[%s4620_s8 + $0x6a8] sm:$0xff] }
 0x18d   : > { %6477 = vst [vmem:[#allocation88_spill] sm:$0xff] %v5391_v51  ;;  %2785 = vmatpush2.bf16.xpose.msra.mxu0 %v4165_v59  ;;  %v2183_v41 = vadd.f32 %v2182_v29, %v5250_v5  ;;  %2946 = vmatpush2.bf16.xpose.msra.mxu1 %v4167_v28  ;;  %v769_v29 = vld [vmem:[%s4620_s8 + $0x688] sm:$0xff]  ;;  %v4157_v51 = vcombine.low %v776_v16, %v780_v58 }
 0x18e   : > { %2592 = vmatprep.mubr.bf16.mxu0 %v5387_v15  ;;  %v2184_v19 = vpop.f32.mrf.mxu0  ;;  %2786 = vmatprep.subr.bf16.mxu0 %v4158_v46  ;;  %v2345_v31 = vpop.f32.mrf.mxu1  ;;  %6480 = vst [vmem:[#allocation91_spill] sm:$0xff] %v5408_v38  ;;  %v5413_v15 = vpack.c.bf16 %v454_v37, %v454_v37  ;;  %v4152_v50 = vcombine.high %v769_v29, %v773_v49  ;;  %v760_v37 = vld [vmem:[%s4620_s8 + $0x640] sm:$0xff] }
 0x18f   : > { %2947 = vmatprep.subr.bf16.mxu1 %v4160_v9  ;;  %v2185_v42 = vadd.f32 %v2184_v19, %v5258_v63  ;;  %v5406_v59 = vadd.f32 %v2343_v12, %v2183_v41  ;;  %2753 = vmatprep.mubr.bf16.mxu1 %v5396_v7  ;;  %v4150_v41 = vcombine.high %v768_v30, %v772_v18 }
 0x190   : > { %v2186_v28 = vpop.f32.mrf.mxu0  ;;  %6481 = vst [vmem:[#allocation92_spill] sm:$0xff] %v5413_v15  ;;  %v2347_v1 = vpop.f32.mrf.mxu1 }
 0x191   : > { %v2187_v46 = vadd.f32 %v2186_v28, %v5250_v5  ;;  %v5416_v9 = vadd.f32 %v2345_v31, %v2185_v42 }
 0x192   : > { %v5418_v12 = vpop.f32.mrf.mxu0  ;;  %v5422_v7 = vpop.f32.mrf.mxu1 }
 0x193   : > { %v5420_v19 = vadd.f32 %v2347_v1, %v2187_v46  ;;  %v764_v1 = vld [vmem:[%s4620_s8 + $0x660] sm:$0xff]  ;;  %v761_v46 = vld [vmem:[%s4620_s8 + $0x648] sm:$0xff] }
 0x194   : > { %2593 = vmatmul.mubr.bf16.gmra.mxu0 %v5408_v38  ;;  %v2192_v16 = vpop.f32.mrf.mxu0  ;;  %2754 = vmatmul.mubr.bf16.gmra.mxu1 %v5413_v15  ;;  %v2353_v3 = vpop.f32.mrf.mxu1  ;;  %v4151_v15 = vcombine.low %v769_v29, %v773_v49  ;;  %v752_v49 = vld [vmem:[%s4620_s8 + $0x600] sm:$0xff] }
 0x195   : > { %6482 = vst [vmem:[#allocation93_spill] sm:$0xff] %v5420_v19  ;;  %2787 = vmatpush2.bf16.xpose.msra.mxu0 %v4157_v51  ;;  %v2193_v2 = vadd.f32 %v2192_v16, %v5250_v5  ;;  %2948 = vmatpush2.bf16.xpose.msra.mxu1 %v4159_v53  ;;  %v765_v51 = vld [vmem:[%s4620_s8 + $0x668] sm:$0xff]  ;;  %v4149_v16 = vcombine.low %v768_v30, %v772_v18  ;;  %v756_v29 = vld [vmem:[%s4620_s8 + $0x620] sm:$0xff] }
 0x196   : > { %2788 = vmatprep.subr.bf16.mxu0 %v4150_v41  ;;  %v2194_v58 = vpop.f32.mrf.mxu0  ;;  %2949 = vmatprep.subr.bf16.mxu1 %v4152_v50  ;;  %v2355_v28 = vpop.f32.mrf.mxu1 }
 0x197   : > { %v2195_v42 = vadd.f32 %v2194_v58, %v5258_v63  ;;  %v5430_v31 = vadd.f32 %v2353_v3, %v2193_v2  ;;  %2794 = vmatprep.mubr.bf16.mxu0 %v4648_v34  ;;  %2955 = vmatprep.mubr.bf16.mxu1 %v4654_v39  ;;  %v4142_v58 = vcombine.high %v760_v37, %v764_v1 }
 0x198   : > { %v2196_v38 = vpop.f32.mrf.mxu0  ;;  %v2357_v50 = vpop.f32.mrf.mxu1  ;;  %v4144_v3 = vcombine.high %v761_v46, %v765_v51 }
 0x199   : > { %6483 = vst [vmem:[#allocation94_spill] sm:$0xff] %v5430_v31  ;;  %v2197_v53 = vadd.f32 %v2196_v38, %v5250_v5  ;;  %v5437_v41 = vadd.f32 %v2355_v28, %v2195_v42 }
 0x19a   : > { %v5439_v2 = vpop.f32.mrf.mxu0  ;;  %v5443_v31 = vpop.f32.mrf.mxu1 }
 0x19b   : > { %6484 = vst [vmem:[#allocation95_spill] sm:$0xff] %v5437_v41  ;;  %6485 = vst [vmem:[#allocation96_spill] sm:$0xff] %v5439_v2  ;;  %v5441_v34 = vadd.f32 %v2357_v50, %v2197_v53  ;;  %v753_v50 = vld [vmem:[%s4620_s8 + $0x608] sm:$0xff] }
 0x19c   : > { %6487 = vst [vmem:[#allocation98_spill] sm:$0xff] %v5443_v31  ;;  %v2202_v39 = vpop.f32.mrf.mxu0  ;;  %v2363_v30 = vpop.f32.mrf.mxu1  ;;  %v4141_v31 = vcombine.low %v760_v37, %v764_v1 }
 0x19d   : > { %6486 = vst [vmem:[#allocation97_spill] sm:$0xff] %v5441_v34  ;;  %2789 = vmatpush2.bf16.xpose.msra.mxu0 %v4149_v16  ;;  %v2203_v38 = vadd.f32 %v2202_v39, %v5250_v5  ;;  %2950 = vmatpush2.bf16.xpose.msra.mxu1 %v4151_v15  ;;  %v757_v34 = vld [vmem:[%s4620_s8 + $0x628] sm:$0xff] }
 0x19e   : > { %2790 = vmatprep.subr.bf16.mxu0 %v4142_v58  ;;  %v2204_v18 = vpop.f32.mrf.mxu0  ;;  %2951 = vmatprep.subr.bf16.mxu1 %v4144_v3  ;;  %v2365_v53 = vpop.f32.mrf.mxu1  ;;  %v4143_v58 = vcombine.low %v761_v46, %v765_v51  ;;  %v4134_v3 = vcombine.high %v752_v49, %v756_v29  ;;  %v4136_v19 = vcombine.high %v753_v50, %v757_v34  ;;  %v746_v46 = vld [vmem:[%s4620_s8 + $0x5d0] sm:$0xff] }
 0x19f   : > { %v2205_v42 = vadd.f32 %v2204_v18, %v5258_v63  ;;  %v5449_v28 = vadd.f32 %v2363_v30, %v2203_v38  ;;  %v750_v51 = vld [vmem:[%s4620_s8 + $0x5f0] sm:$0xff] }
 0x1a0   : > { %v2206_v41 = vpop.f32.mrf.mxu0  ;;  %v2367_v15 = vpop.f32.mrf.mxu1 }
 0x1a1   : > { %6488 = vst [vmem:[#allocation99_spill] sm:$0xff] %v5449_v28  ;;  %v2207_v16 = vadd.f32 %v2206_v41, %v5250_v5  ;;  %v5454_v2 = vadd.f32 %v2365_v53, %v2205_v42 }
 0x1a2   : > { %v5456_v39 = vpop.f32.mrf.mxu0  ;;  %v5460_v30 = vpop.f32.mrf.mxu1 }
 0x1a3   : > { %6489 = vst [vmem:[#allocation100_spill] sm:$0xff] %v5454_v2  ;;  %6490 = vst [vmem:[#allocation101_spill] sm:$0xff] %v5456_v39  ;;  %v5458_v38 = vadd.f32 %v2367_v15, %v2207_v16  ;;  %v747_v15 = vld [vmem:[%s4620_s8 + $0x5d8] sm:$0xff] }
 0x1a4   : > { %6492 = vst [vmem:[#allocation103_spill] sm:$0xff] %v5460_v30  ;;  %v2212_v18 = vpop.f32.mrf.mxu0  ;;  %v2373_v1 = vpop.f32.mrf.mxu1  ;;  %v4133_v30 = vcombine.low %v752_v49, %v756_v29 }
 0x1a5   : > { %6491 = vst [vmem:[#allocation102_spill] sm:$0xff] %v5458_v38  ;;  %2791 = vmatpush2.bf16.xpose.msra.mxu0 %v4141_v31  ;;  %v2213_v37 = vadd.f32 %v2212_v18, %v5250_v5  ;;  %2952 = vmatpush2.bf16.xpose.msra.mxu1 %v4143_v58  ;;  %v751_v38 = vld [vmem:[%s4620_s8 + $0x5f8] sm:$0xff] }
 0x1a6   : > { %2792 = vmatprep.subr.bf16.mxu0 %v4134_v3  ;;  %v2214_v41 = vpop.f32.mrf.mxu0  ;;  %2953 = vmatprep.subr.bf16.mxu1 %v4136_v19  ;;  %v2375_v16 = vpop.f32.mrf.mxu1  ;;  %v4135_v3 = vcombine.low %v753_v50, %v757_v34  ;;  %v4130_v19 = vcombine.high %v746_v46, %v750_v51  ;;  %v4132_v39 = vcombine.high %v747_v15, %v751_v38  ;;  %v738_v34 = vld [vmem:[%s4620_s8 + $0x590] sm:$0xff] }
 0x1a7   : > { %v2215_v42 = vadd.f32 %v2214_v41, %v5258_v63  ;;  %v5466_v53 = vadd.f32 %v2373_v1, %v2213_v37  ;;  %v742_v50 = vld [vmem:[%s4620_s8 + $0x5b0] sm:$0xff] }
 0x1a8   : > { %v2216_v2 = vpop.f32.mrf.mxu0  ;;  %v2377_v58 = vpop.f32.mrf.mxu1 }
 0x1a9   : > { %6493 = vst [vmem:[#allocation104_spill] sm:$0xff] %v5466_v53  ;;  %v2217_v31 = vadd.f32 %v2216_v2, %v5250_v5  ;;  %v5471_v28 = vadd.f32 %v2375_v16, %v2215_v42 }
 0x1aa   : > { %v5473_v18 = vpop.f32.mrf.mxu0  ;;  %v5477_v1 = vpop.f32.mrf.mxu1 }
 0x1ab   : > { %6494 = vst [vmem:[#allocation105_spill] sm:$0xff] %v5471_v28  ;;  %6495 = vst [vmem:[#allocation106_spill] sm:$0xff] %v5473_v18  ;;  %v5475_v37 = vadd.f32 %v2377_v58, %v2217_v31  ;;  %v739_v58 = vld [vmem:[%s4620_s8 + $0x598] sm:$0xff] }
 0x1ac   : > { %6497 = vst [vmem:[#allocation108_spill] sm:$0xff] %v5477_v1  ;;  %v2222_v41 = vpop.f32.mrf.mxu0  ;;  %v2383_v49 = vpop.f32.mrf.mxu1  ;;  %v4129_v1 = vcombine.low %v746_v46, %v750_v51 }
 0x1ad   : > { %6496 = vst [vmem:[#allocation107_spill] sm:$0xff] %v5475_v37  ;;  %2793 = vmatpush2.bf16.xpose.msra.mxu0 %v4133_v30  ;;  %v2223_v2 = vadd.f32 %v2222_v41, %v5250_v5  ;;  %2954 = vmatpush2.bf16.xpose.msra.mxu1 %v4135_v3  ;;  %v743_v37 = vld [vmem:[%s4620_s8 + $0x5b8] sm:$0xff]  ;;  %v4131_v3 = vcombine.low %v747_v15, %v751_v38  ;;  %v730_v15 = vld [vmem:[%s4620_s8 + $0x550] sm:$0xff] }
 0x1ae   : > { %3084 = vmatprep.subr.bf16.mxu0 %v4130_v19  ;;  %v2224_v29 = vpop.f32.mrf.mxu0  ;;  %3245 = vmatprep.subr.bf16.mxu1 %v4132_v39  ;;  %v2385_v31 = vpop.f32.mrf.mxu1  ;;  %v4122_v19 = vcombine.high %v738_v34, %v742_v50  ;;  %v4124_v18 = vcombine.high %v739_v58, %v743_v37 }
 0x1af   : > { %v2225_v42 = vadd.f32 %v2224_v29, %v5258_v63  ;;  %v5483_v16 = vadd.f32 %v2383_v49, %v2223_v2  ;;  %v734_v49 = vld [vmem:[%s4620_s8 + $0x570] sm:$0xff] }
 0x1b0   : > { %v2226_v28 = vpop.f32.mrf.mxu0  ;;  %v2387_v41 = vpop.f32.mrf.mxu1 }
 0x1b1   : > { %v2227_v30 = vadd.f32 %v2226_v28, %v5250_v5  ;;  %v5488_v53 = vadd.f32 %v2385_v31, %v2225_v42 }
 0x1b2   : > { %v5490_v39 = vpop.f32.mrf.mxu0  ;;  %v5494_v2 = vpop.f32.mrf.mxu1 }
 0x1b3   : > { %v5492_v29 = vadd.f32 %v2387_v41, %v2227_v30  ;;  %v731_v30 = vld [vmem:[%s4620_s8 + $0x558] sm:$0xff] }
 0x1b4   : > { %2795 = vmatmul.mubr.bf16.vlgmr.msra.gmra.mxu0 %v4713_v21  ;;  %v2232_v46 = vpop.f32.mrf.mxu0  ;;  %2956 = vmatmul.mubr.bf16.vlgmr.msra.gmra.mxu1 %v4718_v25  ;;  %v2393_v38 = vpop.f32.mrf.mxu1  ;;  %v735_v41 = vld [vmem:[%s4620_s8 + $0x578] sm:$0xff] }
 0x1b5   : > { %6498 = vst [vmem:[#allocation109_spill] sm:$0xff] %v5492_v29  ;;  %3085 = vmatpush1.bf16.xpose.msra.mxu0 %v4129_v1  ;;  %v2233_v28 = vadd.f32 %v2232_v46, %v5250_v5  ;;  %3246 = vmatpush1.bf16.xpose.msra.mxu1 %v4131_v3  ;;  %v4121_v1 = vcombine.low %v738_v34, %v742_v50 }
 0x1b6   : > { %3086 = vmatprep.subr.bf16.mxu0 %v4122_v19  ;;  %v2234_v51 = vpop.f32.mrf.mxu0  ;;  %3247 = vmatprep.subr.bf16.mxu1 %v4124_v18  ;;  %v2395_v21 = vpop.f32.mrf.mxu1  ;;  %v4123_v46 = vcombine.low %v739_v58, %v743_v37  ;;  %v4114_v29 = vcombine.high %v730_v15, %v734_v49  ;;  %v722_v58 = vld [vmem:[%s4620_s8 + $0x510] sm:$0xff] }
 0x1b7   : > { %v2235_v42 = vadd.f32 %v2234_v51, %v5258_v63  ;;  %v5502_v31 = vadd.f32 %v2393_v38, %v2233_v28  ;;  %2804 = vmatprep.mubr.bf16.mxu0 %v4722_v32  ;;  %2965 = vmatprep.mubr.bf16.mxu1 %v4725_v33  ;;  %v4116_v38 = vcombine.high %v731_v30, %v735_v41 }
 0x1b8   : > { %v2236_v25 = vpop.f32.mrf.mxu0  ;;  %v2397_v18 = vpop.f32.mrf.mxu1 }
 0x1b9   : > { %v2237_v3 = vadd.f32 %v2236_v25, %v5250_v5  ;;  %v5509_v19 = vadd.f32 %v2395_v21, %v2235_v42  ;;  %v726_v42 = vld [vmem:[%s4620_s8 + $0x530] sm:$0xff] }
 0x1ba   : > { %v5511_v28 = vpop.f32.mrf.mxu0  ;;  %v5515_v32 = vpop.f32.mrf.mxu1 }
 0x1bb   : > { %v5513_v51 = vadd.f32 %v2397_v18, %v2237_v3  ;;  %v723_v3 = vld [vmem:[%s4620_s8 + $0x518] sm:$0xff] }
 0x1bc   : > { %2805 = vmatmul.mubr.bf16.gmra.mxu0 %v4737_v44  ;;  %v2242_v33 = vpop.f32.mrf.mxu0  ;;  %2966 = vmatmul.mubr.bf16.gmra.mxu1 %v4742_v48  ;;  %v2403_v37 = vpop.f32.mrf.mxu1  ;;  %v4113_v48 = vcombine.low %v730_v15, %v734_v49 }
 0x1bd   : > { %6499 = vst [vmem:[#allocation110_spill] sm:$0xff] %v5513_v51  ;;  %3087 = vmatpush1.bf16.xpose.msra.mxu0 %v4121_v1  ;;  %v2243_v34 = vadd.f32 %v2242_v33, %v5250_v5  ;;  %3248 = vmatpush1.bf16.xpose.msra.mxu1 %v4123_v46  ;;  %v727_v1 = vld [vmem:[%s4620_s8 + $0x538] sm:$0xff]  ;;  %v4115_v33 = vcombine.low %v731_v30, %v735_v41  ;;  %v714_v41 = vld [vmem:[%s4620_s8 + $0x4d0] sm:$0xff] }
 0x1be   : > { %3088 = vmatprep.subr.bf16.mxu0 %v4114_v29  ;;  %v2244_v50 = vpop.f32.mrf.mxu0  ;;  %3249 = vmatprep.subr.bf16.mxu1 %v4116_v38  ;;  %v2405_v44 = vpop.f32.mrf.mxu1  ;;  %v4106_v51 = vcombine.high %v722_v58, %v726_v42 }
 0x1bf   : > { %v2245_v21 = vadd.f32 %v2244_v50, %v5258_v63  ;;  %v5523_v25 = vadd.f32 %v2403_v37, %v2243_v34  ;;  %2814 = vmatprep.mubr.bf16.mxu0 %v4746_v54  ;;  %2975 = vmatprep.mubr.bf16.mxu1 %v4749_v55  ;;  %v4108_v37 = vcombine.high %v723_v3, %v727_v1 }
 0x1c0   : > { %v2246_v18 = vpop.f32.mrf.mxu0  ;;  %v2407_v38 = vpop.f32.mrf.mxu1 }
 0x1c1   : > { %v2247_v46 = vadd.f32 %v2246_v18, %v5250_v5  ;;  %v5530_v29 = vadd.f32 %v2405_v44, %v2245_v21  ;;  %v718_v21 = vld [vmem:[%s4620_s8 + $0x4f0] sm:$0xff] }
 0x1c2   : > { %v5532_v34 = vpop.f32.mrf.mxu0  ;;  %v5536_v54 = vpop.f32.mrf.mxu1 }
 0x1c3   : > { %v5534_v50 = vadd.f32 %v2407_v38, %v2247_v46  ;;  %v715_v46 = vld [vmem:[%s4620_s8 + $0x4d8] sm:$0xff] }
 0x1c4   : > { %2815 = vmatmul.mubr.bf16.gmra.mxu0 %v4761_v0  ;;  %v2252_v55 = vpop.f32.mrf.mxu0  ;;  %2976 = vmatmul.mubr.bf16.gmra.mxu1 %v4766_v4  ;;  %v2413_v49 = vpop.f32.mrf.mxu1  ;;  %v4105_v4 = vcombine.low %v722_v58, %v726_v42 }
 0x1c5   : > { %6500 = vst [vmem:[#allocation111_spill] sm:$0xff] %v5534_v50  ;;  %3089 = vmatpush1.bf16.xpose.msra.mxu0 %v4113_v48  ;;  %v2253_v15 = vadd.f32 %v2252_v55, %v5250_v5  ;;  %3250 = vmatpush1.bf16.xpose.msra.mxu1 %v4115_v33  ;;  %v719_v48 = vld [vmem:[%s4620_s8 + $0x4f8] sm:$0xff]  ;;  %v4107_v55 = vcombine.low %v723_v3, %v727_v1  ;;  %v706_v1 = vld [vmem:[%s4620_s8 + $0x490] sm:$0xff] }
 0x1c6   : > { %3090 = vmatprep.subr.bf16.mxu0 %v4106_v51  ;;  %v2254_v30 = vpop.f32.mrf.mxu0  ;;  %3251 = vmatprep.subr.bf16.mxu1 %v4108_v37  ;;  %v2415_v0 = vpop.f32.mrf.mxu1  ;;  %v4098_v50 = vcombine.high %v714_v41, %v718_v21 }
 0x1c7   : > { %v2255_v44 = vadd.f32 %v2254_v30, %v5258_v63  ;;  %v5544_v18 = vadd.f32 %v2413_v49, %v2253_v15  ;;  %2824 = vmatprep.mubr.bf16.mxu0 %v4770_v10  ;;  %2985 = vmatprep.mubr.bf16.mxu1 %v4773_v11  ;;  %v4100_v49 = vcombine.high %v715_v46, %v719_v48 }
 0x1c8   : > { %v2256_v38 = vpop.f32.mrf.mxu0  ;;  %v2417_v37 = vpop.f32.mrf.mxu1 }
 0x1c9   : > { %v2257_v33 = vadd.f32 %v2256_v38, %v5250_v5  ;;  %v5551_v51 = vadd.f32 %v2415_v0, %v2255_v44  ;;  %v710_v44 = vld [vmem:[%s4620_s8 + $0x4b0] sm:$0xff] }
 0x1ca   : > { %v5553_v15 = vpop.f32.mrf.mxu0  ;;  %v5557_v10 = vpop.f32.mrf.mxu1 }
 0x1cb   : > { %v5555_v30 = vadd.f32 %v2417_v37, %v2257_v33  ;;  %v707_v33 = vld [vmem:[%s4620_s8 + $0x498] sm:$0xff] }
 0x1cc   : > { %2825 = vmatmul.mubr.bf16.gmra.mxu0 %v4785_v20  ;;  %v2262_v11 = vpop.f32.mrf.mxu0  ;;  %2986 = vmatmul.mubr.bf16.gmra.mxu1 %v4790_v26  ;;  %v2423_v42 = vpop.f32.mrf.mxu1  ;;  %v4097_v26 = vcombine.low %v714_v41, %v718_v21 }
 0x1cd   : > { %6501 = vst [vmem:[#allocation112_spill] sm:$0xff] %v5555_v30  ;;  %3091 = vmatpush1.bf16.xpose.msra.mxu0 %v4105_v4  ;;  %v2263_v58 = vadd.f32 %v2262_v11, %v5250_v5  ;;  %3252 = vmatpush1.bf16.xpose.msra.mxu1 %v4107_v55  ;;  %v711_v4 = vld [vmem:[%s4620_s8 + $0x4b8] sm:$0xff]  ;;  %v4099_v11 = vcombine.low %v715_v46, %v719_v48  ;;  %v698_v48 = vld [vmem:[%s4620_s8 + $0x450] sm:$0xff] }
 0x1ce   : > { %3092 = vmatprep.subr.bf16.mxu0 %v4098_v50  ;;  %v2264_v3 = vpop.f32.mrf.mxu0  ;;  %3253 = vmatprep.subr.bf16.mxu1 %v4100_v49  ;;  %v2425_v20 = vpop.f32.mrf.mxu1  ;;  %v4090_v30 = vcombine.high %v706_v1, %v710_v44 }
 0x1cf   : > { %v2265_v0 = vadd.f32 %v2264_v3, %v5258_v63  ;;  %v5565_v38 = vadd.f32 %v2423_v42, %v2263_v58  ;;  %2834 = vmatprep.mubr.bf16.mxu0 %v4794_v35  ;;  %2995 = vmatprep.mubr.bf16.mxu1 %v4797_v36  ;;  %v4092_v42 = vcombine.high %v707_v33, %v711_v4 }
 0x1d0   : > { %v2266_v37 = vpop.f32.mrf.mxu0  ;;  %v2427_v49 = vpop.f32.mrf.mxu1 }
 0x1d1   : > { %v2267_v55 = vadd.f32 %v2266_v37, %v5250_v5  ;;  %v5572_v50 = vadd.f32 %v2425_v20, %v2265_v0  ;;  %v702_v0 = vld [vmem:[%s4620_s8 + $0x470] sm:$0xff] }
 0x1d2   : > { %v5574_v58 = vpop.f32.mrf.mxu0  ;;  %v5578_v35 = vpop.f32.mrf.mxu1 }
 0x1d3   : > { %v5576_v3 = vadd.f32 %v2427_v49, %v2267_v55  ;;  %v699_v55 = vld [vmem:[%s4620_s8 + $0x458] sm:$0xff] }
 0x1d4   : > { %2835 = vmatmul.mubr.bf16.gmra.mxu0 %v4809_v47  ;;  %v2272_v36 = vpop.f32.mrf.mxu0  ;;  %2996 = vmatmul.mubr.bf16.gmra.mxu1 %v4814_v52  ;;  %v2433_v21 = vpop.f32.mrf.mxu1  ;;  %v4089_v52 = vcombine.low %v706_v1, %v710_v44  ;;  %v691_v1 = vld [vmem:[%s4620_s8 + $0x418] sm:$0xff] }
 0x1d5   : > { %3093 = vmatpush1.bf16.xpose.msra.mxu0 %v4097_v26  ;;  %v2273_v41 = vadd.f32 %v2272_v36, %v5250_v5  ;;  %3254 = vmatpush1.bf16.xpose.msra.mxu1 %v4099_v11  ;;  %v703_v26 = vld [vmem:[%s4620_s8 + $0x478] sm:$0xff]  ;;  %v4091_v11 = vcombine.low %v707_v33, %v711_v4  ;;  %v4081_v33 = vcombine.low %v698_v48, %v702_v0 }
 0x1d6   : > { %3094 = vmatprep.subr.bf16.mxu0 %v4090_v30  ;;  %v2274_v46 = vpop.f32.mrf.mxu0  ;;  %3255 = vmatprep.subr.bf16.mxu1 %v4092_v42  ;;  %v2435_v47 = vpop.f32.mrf.mxu1  ;;  %v4082_v42 = vcombine.high %v698_v48, %v702_v0  ;;  %v695_v44 = vld [vmem:[%s4620_s8 + $0x438] sm:$0xff] }
 0x1d7   : > { %v2275_v20 = vadd.f32 %v2274_v46, %v5258_v63  ;;  %v5586_v37 = vadd.f32 %v2433_v21, %v2273_v41  ;;  %2844 = vmatprep.mubr.bf16.mxu0 %v4818_v60  ;;  %3005 = vmatprep.mubr.bf16.mxu1 %v4821_v61  ;;  %v4084_v41 = vcombine.high %v699_v55, %v703_v26  ;;  %v690_v60 = vld [vmem:[%s4620_s8 + $0x410] sm:$0xff] }
 0x1d8   : > { %v2276_v49 = vpop.f32.mrf.mxu0  ;;  %v2437_v30 = vpop.f32.mrf.mxu1  ;;  %v694_v61 = vld [vmem:[%s4620_s8 + $0x430] sm:$0xff]  ;;  %v4076_v46 = vcombine.high %v691_v1, %v695_v44 }
 0x1d9   : > { %v5592_v5 = vadd.f32 %v2435_v47, %v2275_v20  ;;  %v4074_v4 = vcombine.high %v690_v60, %v694_v61  ;;  %v811_v20 = vld [vmem:[%s4620_s8 + $0x7d8] sm:$0xff]  ;;  %v4073_v48 = vcombine.low %v690_v60, %v694_v61  ;;  %v806_v47 = vld [vmem:[%s4620_s8 + $0x7b0] sm:$0xff] }
 0x1da   : > { %v2277_v36 = vpop.f32.mrf.mxu0  ;;  %v2438_v21 = vpop.f32.mrf.mxu1  ;;  %v6505_v60 = vld [vmem:[#allocation68_spill] sm:$0xff] }
 0x1dc   : > { %2845 = vmatmul.mubr.bf16.gmra.mxu0 %v4833_v8  ;;  %3006 = vmatmul.mubr.bf16.gmra.mxu1 %v4838_v14  ;;  %v4083_v8 = vcombine.low %v699_v55, %v703_v26  ;;  %v810_v14 = vld [vmem:[%s4620_s8 + $0x7d0] sm:$0xff]  ;;  %v803_v55 = vld [vmem:[%s4620_s8 + $0x798] sm:$0xff] }
 0x1dd   : > { %3095 = vmatpush1.bf16.xpose.msra.mxu0 %v4089_v52  ;;  %3256 = vmatpush1.bf16.xpose.msra.mxu1 %v4091_v11 }
 0x1de   : > { %3096 = vmatprep.subr.bf16.mxu0 %v4082_v42  ;;  %3257 = vmatprep.subr.bf16.mxu1 %v4084_v41 }
 0x1df   : > { %2854 = vmatprep.mubr.bf16.mxu0 %v4842_v22  ;;  %3015 = vmatprep.mubr.bf16.mxu1 %v4845_v23  ;;  %v814_v22 = vld [vmem:[%s4620_s8 + $0x7f0] sm:$0xff]  ;;  %v815_v23 = vld [vmem:[%s4620_s8 + $0x7f8] sm:$0xff] }
 0x1e0   : > { %v4194_v0 = vcombine.high %v810_v14, %v814_v22  ;;  %v4193_v26 = vcombine.low %v810_v14, %v814_v22  ;;  %v4195_v49 = vcombine.low %v811_v20, %v815_v23  ;;  %v5638_v14 = vld [vmem:[%s4620_s8 + $0x778] sm:$0xff] }
 0x1e1   : > { %v6507_v22 = vld [vmem:[#allocation12_spill] sm:$0xff] }
 0x1e4   : > { %2855 = vmatmul.mubr.bf16.gmra.mxu0 %v4857_v40  ;;  %3016 = vmatmul.mubr.bf16.gmra.mxu1 %v4862_v45  ;;  %v4075_v40 = vcombine.low %v691_v1, %v695_v44  ;;  %v4196_v45 = vcombine.high %v811_v20, %v815_v23  ;;  %v5631_v44 = vld [vmem:[%s4620_s8 + $0x770] sm:$0xff]  ;;  %v6508_v20 = vld [vmem:[#allocation73_spill] sm:$0xff] }
 0x1e5   : > { %3097 = vmatpush1.bf16.xpose.msra.mxu0 %v4081_v33  ;;  %3258 = vmatpush1.bf16.xpose.msra.mxu1 %v4083_v8  ;;  %v6506_v33 = vld [vmem:[#allocation11_spill] sm:$0xff] }
 0x1e6   : > { %3098 = vmatprep.subr.bf16.mxu0 %v4074_v4  ;;  %3259 = vmatprep.subr.bf16.mxu1 %v4076_v46  ;;  %v5635_v46 = vld [vmem:[%s4620_s8 + $0x758] sm:$0xff] }
 0x1e7   : > { %2864 = vmatprep.mubr.bf16.mxu0 %v4866_v56  ;;  %3025 = vmatprep.mubr.bf16.mxu1 %v4869_v57  ;;  %v802_v56 = vld [vmem:[%s4620_s8 + $0x790] sm:$0xff]  ;;  %v807_v57 = vld [vmem:[%s4620_s8 + $0x7b8] sm:$0xff] }
 0x1e8   : > { %v4186_v52 = vcombine.high %v802_v56, %v806_v47  ;;  %v4185_v4 = vcombine.low %v802_v56, %v806_v47 }
 0x1ec   : > { %2865 = vmatmul.mubr.bf16.gmra.mxu0 %v4881_v6  ;;  %3026 = vmatmul.mubr.bf16.gmra.mxu1 %v4886_v13  ;;  %v4188_v6 = vcombine.high %v803_v55, %v807_v57  ;;  %v6502_v13 = vld [vmem:[#allocation70_spill] sm:$0xff] }
 0x1ed   : > { %3099 = vmatpush1.bf16.xpose.msra.mxu0 %v4073_v48  ;;  %3260 = vmatpush1.bf16.xpose.msra.mxu1 %v4075_v40  ;;  %v2159_v11 = vadd.f32 %v6502_v13, %v5258_v63 }
 0x1ee   : > { %3100 = vmatprep.subr.bf16.mxu0 %v4194_v0  ;;  %3261 = vmatprep.subr.bf16.mxu1 %v4196_v45  ;;  %v6509_v0 = vld [vmem:[#allocation72_spill] sm:$0xff] }
 0x1ef   : > { %2874 = vmatprep.mubr.bf16.mxu0 %v4890_v24  ;;  %3035 = vmatprep.mubr.bf16.mxu1 %v4893_v27  ;;  %v6503_v24 = vld [vmem:[#allocation66_spill] sm:$0xff]  ;;  %v2320_v23 = vadd.f32 %v6508_v20, %v2159_v11  ;;  %v4180_v11 = vcombine.high %v5635_v46, %v5638_v14 }
 0x1f0   : > { %v6504_v27 = vld [vmem:[#allocation10_spill] sm:$0xff] }
 0x1f4   : > { %v2474_v30 = vpop.f32.mrf.mxu0  ;;  %2875 = vmatmul.mubr.bf16.gmra.mxu0 %v4905_v43  ;;  %v2635_v36 = vpop.f32.mrf.mxu1  ;;  %3036 = vmatmul.mubr.bf16.gmra.mxu1 %v6504_v27  ;;  %v5628_v43 = vld [vmem:[%s4620_s8 + $0x750] sm:$0xff] }
 0x1f5   : > { %v2475_v42 = vadd.f32 %v2474_v30, %v6503_v24  ;;  %3101 = vmatpush2.bf16.xpose.msra.mxu0 %v4193_v26  ;;  %3262 = vmatpush2.bf16.xpose.msra.mxu1 %v4195_v49  ;;  %v6510_v24 = vld [vmem:[#allocation13_spill] sm:$0xff]  ;;  %v6511_v27 = vld [vmem:[#allocation75_spill] sm:$0xff] }
 0x1f6   : > { %v2476_v41 = vpop.f32.mrf.mxu0  ;;  %3102 = vmatprep.subr.bf16.mxu0 %v4186_v52  ;;  %v2637_v1 = vpop.f32.mrf.mxu1  ;;  %3263 = vmatprep.subr.bf16.mxu1 %v4188_v6  ;;  %v4187_v52 = vcombine.low %v803_v55, %v807_v57  ;;  %v4178_v6 = vcombine.high %v5628_v43, %v5631_v44  ;;  %v2169_v55 = vadd.f32 %v5348_v62, %v5258_v63 }
 0x1f7   : > { %v2636_v21 = vadd.f32 %v2635_v36, %v2475_v42  ;;  %v2477_v61 = vadd.f32 %v2476_v41, %v6505_v60  ;;  %2884 = vmatprep.mubr.bf16.mxu0 %v6506_v33  ;;  %3045 = vmatprep.mubr.bf16.mxu1 %v6507_v22  ;;  %v6512_v60 = vld [vmem:[#allocation14_spill] sm:$0xff] }
 0x1f8   : > { %v2478_v8 = vpop.f32.mrf.mxu0  ;;  %v2639_v26 = vpop.f32.mrf.mxu1 }
 0x1f9   : > { %v3406_v48 = vmax.f32 %v2636_v21, 0.0  ;;  %v2638_v40 = vadd.f32 %v2637_v1, %v2477_v61  ;;  %v2479_v45 = vadd.f32 %v2478_v8, %v6509_v0  ;;  %v5657_v1 = vld [vmem:[%s4620_s8 + $0x710] sm:$0xff]  ;;  %v6513_v8 = vld [vmem:[#allocation78_spill] sm:$0xff]  ;;  %v5668_v0 = vld [vmem:[%s4620_s8 + $0x738] sm:$0xff] }
 0x1fa   : > { %v2480_v49 = vpop.f32.mrf.mxu0  ;;  %v2641_v13 = vpop.f32.mrf.mxu1 }
 0x1fb   : > { %3506 = vst [vmem:[%s5645_s26] sm:$0xff] %v3406_v48  ;;  %v3407_v56 = vmax.f32 %v2638_v40, 0.0  ;;  %v2640_v47 = vadd.f32 %v2639_v26, %v2479_v45  ;;  %v2481_v30 = vadd.f32 %v2480_v49, %v2320_v23  ;;  %v5662_v40 = vld [vmem:[%s4620_s8 + $0x730] sm:$0xff]  ;;  %v6515_v26 = vld [vmem:[#allocation81_spill] sm:$0xff] }
 0x1fc   : > { %v2484_v57 = vpop.f32.mrf.mxu0  ;;  %2885 = vmatmul.mubr.bf16.gmra.mxu0 %v6510_v24  ;;  %v2645_v21 = vpop.f32.mrf.mxu1  ;;  %3046 = vmatmul.mubr.bf16.gmra.mxu1 %v6512_v60  ;;  %v6514_v45 = vld [vmem:[#allocation15_spill] sm:$0xff]  ;;  %v2330_v49 = vadd.f32 %v6515_v26, %v2169_v55  ;;  %v4170_v55 = vcombine.high %v5657_v1, %v5662_v40  ;;  %v2179_v60 = vadd.f32 %v5389_v17, %v5258_v63 }
 0x1fd   : > { %3507 = vst [vmem:[%s5645_s26 + $0x8] sm:$0xff] %v3407_v56  ;;  %v3410_v42 = vmax.f32 %v2640_v47, 0.0  ;;  %v2642_v36 = vadd.f32 %v2641_v13, %v2481_v30  ;;  %v2485_v41 = vadd.f32 %v2484_v57, %v6511_v27  ;;  %3103 = vmatpush2.bf16.xpose.msra.mxu0 %v4185_v4  ;;  %3264 = vmatpush2.bf16.xpose.msra.mxu1 %v4187_v52  ;;  %v5665_v4 = vld [vmem:[%s4620_s8 + $0x718] sm:$0xff]  ;;  %v5691_v17 = vld [vmem:[%s4620_s8 + $0x6d0] sm:$0xff] }
 0x1fe   : > { %v2486_v61 = vpop.f32.mrf.mxu0  ;;  %3104 = vmatprep.subr.bf16.mxu0 %v4178_v6  ;;  %v2647_v23 = vpop.f32.mrf.mxu1  ;;  %3265 = vmatprep.subr.bf16.mxu1 %v4180_v11  ;;  %v6516_v6 = vld [vmem:[#allocation16_spill] sm:$0xff] }
 0x1ff   : > { %3510 = vst [vmem:[%s5645_s26 + $0x20] sm:$0xff] %v3410_v42  ;;  %v3606_v62 = vadd.f32 %v3410_v42, %v3406_v48  ;;  %v3411_v33 = vmax.f32 %v2642_v36, 0.0  ;;  %v2487_v22 = vadd.f32 %v2486_v61, %v6513_v8  ;;  %v2646_v20 = vadd.f32 %v2645_v21, %v2485_v41  ;;  %2894 = vmatprep.mubr.bf16.mxu0 %v6514_v45  ;;  %v6517_v13 = vld [vmem:[#allocation80_spill] sm:$0xff]  ;;  %v6519_v8 = vld [vmem:[#allocation83_spill] sm:$0xff] }
 0x200   : > { %v2488_v52 = vpop.f32.mrf.mxu0  ;;  %v4177_v48 = vcombine.low %v5628_v43, %v5631_v44  ;;  %3055 = vmatprep.mubr.bf16.mxu1 %v6516_v6  ;;  %v2649_v24 = vpop.f32.mrf.mxu1  ;;  %v4179_v36 = vcombine.low %v5635_v46, %v5638_v14  ;;  %v4172_v43 = vcombine.high %v5665_v4, %v5668_v0 }
 0x201   : > { %3511 = vst [vmem:[%s5645_s26 + $0x28] sm:$0xff] %v3411_v33  ;;  %v3638_v47 = vadd.f32 %v3411_v33, %v3407_v56  ;;  %v3414_v30 = vmax.f32 %v2646_v20, 0.0  ;;  %v2489_v11 = vadd.f32 %v2488_v52, %v6517_v13  ;;  %v2648_v57 = vadd.f32 %v2647_v23, %v2487_v22  ;;  %v6518_v33 = vld [vmem:[#allocation17_spill] sm:$0xff]  ;;  %v6520_v23 = vld [vmem:[#allocation18_spill] sm:$0xff]  ;;  %v5696_v13 = vld [vmem:[%s4620_s8 + $0x6f0] sm:$0xff] }
 0x202   : > { %v2490_v42 = vpop.f32.mrf.mxu0  ;;  %v2651_v21 = vpop.f32.mrf.mxu1  ;;  %v6521_v52 = vld [vmem:[#allocation86_spill] sm:$0xff] }
 0x203   : > { %3514 = vst [vmem:[%s5645_s26 + $0x40] sm:$0xff] %v3414_v30  ;;  %v3607_v44 = vadd.f32 %v3606_v62, %v3414_v30  ;;  %v3415_v27 = vmax.f32 %v2648_v57, 0.0  ;;  %v2491_v56 = vadd.f32 %v2490_v42, %v2330_v49  ;;  %v2650_v41 = vadd.f32 %v2649_v24, %v2489_v11  ;;  %v5702_v11 = vld [vmem:[%s4620_s8 + $0x6f8] sm:$0xff]  ;;  %v6522_v57 = vld [vmem:[#allocation19_spill] sm:$0xff]  ;;  %v6523_v24 = vld [vmem:[#allocation89_spill] sm:$0xff] }
 0x204   : > { %v2494_v61 = vpop.f32.mrf.mxu0  ;;  %2895 = vmatmul.mubr.bf16.gmra.mxu0 %v6518_v33  ;;  %v2655_v62 = vpop.f32.mrf.mxu1  ;;  %3056 = vmatmul.mubr.bf16.gmra.mxu1 %v6520_v23  ;;  %v2340_v42 = vadd.f32 %v6523_v24, %v2179_v60  ;;  %v4162_v60 = vcombine.high %v5691_v17, %v5696_v13 }
 0x205   : > { %3515 = vst [vmem:[%s5645_s26 + $0x48] sm:$0xff] %v3415_v27  ;;  %v3639_v46 = vadd.f32 %v3638_v47, %v3415_v27  ;;  %v3418_v14 = vmax.f32 %v2650_v41, 0.0  ;;  %v2495_v22 = vadd.f32 %v2494_v61, %v6519_v8  ;;  %v2652_v20 = vadd.f32 %v2651_v21, %v2491_v56  ;;  %3105 = vmatpush2.bf16.xpose.msra.mxu0 %v4177_v48  ;;  %v5699_v48 = vld [vmem:[%s4620_s8 + $0x6d8] sm:$0xff] }
 0x206   : > { %3266 = vmatpush2.bf16.xpose.msra.mxu1 %v4179_v36  ;;  %v2496_v45 = vpop.f32.mrf.mxu0  ;;  %3106 = vmatprep.subr.bf16.mxu0 %v4170_v55  ;;  %v2657_v30 = vpop.f32.mrf.mxu1  ;;  %v4169_v55 = vcombine.low %v5657_v1, %v5662_v40  ;;  %v6525_v56 = vld [vmem:[#allocation88_spill] sm:$0xff]  ;;  %v4164_v1 = vcombine.high %v5699_v48, %v5702_v11 }
 0x207   : > { %3518 = vst [vmem:[%s5645_s26 + $0x60] sm:$0xff] %v3418_v14  ;;  %v3608_v26 = vadd.f32 %v3607_v44, %v3418_v14  ;;  %v3419_v49 = vmax.f32 %v2652_v20, 0.0  ;;  %v2497_v6 = vadd.f32 %v2496_v45, %v6521_v52  ;;  %v2656_v47 = vadd.f32 %v2655_v62, %v2495_v22  ;;  %3267 = vmatprep.subr.bf16.mxu1 %v4172_v43  ;;  %v6524_v44 = vld [vmem:[#allocation20_spill] sm:$0xff]  ;;  %v6526_v45 = vld [vmem:[#allocation21_spill] sm:$0xff] }
 0x208   : > { %2904 = vmatprep.mubr.bf16.mxu0 %v6522_v57  ;;  %v2498_v36 = vpop.f32.mrf.mxu0  ;;  %3065 = vmatprep.mubr.bf16.mxu1 %v6524_v44  ;;  %v2659_v61 = vpop.f32.mrf.mxu1  ;;  %v4171_v14 = vcombine.low %v5665_v4, %v5668_v0  ;;  %v2189_v62 = vadd.f32 %v5418_v12, %v5258_v63  ;;  %v5725_v12 = vld [vmem:[%s4620_s8 + $0x690] sm:$0xff]  ;;  %v5736_v44 = vld [vmem:[%s4620_s8 + $0x6b8] sm:$0xff] }
 0x209   : > { %3519 = vst [vmem:[%s5645_s26 + $0x68] sm:$0xff] %v3419_v49  ;;  %v3640_v27 = vadd.f32 %v3639_v46, %v3419_v49  ;;  %v3422_v43 = vmax.f32 %v2656_v47, 0.0  ;;  %v2499_v41 = vadd.f32 %v2498_v36, %v6525_v56  ;;  %v2658_v21 = vadd.f32 %v2657_v30, %v2497_v6  ;;  %v6527_v6 = vld [vmem:[#allocation22_spill] sm:$0xff]  ;;  %v5730_v36 = vld [vmem:[%s4620_s8 + $0x6b0] sm:$0xff] }
 0x20a   : > { %v2500_v33 = vpop.f32.mrf.mxu0  ;;  %v2661_v20 = vpop.f32.mrf.mxu1 }
 0x20b   : > { %3522 = vst [vmem:[%s5645_s26 + $0x80] sm:$0xff] %v3422_v43  ;;  %v3609_v40 = vadd.f32 %v3608_v26, %v3422_v43  ;;  %v3423_v8 = vmax.f32 %v2658_v21, 0.0  ;;  %v2501_v46 = vadd.f32 %v2500_v33, %v2340_v42  ;;  %v2660_v22 = vadd.f32 %v2659_v61, %v2499_v41  ;;  %v6529_v21 = vld [vmem:[#allocation24_spill] sm:$0xff]  ;;  %v6530_v33 = vld [vmem:[#allocation93_spill] sm:$0xff] }
 0x20c   : > { %v2504_v23 = vpop.f32.mrf.mxu0  ;;  %2905 = vmatmul.mubr.bf16.gmra.mxu0 %v6526_v45  ;;  %v2665_v26 = vpop.f32.mrf.mxu1  ;;  %3066 = vmatmul.mubr.bf16.gmra.mxu1 %v6527_v6  ;;  %v2350_v43 = vadd.f32 %v5422_v7, %v2189_v62  ;;  %v4161_v41 = vcombine.low %v5691_v17, %v5696_v13  ;;  %v4154_v7 = vcombine.high %v5725_v12, %v5730_v36 }
 0x20d   : > { %3523 = vst [vmem:[%s5645_s26 + $0x88] sm:$0xff] %v3423_v8  ;;  %v3641_v4 = vadd.f32 %v3640_v27, %v3423_v8  ;;  %v3426_v0 = vmax.f32 %v2660_v22, 0.0  ;;  %v2505_v49 = vadd.f32 %v2504_v23, %v5406_v59  ;;  %v2662_v52 = vadd.f32 %v2661_v20, %v2501_v46  ;;  %3107 = vmatpush2.bf16.xpose.msra.mxu0 %v4169_v55  ;;  %v5733_v55 = vld [vmem:[%s4620_s8 + $0x698] sm:$0xff]  ;;  %v6528_v27 = vld [vmem:[#allocation23_spill] sm:$0xff] }
 0x20e   : > { %3268 = vmatpush2.bf16.xpose.msra.mxu1 %v4171_v14  ;;  %v2506_v47 = vpop.f32.mrf.mxu0  ;;  %3108 = vmatprep.subr.bf16.mxu0 %v4162_v60  ;;  %v2667_v42 = vpop.f32.mrf.mxu1  ;;  %v4163_v8 = vcombine.low %v5699_v48, %v5702_v11  ;;  %v4156_v17 = vcombine.high %v5733_v55, %v5736_v44  ;;  %v6531_v23 = vld [vmem:[#allocation96_spill] sm:$0xff] }
 0x20f   : > { %3526 = vst [vmem:[%s5645_s26 + $0xa0] sm:$0xff] %v3426_v0  ;;  %v3610_v30 = vadd.f32 %v3609_v40, %v3426_v0  ;;  %v3427_v57 = vmax.f32 %v2662_v52, 0.0  ;;  %v2507_v24 = vadd.f32 %v2506_v47, %v5416_v9  ;;  %v2666_v59 = vadd.f32 %v2665_v26, %v2505_v49  ;;  %3269 = vmatprep.subr.bf16.mxu1 %v4164_v1  ;;  %v6532_v0 = vld [vmem:[#allocation25_spill] sm:$0xff]  ;;  %v6533_v49 = vld [vmem:[#allocation94_spill] sm:$0xff] }
 0x210   : > { %2914 = vmatprep.mubr.bf16.mxu0 %v6528_v27  ;;  %v2508_v56 = vpop.f32.mrf.mxu0  ;;  %3075 = vmatprep.mubr.bf16.mxu1 %v6529_v21  ;;  %v2669_v1 = vpop.f32.mrf.mxu1  ;;  %v2199_v45 = vadd.f32 %v6531_v23, %v5258_v63  ;;  %v6534_v47 = vld [vmem:[#allocation26_spill] sm:$0xff]  ;;  %v5764_v21 = vld [vmem:[%s4620_s8 + $0x670] sm:$0xff] }
 0x211   : > { %3527 = vst [vmem:[%s5645_s26 + $0xa8] sm:$0xff] %v3427_v57  ;;  %v3642_v9 = vadd.f32 %v3641_v4, %v3427_v57  ;;  %v3430_v61 = vmax.f32 %v2666_v59, 0.0  ;;  %v2509_v14 = vadd.f32 %v2508_v56, %v6530_v33  ;;  %v2668_v60 = vadd.f32 %v2667_v42, %v2507_v24  ;;  %v5759_v57 = vld [vmem:[%s4620_s8 + $0x650] sm:$0xff]  ;;  %v6537_v33 = vld [vmem:[#allocation98_spill] sm:$0xff] }
 0x212   : > { %v2510_v40 = vpop.f32.mrf.mxu0  ;;  %v2671_v62 = vpop.f32.mrf.mxu1  ;;  %v6535_v42 = vld [vmem:[#allocation95_spill] sm:$0xff]  ;;  %v4146_v23 = vcombine.high %v5759_v57, %v5764_v21 }
 0x213   : > { %3530 = vst [vmem:[%s5645_s26 + $0xc0] sm:$0xff] %v3430_v61  ;;  %v3611_v13 = vadd.f32 %v3610_v30, %v3430_v61  ;;  %v3431_v46 = vmax.f32 %v2668_v60, 0.0  ;;  %v2511_v22 = vadd.f32 %v2510_v40, %v2350_v43  ;;  %v2670_v20 = vadd.f32 %v2669_v1, %v2509_v14  ;;  %v6536_v61 = vld [vmem:[#allocation27_spill] sm:$0xff]  ;;  %v6538_v40 = vld [vmem:[#allocation28_spill] sm:$0xff] }
 0x214   : > { %v2514_v4 = vpop.f32.mrf.mxu0  ;;  %2915 = vmatmul.mubr.bf16.gmra.mxu0 %v6532_v0  ;;  %v2675_v6 = vpop.f32.mrf.mxu1  ;;  %3076 = vmatmul.mubr.bf16.gmra.mxu1 %v6534_v47  ;;  %v2360_v14 = vadd.f32 %v6537_v33, %v2199_v45  ;;  %v4153_v1 = vcombine.low %v5725_v12, %v5730_v36 }
 0x215   : > { %3531 = vst [vmem:[%s5645_s26 + $0xc8] sm:$0xff] %v3431_v46  ;;  %v3643_v48 = vadd.f32 %v3642_v9, %v3431_v46  ;;  %v3434_v11 = vmax.f32 %v2670_v20, 0.0  ;;  %v2515_v52 = vadd.f32 %v2514_v4, %v6533_v49  ;;  %v2672_v26 = vadd.f32 %v2671_v62, %v2511_v22  ;;  %3109 = vmatpush2.bf16.xpose.msra.mxu0 %v4161_v41  ;;  %v5767_v41 = vld [vmem:[%s4620_s8 + $0x658] sm:$0xff] }
 0x216   : > { %3270 = vmatpush2.bf16.xpose.msra.mxu1 %v4163_v8  ;;  %v2516_v30 = vpop.f32.mrf.mxu0  ;;  %3110 = vmatprep.subr.bf16.mxu0 %v4154_v7  ;;  %v2677_v56 = vpop.f32.mrf.mxu1  ;;  %v5770_v9 = vld [vmem:[%s4620_s8 + $0x678] sm:$0xff]  ;;  %v4155_v62 = vcombine.low %v5733_v55, %v5736_v44 }
 0x217   : > { %3534 = vst [vmem:[%s5645_s26 + $0xe0] sm:$0xff] %v3434_v11  ;;  %v3612_v24 = vadd.f32 %v3611_v13, %v3434_v11  ;;  %v3435_v59 = vmax.f32 %v2672_v26, 0.0  ;;  %v2517_v27 = vadd.f32 %v2516_v30, %v6535_v42  ;;  %v2676_v43 = vadd.f32 %v2675_v6, %v2515_v52  ;;  %3271 = vmatprep.subr.bf16.mxu1 %v4156_v17  ;;  %v6539_v17 = vld [vmem:[#allocation97_spill] sm:$0xff]  ;;  %v6541_v26 = vld [vmem:[#allocation99_spill] sm:$0xff] }
 0x218   : > { %3116 = vmatprep.mubr.bf16.mxu0 %v6536_v61  ;;  %v2518_v60 = vpop.f32.mrf.mxu0  ;;  %3277 = vmatprep.mubr.bf16.mxu1 %v6538_v40  ;;  %v2679_v22 = vpop.f32.mrf.mxu1  ;;  %v4148_v12 = vcombine.high %v5767_v41, %v5770_v9  ;;  %v6540_v11 = vld [vmem:[#allocation101_spill] sm:$0xff]  ;;  %v6543_v40 = vld [vmem:[#allocation103_spill] sm:$0xff] }
 0x219   : > { %3535 = vst [vmem:[%s5645_s26 + $0xe8] sm:$0xff] %v3435_v59  ;;  %v3644_v8 = vadd.f32 %v3643_v48, %v3435_v59  ;;  %v3438_v7 = vmax.f32 %v2676_v43, 0.0  ;;  %v2519_v13 = vadd.f32 %v2518_v60, %v6539_v17  ;;  %v2678_v46 = vadd.f32 %v2677_v56, %v2517_v27  ;;  %v5791_v59 = vld [vmem:[%s4620_s8 + $0x610] sm:$0xff]  ;;  %v6542_v43 = vld [vmem:[#allocation100_spill] sm:$0xff] }
 0x21a   : > { %v2520_v20 = vpop.f32.mrf.mxu0  ;;  %v2681_v48 = vpop.f32.mrf.mxu1  ;;  %v2209_v49 = vadd.f32 %v6540_v11, %v5258_v63  ;;  %v5799_v60 = vld [vmem:[%s4620_s8 + $0x618] sm:$0xff]  ;;  %v4145_v17 = vcombine.low %v5759_v57, %v5764_v21 }
 0x21b   : > { %3538 = vst [vmem:[%s5645_s26 + $0x100] sm:$0xff] %v3438_v7  ;;  %v3613_v36 = vadd.f32 %v3612_v24, %v3438_v7  ;;  %v3439_v45 = vmax.f32 %v2678_v46, 0.0  ;;  %v2521_v4 = vadd.f32 %v2520_v20, %v2360_v14  ;;  %v2680_v0 = vadd.f32 %v2679_v22, %v2519_v13  ;;  %v5796_v14 = vld [vmem:[%s4620_s8 + $0x630] sm:$0xff]  ;;  %v6544_v22 = vld [vmem:[#allocation102_spill] sm:$0xff] }
 0x21c   : > { %v2524_v52 = vpop.f32.mrf.mxu0  ;;  %v2685_v30 = vpop.f32.mrf.mxu1 }
 0x21d   : > { %3539 = vst [vmem:[%s5645_s26 + $0x108] sm:$0xff] %v3439_v45  ;;  %v3645_v55 = vadd.f32 %v3644_v8, %v3439_v45  ;;  %v3442_v44 = vmax.f32 %v2680_v0, 0.0  ;;  %v2525_v6 = vadd.f32 %v2524_v52, %v6541_v26  ;;  %v2682_v47 = vadd.f32 %v2681_v48, %v2521_v4  ;;  %3111 = vmatpush2.bf16.xpose.msra.mxu0 %v4153_v1  ;;  %v5802_v1 = vld [vmem:[%s4620_s8 + $0x638] sm:$0xff]  ;;  %s4198_s8 = sshll.u32 %s4445_s21, 1 }
 0x21e   : > { %3272 = vmatpush2.bf16.xpose.msra.mxu1 %v4155_v62  ;;  %v2526_v24 = vpop.f32.mrf.mxu0  ;;  %3112 = vmatprep.subr.bf16.mxu0 %v4146_v23  ;;  %v2687_v33 = vpop.f32.mrf.mxu1  ;;  %v2370_v8 = vadd.f32 %v6543_v40, %v2209_v49  ;;  %v4138_v45 = vcombine.high %v5791_v59, %v5796_v14  ;;  %v4140_v4 = vcombine.high %v5799_v60, %v5802_v1  ;;  %v6545_v49 = vld [vmem:[#allocation106_spill] sm:$0xff]  ;;  %s3784_s27 = sadd.s32 %s4449_s22, %s4198_s8  ;;  %s4315_s8 = scalar_lea.vmem %s6203_s6, 12800 }
 0x21f   : > { %3542 = vst [vmem:[%s5645_s26 + $0x120] sm:$0xff] %v3442_v44  ;;  %v3614_v42 = vadd.f32 %v3613_v36, %v3442_v44  ;;  %v3443_v27 = vmax.f32 %v2682_v47, 0.0  ;;  %v2527_v56 = vadd.f32 %v2526_v24, %v6542_v43  ;;  %v2686_v61 = vadd.f32 %v2685_v30, %v2525_v6  ;;  %3273 = vmatprep.subr.bf16.mxu1 %v4148_v12  ;;  %s4208_s22 = sshll.u32 %s3784_s27, 9  ;;  %p4316_p5 = scmp.ne.s32.totalorder %s6203_s6, %s4315_s8 }
 0x220   : > { %v2528_v7 = vpop.f32.mrf.mxu0  ;;  %v2689_v23 = vpop.f32.mrf.mxu1  ;;  %v4147_v36 = vcombine.low %v5767_v41, %v5770_v9  ;;  %v2219_v52 = vadd.f32 %v6545_v49, %v5258_v63  ;;  %v6546_v9 = vld [vmem:[#allocation104_spill] sm:$0xff]  ;;  %s4463_s27 = smov [#allocation2]  }
 0x221   : > { %3543 = vst [vmem:[%s5645_s26 + $0x128] sm:$0xff] %v3443_v27  ;;  %v3646_v13 = vadd.f32 %v3645_v55, %v3443_v27  ;;  %v3446_v46 = vmax.f32 %v2686_v61, 0.0  ;;  %v2529_v20 = vadd.f32 %v2528_v7, %v6544_v22  ;;  %v2688_v62 = vadd.f32 %v2687_v33, %v2527_v56  ;;  %v6547_v27 = vld [vmem:[#allocation105_spill] sm:$0xff]  ;;  %v6548_v33 = vld [vmem:[#allocation108_spill] sm:$0xff]  ;;  %p4317_p8 = pnand %p4316_p5, %p4576_p6 }
 0x222   : > { %v2530_v12 = vpop.f32.mrf.mxu0  ;;  %v2691_v11 = vpop.f32.mrf.mxu1  ;;  %v2380_v40 = vadd.f32 %v6548_v33, %v2219_v52  ;;  %v4137_v7 = vcombine.low %v5791_v59, %v5796_v14  ;;  %v2229_v59 = vadd.f32 %v5490_v39, %v5258_v63 }
 0x223   : > { %3546 = vst [vmem:[%s5645_s26 + $0x140] sm:$0xff] %v3446_v46  ;;  %v3615_v57 = vadd.f32 %v3614_v42, %v3446_v46  ;;  %v3447_v21 = vmax.f32 %v2688_v62, 0.0  ;;  %v2531_v0 = vadd.f32 %v2530_v12, %v2370_v8  ;;  %v2690_v48 = vadd.f32 %v2689_v23, %v2529_v20  ;;  %v6549_v46 = vld [vmem:[#allocation107_spill] sm:$0xff]  ;;  %p4318_p9 = pneg %p4317_p8 }
 0x224   : > { %v2534_v55 = vpop.f32.mrf.mxu0  ;;  %v2695_v47 = vpop.f32.mrf.mxu1  ;;  %v4139_v12 = vcombine.low %v5799_v60, %v5802_v1 }
 0x225   : > { %3547 = vst [vmem:[%s5645_s26 + $0x148] sm:$0xff] %v3447_v21  ;;  %v3647_v44 = vadd.f32 %v3646_v13, %v3447_v21  ;;  %v3450_v41 = vmax.f32 %v2690_v48, 0.0  ;;  %v2535_v26 = vadd.f32 %v2534_v55, %v6546_v9  ;;  %v2692_v6 = vadd.f32 %v2691_v11, %v2531_v0  ;;  %3113 = vmatpush2.bf16.xpose.msra.mxu0 %v4145_v17 }
 0x226   : > { %3274 = vmatpush2.bf16.xpose.msra.mxu1 %v4147_v36  ;;  %v2536_v30 = vpop.f32.mrf.mxu0  ;;  %3114 = vmatprep.subr.bf16.mxu0 %v4138_v45  ;;  %v2697_v61 = vpop.f32.mrf.mxu1  ;;  %v2390_v9 = vadd.f32 %v5494_v2, %v2229_v59  ;;  %v2239_v2 = vadd.f32 %v5511_v28, %v5258_v63 }
 0x227   : > { %3550 = vst [vmem:[%s5645_s26 + $0x160] sm:$0xff] %v3450_v41  ;;  %v3616_v24 = vadd.f32 %v3615_v57, %v3450_v41  ;;  %v3451_v42 = vmax.f32 %v2692_v6, 0.0  ;;  %v2537_v43 = vadd.f32 %v2536_v30, %v6547_v27  ;;  %v2696_v56 = vadd.f32 %v2695_v47, %v2535_v26  ;;  %3275 = vmatprep.subr.bf16.mxu1 %v4140_v4  ;;  %v6550_v47 = vld [vmem:[#allocation109_spill] sm:$0xff] }
 0x228   : > { %v2538_v8 = vpop.f32.mrf.mxu0  ;;  %v2699_v62 = vpop.f32.mrf.mxu1 }
 0x229   : > { %3551 = vst [vmem:[%s5645_s26 + $0x168] sm:$0xff] %v3451_v42  ;;  %v3648_v17 = vadd.f32 %v3647_v44, %v3451_v42  ;;  %v3454_v13 = vmax.f32 %v2696_v56, 0.0  ;;  %v2539_v22 = vadd.f32 %v2538_v8, %v6549_v46  ;;  %v2698_v20 = vadd.f32 %v2697_v61, %v2537_v43  ;;  %v6551_v8 = vld [vmem:[#allocation29_spill] sm:$0xff] }
 0x22a   : > { %v2540_v23 = vpop.f32.mrf.mxu0  ;;  %v2701_v21 = vpop.f32.mrf.mxu1 }
 0x22b   : > { %3554 = vst [vmem:[%s5645_s26 + $0x180] sm:$0xff] %v3454_v13  ;;  %v3617_v36 = vadd.f32 %v3616_v24, %v3454_v13  ;;  %v3455_v45 = vmax.f32 %v2698_v20, 0.0  ;;  %v2541_v4 = vadd.f32 %v2540_v23, %v2380_v40  ;;  %v2700_v57 = vadd.f32 %v2699_v62, %v2539_v22  ;;  %v6552_v22 = vld [vmem:[#allocation30_spill] sm:$0xff]  ;;  %v6553_v62 = vld [vmem:[#allocation31_spill] sm:$0xff] }
 0x22c   : > { %v2544_v14 = vpop.f32.mrf.mxu0  ;;  %v2705_v60 = vpop.f32.mrf.mxu1 }
 0x22d   : > { %3555 = vst [vmem:[%s5645_s26 + $0x188] sm:$0xff] %v3455_v45  ;;  %v3649_v0 = vadd.f32 %v3648_v17, %v3455_v45  ;;  %v3458_v48 = vmax.f32 %v2700_v57, 0.0  ;;  %v2545_v11 = vadd.f32 %v2544_v14, %v5483_v16  ;;  %v2702_v49 = vadd.f32 %v2701_v21, %v2541_v4  ;;  %3115 = vmatpush2.bf16.xpose.msra.mxu0 %v4137_v7 }
 0x22e   : > { %3276 = vmatpush2.bf16.xpose.msra.mxu1 %v4139_v12  ;;  %v2546_v1 = vpop.f32.mrf.mxu0  ;;  %v2707_v39 = vpop.f32.mrf.mxu1  ;;  %v6554_v12 = vld [vmem:[#allocation32_spill] sm:$0xff]  ;;  %v2400_v21 = vadd.f32 %v5515_v32, %v2239_v2  ;;  %v2249_v32 = vadd.f32 %v5532_v34, %v5258_v63 }
 0x22f   : > { %3558 = vst [vmem:[%s5645_s26 + $0x1a0] sm:$0xff] %v3458_v48  ;;  %v3618_v52 = vadd.f32 %v3617_v36, %v3458_v48  ;;  %v3459_v55 = vmax.f32 %v2702_v49, 0.0  ;;  %v2547_v44 = vadd.f32 %v2546_v1, %v5488_v53  ;;  %v2706_v41 = vadd.f32 %v2705_v60, %v2545_v11 }
 0x230   : > { %v2548_v26 = vpop.f32.mrf.mxu0  ;;  %v2709_v42 = vpop.f32.mrf.mxu1 }
 0x231   : > { %3559 = vst [vmem:[%s5645_s26 + $0x1a8] sm:$0xff] %v3459_v55  ;;  %v3650_v6 = vadd.f32 %v3649_v0, %v3459_v55  ;;  %v3462_v16 = vmax.f32 %v2706_v41, 0.0  ;;  %v2549_v30 = vadd.f32 %v2548_v26, %v6550_v47  ;;  %v2708_v24 = vadd.f32 %v2707_v39, %v2547_v44  ;;  %v6555_v0 = vld [vmem:[#allocation110_spill] sm:$0xff]  ;;  %v6556_v39 = vld [vmem:[#allocation33_spill] sm:$0xff] }
 0x232   : > { %v2550_v27 = vpop.f32.mrf.mxu0  ;;  %v2711_v33 = vpop.f32.mrf.mxu1  ;;  %v6557_v47 = vld [vmem:[#allocation34_spill] sm:$0xff] }
 0x233   : > { %3562 = vst [vmem:[%s5645_s26 + $0x1c0] sm:$0xff] %v3462_v16  ;;  %v3619_v43 = vadd.f32 %v3618_v52, %v3462_v16  ;;  %v3463_v56 = vmax.f32 %v2708_v24, 0.0  ;;  %v2551_v61 = vadd.f32 %v2550_v27, %v2390_v9  ;;  %v2710_v53 = vadd.f32 %v2709_v42, %v2549_v30  ;;  %v6558_v24 = vld [vmem:[#allocation35_spill] sm:$0xff]  ;;  %v6559_v27 = vld [vmem:[#allocation36_spill] sm:$0xff] }
 0x234   : > { %v2554_v40 = vpop.f32.mrf.mxu0  ;;  %3117 = vmatmul.mubr.bf16.vlgmr.msra.gmra.mxu0 %v6551_v8  ;;  %v2715_v20 = vpop.f32.mrf.mxu1  ;;  %v6560_v8 = vld [vmem:[#allocation111_spill] sm:$0xff] }
 0x235   : > { %3563 = vst [vmem:[%s5645_s26 + $0x1c8] sm:$0xff] %v3463_v56  ;;  %v3651_v7 = vadd.f32 %v3650_v6, %v3463_v56  ;;  %v3466_v17 = vmax.f32 %v2710_v53, 0.0  ;;  %v2555_v13 = vadd.f32 %v2554_v40, %v5502_v31  ;;  %v2712_v46 = vadd.f32 %v2711_v33, %v2551_v61  ;;  %3278 = vmatmul.mubr.bf16.vlgmr.msra.gmra.mxu1 %v6552_v22 }
 0x236   : > { %3126 = vmatprep.mubr.bf16.mxu0 %v6553_v62  ;;  %v2556_v23 = vpop.f32.mrf.mxu0  ;;  %3287 = vmatprep.mubr.bf16.mxu1 %v6554_v12  ;;  %v2717_v57 = vpop.f32.mrf.mxu1  ;;  %v2410_v33 = vadd.f32 %v5536_v54, %v2249_v32  ;;  %v2259_v54 = vadd.f32 %v5553_v15, %v5258_v63 }
 0x237   : > { %3566 = vst [vmem:[%s5645_s26 + $0x1e0] sm:$0xff] %v3466_v17  ;;  %v3620_v28 = vadd.f32 %v3619_v43, %v3466_v17  ;;  %v3467_v36 = vmax.f32 %v2712_v46, 0.0  ;;  %v2557_v45 = vadd.f32 %v2556_v23, %v5509_v19  ;;  %v2716_v4 = vadd.f32 %v2715_v20, %v2555_v13 }
 0x238   : > { %v2558_v31 = vpop.f32.mrf.mxu0  ;;  %v2719_v49 = vpop.f32.mrf.mxu1 }
 0x239   : > { %3567 = vst [vmem:[%s5645_s26 + $0x1e8] sm:$0xff] %v3467_v36  ;;  %v3652_v59 = vadd.f32 %v3651_v7, %v3467_v36  ;;  %v3470_v14 = vmax.f32 %v2716_v4, 0.0  ;;  %v2559_v48 = vadd.f32 %v2558_v31, %v6555_v0  ;;  %v2718_v11 = vadd.f32 %v2717_v57, %v2557_v45  ;;  %v6564_v0 = vld [vmem:[#allocation40_spill] sm:$0xff] }
 0x23a   : > { %v2560_v60 = vpop.f32.mrf.mxu0  ;;  %v2721_v44 = vpop.f32.mrf.mxu1 }
 0x23b   : > { %3570 = vst [vmem:[%s5645_s26 + $0x200] sm:$0xff] %v3470_v14  ;;  %v3621_v1 = vadd.f32 %v3620_v28, %v3470_v14  ;;  %v3471_v52 = vmax.f32 %v2718_v11, 0.0  ;;  %v2561_v55 = vadd.f32 %v2560_v60, %v2400_v21  ;;  %v2720_v19 = vadd.f32 %v2719_v49, %v2559_v48  ;;  %v6561_v28 = vld [vmem:[#allocation37_spill] sm:$0xff]  ;;  %v6562_v21 = vld [vmem:[#allocation38_spill] sm:$0xff] }
 0x23c   : > { %v2564_v41 = vpop.f32.mrf.mxu0  ;;  %3127 = vmatmul.mubr.bf16.gmra.mxu0 %v6556_v39  ;;  %v2725_v30 = vpop.f32.mrf.mxu1 }
 0x23d   : > { %3571 = vst [vmem:[%s5645_s26 + $0x208] sm:$0xff] %v3471_v52  ;;  %v3653_v9 = vadd.f32 %v3652_v59, %v3471_v52  ;;  %v3474_v26 = vmax.f32 %v2720_v19, 0.0  ;;  %v2565_v6 = vadd.f32 %v2564_v41, %v5523_v25  ;;  %v2722_v16 = vadd.f32 %v2721_v44, %v2561_v55  ;;  %3288 = vmatmul.mubr.bf16.gmra.mxu1 %v6557_v47  ;;  %v6563_v59 = vld [vmem:[#allocation39_spill] sm:$0xff]  ;;  %v6565_v19 = vld [vmem:[#allocation112_spill] sm:$0xff] }
 0x23e   : > { %3136 = vmatprep.mubr.bf16.mxu0 %v6558_v24  ;;  %v2566_v42 = vpop.f32.mrf.mxu0  ;;  %3297 = vmatprep.mubr.bf16.mxu1 %v6559_v27  ;;  %v2727_v53 = vpop.f32.mrf.mxu1 }
 0x23f   : > { %3574 = vst [vmem:[%s5645_s26 + $0x220] sm:$0xff] %v3474_v26  ;;  %v3622_v34 = vadd.f32 %v3621_v1, %v3474_v26  ;;  %v3475_v43 = vmax.f32 %v2722_v16, 0.0  ;;  %v2567_v56 = vadd.f32 %v2566_v42, %v5530_v29  ;;  %v2726_v61 = vadd.f32 %v2725_v30, %v2565_v6  ;;  %v6566_v30 = vld [vmem:[#allocation41_spill] sm:$0xff] }
 0x240   : > { %v2568_v25 = vpop.f32.mrf.mxu0  ;;  %v2729_v13 = vpop.f32.mrf.mxu1  ;;  %v2420_v1 = vadd.f32 %v5557_v10, %v2259_v54  ;;  %v2269_v10 = vadd.f32 %v5574_v58, %v5258_v63 }
 0x241   : > { %3575 = vst [vmem:[%s5645_s26 + $0x228] sm:$0xff] %v3475_v43  ;;  %v3654_v2 = vadd.f32 %v3653_v9, %v3475_v43  ;;  %v3478_v40 = vmax.f32 %v2726_v61, 0.0  ;;  %v2569_v7 = vadd.f32 %v2568_v25, %v6560_v8  ;;  %v2728_v17 = vadd.f32 %v2727_v53, %v2567_v56  ;;  %v6567_v43 = vld [vmem:[#allocation42_spill] sm:$0xff]  ;;  %v6568_v61 = vld [vmem:[#allocation43_spill] sm:$0xff] }
 0x242   : > { %v2570_v46 = vpop.f32.mrf.mxu0  ;;  %v2731_v23 = vpop.f32.mrf.mxu1  ;;  %v2430_v8 = vadd.f32 %v5578_v35, %v2269_v10 }
 0x243   : > { %3578 = vst [vmem:[%s5645_s26 + $0x240] sm:$0xff] %v3478_v40  ;;  %v3623_v22 = vadd.f32 %v3622_v34, %v3478_v40  ;;  %v3479_v20 = vmax.f32 %v2728_v17, 0.0  ;;  %v2571_v62 = vadd.f32 %v2570_v46, %v2410_v33  ;;  %v2730_v29 = vadd.f32 %v2729_v13, %v2569_v7  ;;  %v6569_v33 = vld [vmem:[#allocation44_spill] sm:$0xff] }
 0x244   : > { %v2574_v12 = vpop.f32.mrf.mxu0  ;;  %3137 = vmatmul.mubr.bf16.gmra.mxu0 %v6561_v28  ;;  %v2735_v31 = vpop.f32.mrf.mxu1  ;;  %v6570_v28 = vld [vmem:[#allocation45_spill] sm:$0xff] }
 0x245   : > { %3579 = vst [vmem:[%s5645_s26 + $0x248] sm:$0xff] %v3479_v20  ;;  %v3655_v36 = vadd.f32 %v3654_v2, %v3479_v20  ;;  %v3482_v45 = vmax.f32 %v2730_v29, 0.0  ;;  %v2575_v4 = vadd.f32 %v2574_v12, %v5544_v18  ;;  %v2732_v57 = vadd.f32 %v2731_v23, %v2571_v62  ;;  %3298 = vmatmul.mubr.bf16.gmra.mxu1 %v6562_v21  ;;  %v6572_v21 = vld [vmem:[#allocation47_spill] sm:$0xff] }
 0x246   : > { %3146 = vmatprep.mubr.bf16.mxu0 %v6563_v59  ;;  %v2576_v14 = vpop.f32.mrf.mxu0  ;;  %3307 = vmatprep.mubr.bf16.mxu1 %v6564_v0  ;;  %v2737_v60 = vpop.f32.mrf.mxu1  ;;  %v6573_v59 = vld [vmem:[#allocation48_spill] sm:$0xff] }
 0x247   : > { %3582 = vst [vmem:[%s5645_s26 + $0x260] sm:$0xff] %v3482_v45  ;;  %v3624_v15 = vadd.f32 %v3623_v22, %v3482_v45  ;;  %v3483_v48 = vmax.f32 %v2732_v57, 0.0  ;;  %v2577_v11 = vadd.f32 %v2576_v14, %v5551_v51  ;;  %v2736_v49 = vadd.f32 %v2735_v31, %v2575_v4  ;;  %v6571_v4 = vld [vmem:[#allocation46_spill] sm:$0xff] }
 0x248   : > { %v2578_v18 = vpop.f32.mrf.mxu0  ;;  %v2739_v41 = vpop.f32.mrf.mxu1 }
 0x249   : > { %3583 = vst [vmem:[%s5645_s26 + $0x268] sm:$0xff] %v3483_v48  ;;  %v3656_v52 = vadd.f32 %v3655_v36, %v3483_v48  ;;  %v3486_v55 = vmax.f32 %v2736_v49, 0.0  ;;  %v2579_v44 = vadd.f32 %v2578_v18, %v6565_v19  ;;  %v2738_v32 = vadd.f32 %v2737_v60, %v2577_v11 }
 0x24a   : > { %v2580_v39 = vpop.f32.mrf.mxu0  ;;  %v2741_v16 = vpop.f32.mrf.mxu1 }
 0x24b   : > { %3586 = vst [vmem:[%s5645_s26 + $0x280] sm:$0xff] %v3486_v55  ;;  %v3625_v9 = vadd.f32 %v3624_v15, %v3486_v55  ;;  %v3487_v26 = vmax.f32 %v2738_v32, 0.0  ;;  %v2581_v6 = vadd.f32 %v2580_v39, %v2420_v1  ;;  %v2740_v51 = vadd.f32 %v2739_v41, %v2579_v44  ;;  %v6574_v41 = vld [vmem:[#allocation49_spill] sm:$0xff]  ;;  %v6575_v39 = vld [vmem:[#allocation50_spill] sm:$0xff] }
 0x24c   : > { %v2584_v47 = vpop.f32.mrf.mxu0  ;;  %3147 = vmatmul.mubr.bf16.gmra.mxu0 %v6566_v30  ;;  %v2745_v56 = vpop.f32.mrf.mxu1 }
 0x24d   : > { %3587 = vst [vmem:[%s5645_s26 + $0x288] sm:$0xff] %v3487_v26  ;;  %v3657_v24 = vadd.f32 %v3656_v52, %v3487_v26  ;;  %v3490_v42 = vmax.f32 %v2740_v51, 0.0  ;;  %v2585_v27 = vadd.f32 %v2584_v47, %v5565_v38  ;;  %v2742_v34 = vadd.f32 %v2741_v16, %v2581_v6  ;;  %3308 = vmatmul.mubr.bf16.gmra.mxu1 %v6567_v43  ;;  %v6577_v51 = vld [vmem:[#allocation52_spill] sm:$0xff]  ;;  %v6580_v43 = vld [vmem:[#allocation55_spill] sm:$0xff] }
 0x24e   : > { %3156 = vmatprep.mubr.bf16.mxu0 %v6568_v61  ;;  %v2586_v53 = vpop.f32.mrf.mxu0  ;;  %3317 = vmatprep.mubr.bf16.mxu1 %v6569_v33  ;;  %v2747_v40 = vpop.f32.mrf.mxu1 }
 0x24f   : > { %3590 = vst [vmem:[%s5645_s26 + $0x2a0] sm:$0xff] %v3490_v42  ;;  %v3626_v63 = vadd.f32 %v3625_v9, %v3490_v42  ;;  %v3491_v58 = vmax.f32 %v2742_v34, 0.0  ;;  %v2587_v25 = vadd.f32 %v2586_v53, %v5572_v50  ;;  %v2746_v2 = vadd.f32 %v2745_v56, %v2585_v27  ;;  %v6576_v9 = vld [vmem:[#allocation51_spill] sm:$0xff]  ;;  %v6578_v27 = vld [vmem:[#allocation53_spill] sm:$0xff]  ;;  %v6579_v34 = vld [vmem:[#allocation54_spill] sm:$0xff] }
 0x250   : > { %v2588_v38 = vpop.f32.mrf.mxu0  ;;  %v2749_v22 = vpop.f32.mrf.mxu1  ;;  %v6581_v53 = vld [vmem:[#allocation56_spill] sm:$0xff] }
 0x251   : > { %3591 = vst [vmem:[%s5645_s26 + $0x2a8] sm:$0xff] %v3491_v58  ;;  %v3658_v7 = vadd.f32 %v3657_v24, %v3491_v58  ;;  %v3494_v17 = vmax.f32 %v2746_v2, 0.0  ;;  %v2589_v13 = vadd.f32 %v2588_v38, %v5576_v3  ;;  %v2748_v46 = vadd.f32 %v2747_v40, %v2587_v25  ;;  %v6584_v40 = vld [vmem:[#allocation57_spill] sm:$0xff]  ;;  %v6586_v38 = vld [vmem:[#allocation60_spill] sm:$0xff] }
 0x252   : > { %v2590_v20 = vpop.f32.mrf.mxu0  ;;  %v2751_v54 = vpop.f32.mrf.mxu1 }
 0x253   : > { %3594 = vst [vmem:[%s5645_s26 + $0x2c0] sm:$0xff] %v3494_v17  ;;  %v3627_v62 = vadd.f32 %v3626_v63, %v3494_v17  ;;  %v3495_v29 = vmax.f32 %v2748_v46, 0.0  ;;  %v2591_v23 = vadd.f32 %v2590_v20, %v2430_v8  ;;  %v2750_v50 = vadd.f32 %v2749_v22, %v2589_v13  ;;  %v6585_v8 = vld [vmem:[#allocation58_spill] sm:$0xff]  ;;  %v6588_v46 = vld [vmem:[#allocation61_spill] sm:$0xff] }
 0x254   : > { %v2594_v12 = vpop.f32.mrf.mxu0  ;;  %3157 = vmatmul.mubr.bf16.gmra.mxu0 %v6570_v28  ;;  %v2755_v57 = vpop.f32.mrf.mxu1  ;;  %v4314_v20 = vld [vmem:[%s5225_s13] sm:$0xf]  ;;  %v6590_v28 = vld [vmem:[#allocation63_spill] sm:$0xff]  ;;  %s6208_s13 = scalar_lea.hbm %s6305_s3, %s4208_s22  ;;  %s4319_s22 = sshll.u32 %s4463_s27, 4  ;;  %s4320_s22 = int_to_ptr.vmem [resolvable:$false] %s4319_s22 }
 0x255   : > { %3595 = vst [vmem:[%s5645_s26 + $0x2c8] sm:$0xff] %v3495_v29  ;;  %v3659_v35 = vadd.f32 %v3658_v7, %v3495_v29  ;;  %v3498_v36 = vmax.f32 %v2750_v50, 0.0  ;;  %v2595_v45 = vadd.f32 %v2594_v12, %v5586_v37  ;;  %v2752_v3 = vadd.f32 %v2751_v54, %v2591_v23  ;;  %3318 = vmatmul.mubr.bf16.gmra.mxu1 %v6571_v4  ;;  %v6587_v7 = vld [vmem:[#allocation59_spill] sm:$0xff]  ;;  %v6589_v50 = vld [vmem:[#allocation62_spill] sm:$0xff]  ;;  %s4321_s7 = scalar_lea.vmem %s4320_s22, 25600  ;;  %p4322_p10 = scmp.lt.s32.totalorder %s6203_s6, %s4320_s22 }
 0x256   : > { %3166 = vmatprep.mubr.bf16.mxu0 %v6572_v21  ;;  %v2596_v31 = vpop.f32.mrf.mxu0  ;;  %3327 = vmatprep.mubr.bf16.mxu1 %v6573_v59  ;;  %v2757_v11 = vpop.f32.mrf.mxu1  ;;  %v828_v17 = vsub.s32 2, %v6587_v7  ;;  %v832_v22 = vsub.s32 3, %v6587_v7  ;;  %p4323_p11 = scmp.lt.s32.totalorder %s4321_s7, %s4315_s8 }
 0x257   : > { %3598 = vst [vmem:[%s5645_s26 + $0x2e0] sm:$0xff] %v3498_v36  ;;  %v3628_v14 = vadd.f32 %v3627_v62, %v3498_v36  ;;  %v3499_v0 = vmax.f32 %v2752_v3, 0.0  ;;  %v2597_v15 = vadd.f32 %v2596_v31, %v5592_v5  ;;  %v2756_v48 = vadd.f32 %v2755_v57, %v2595_v45  ;;  %v6592_v45 = vld [vmem:[#allocation65_spill] sm:$0xff] }
 0x258   : > { %v2598_v37 = vpop.f32.mrf.mxu0  ;;  %v2759_v18 = vpop.f32.mrf.mxu1  ;;  %v5930_v62 = vrot.slane %v4314_v20, %v828_v17  ;;  %v5932_v29 = vrot.slane %v4314_v20, %v832_v22  ;;  %p4324_p12 = por %p4323_p11, %p4322_p10 }
 0x259   : > { %3599 = vst [vmem:[%s5645_s26 + $0x2e8] sm:$0xff] %v3499_v0  ;;  %v3660_v49 = vadd.f32 %v3659_v35, %v3499_v0  ;;  %v3502_v60 = vmax.f32 %v2756_v48, 0.0  ;;  %v2758_v1 = vadd.f32 %v2757_v11, %v2597_v15  ;;  %v6591_v35 = vld [vmem:[#allocation64_spill] sm:$0xff]  ;;  %v6593_v37 = vld [vmem:[#allocation67_spill] sm:$0xff] }
 0x25a   : > { %v2599_v52 = vpop.f32.mrf.mxu0  ;;  %v2760_v44 = vpop.f32.mrf.mxu1  ;;  %v6595_v18 = vld [vmem:[#allocation71_spill] sm:$0xff]  ;;  %p4325_p13 = pnand %p4324_p12, %p4318_p9 }
 0x25b   : > { %3602 = vst [vmem:[%s5645_s26 + $0x300] sm:$0xf] %v3502_v60  ;;  %v3630_v55 = vsel %vm3629_vm0, %v3502_v60, 0.0  ;;  %v3503_v19 = vmax.f32 %v2758_v1, 0.0  ;;  %v6594_v1 = vld [vmem:[#allocation69_spill] sm:$0xff] }
 0x25c   : > { %v3631_v32 = vadd.f32 %v3630_v55, %v3628_v14  ;;  %3167 = vmatmul.mubr.bf16.gmra.mxu0 %v6574_v41 }
 0x25d   : > { %3603 = vst [vmem:[%s5645_s26 + $0x308] sm:$0xf] %v3503_v19  ;;  %v3661_v5 = vsel %vm3629_vm0, %v3503_v19, 0.0  ;;  %3328 = vmatmul.mubr.bf16.gmra.mxu1 %v6575_v39  ;;  %3176 = vmatprep.mubr.bf16.mxu0 %v6576_v9  ;;  %v6596_v19 = vld [vmem:[#allocation74_spill] sm:$0xff] }
 0x25e   : > { %v3632_v26 = vrot.slane %v3631_v32, 4  ;;  %v3662_v6 = vadd.f32 %v3661_v5, %v3660_v49  ;;  %3337 = vmatprep.mubr.bf16.mxu1 %v6577_v51 }
 0x260   : > { %v3633_v16 = vadd.f32 %v3632_v26, %v3631_v32  ;;  %v3663_v10 = vrot.slane %v3662_v6, 4 }
 0x262   : > { %v3634_v47 = vrot.slane %v3633_v16, 2  ;;  %v3664_v30 = vadd.f32 %v3663_v10, %v3662_v6 }
 0x264   : > { %v3635_v24 = vadd.f32 %v3634_v47, %v3633_v16  ;;  %v3665_v42 = vrot.slane %v3664_v30, 2  ;;  %3177 = vmatmul.mubr.bf16.gmra.mxu0 %v6578_v27  ;;  %v6599_v27 = vld [vmem:[#allocation79_spill] sm:$0xff] }
 0x265   : > { %3338 = vmatmul.mubr.bf16.gmra.mxu1 %v6579_v34  ;;  %3186 = vmatprep.mubr.bf16.mxu0 %v6580_v43 }
 0x266   : > { %v3636_v56 = vrot.slane %v3635_v24, 1  ;;  %v3666_v61 = vadd.f32 %v3665_v42, %v3664_v30  ;;  %3347 = vmatprep.mubr.bf16.mxu1 %v6581_v53  ;;  %v6597_v30 = vld [vmem:[#allocation76_spill] sm:$0xff]  ;;  %v6598_v42 = vld [vmem:[#allocation77_spill] sm:$0xff] }
 0x268   : > { %v3637_v33 = vadd.f32 %v3636_v56, %v3635_v24  ;;  %v3667_v63 = vrot.slane %v3666_v61, 1 }
 0x26a   : > { %v3668_v58 = vadd.f32 %v3667_v63, %v3666_v61  ;;  %v5917_v25 = vmul.f32 0.0051020407, %v3637_v33  ;;  %v6600_v61 = vld [vmem:[#allocation82_spill] sm:$0xff] }
 0x26c   : > { %6582 = vst [vmem:[#allocation70_spill] sm:$0xff] %v5917_v25  ;;  %v5919_v2 = vmul.f32 0.0051020407, %v3668_v58  ;;  %3187 = vmatmul.mubr.bf16.gmra.mxu0 %v6584_v40 }
 0x26d   : > { %3348 = vmatmul.mubr.bf16.gmra.mxu1 %v6585_v8  ;;  %3196 = vmatprep.mubr.bf16.mxu0 %v6586_v38 }
 0x26e   : > { %6583 = vst [vmem:[#allocation66_spill] sm:$0xff] %v5919_v2  ;;  %3357 = vmatprep.mubr.bf16.mxu1 %v6588_v46 }
 0x274   : > { %v2796_v23 = vpop.f32.mrf.mxu0  ;;  %3197 = vmatmul.mubr.bf16.gmra.mxu0 %v6589_v50  ;;  %v2957_v12 = vpop.f32.mrf.mxu1  ;;  %v6601_v50 = vld [vmem:[#allocation84_spill] sm:$0xff] }
 0x275   : > { %v2797_v54 = vadd.f32 %v2796_v23, %v5930_v62  ;;  %3358 = vmatmul.mubr.bf16.gmra.mxu1 %v6590_v28  ;;  %3206 = vmatprep.mubr.bf16.mxu0 %v6591_v35  ;;  %v6603_v28 = vld [vmem:[#allocation87_spill] sm:$0xff] }
 0x276   : > { %v2798_v36 = vpop.f32.mrf.mxu0  ;;  %3367 = vmatprep.mubr.bf16.mxu1 %v6592_v45  ;;  %v2959_v57 = vpop.f32.mrf.mxu1 }
 0x277   : > { %v5939_v3 = vadd.f32 %v2957_v12, %v2797_v54  ;;  %v2799_v4 = vadd.f32 %v2798_v36, %v5932_v29  ;;  %v6602_v12 = vld [vmem:[#allocation85_spill] sm:$0xff] }
 0x278   : > { %v2800_v21 = vpop.f32.mrf.mxu0  ;;  %v2961_v14 = vpop.f32.mrf.mxu1 }
 0x279   : > { %v5942_v31 = vadd.f32 %v2959_v57, %v2799_v4  ;;  %v2801_v59 = vadd.f32 %v2800_v21, %v5930_v62  ;;  %v6604_v4 = vld [vmem:[#allocation90_spill] sm:$0xff] }
 0x27a   : > { %v2802_v0 = vpop.f32.mrf.mxu0  ;;  %v2963_v11 = vpop.f32.mrf.mxu1 }
 0x27b   : > { %v5945_v15 = vadd.f32 %v2961_v14, %v2801_v59  ;;  %v2803_v48 = vadd.f32 %v2802_v0, %v5932_v29 }
 0x27c   : > { %3207 = vmatmul.mubr.bf16.gmra.mxu0 %v6593_v37  ;;  %v2806_v49 = vpop.f32.mrf.mxu0  ;;  %v2967_v55 = vpop.f32.mrf.mxu1 }
 0x27d   : > { %v5949_v60 = vadd.f32 %v2963_v11, %v2803_v48  ;;  %3368 = vmatmul.mubr.bf16.gmra.mxu1 %v6594_v1  ;;  %3216 = vmatprep.mubr.bf16.mxu0 %v6595_v18  ;;  %v2807_v52 = vadd.f32 %v2806_v49, %v5930_v62 }
 0x27e   : > { %3377 = vmatprep.mubr.bf16.mxu1 %v6596_v19  ;;  %v2808_v44 = vpop.f32.mrf.mxu0  ;;  %v2969_v5 = vpop.f32.mrf.mxu1 }
 0x27f   : > { %v2809_v32 = vadd.f32 %v2808_v44, %v5932_v29  ;;  %v5956_v41 = vadd.f32 %v2967_v55, %v2807_v52  ;;  %v6605_v55 = vld [vmem:[#allocation91_spill] sm:$0xff]  ;;  %v6606_v44 = vld [vmem:[#allocation92_spill] sm:$0xff] }
 0x280   : > { %v2810_v39 = vpop.f32.mrf.mxu0  ;;  %v2971_v6 = vpop.f32.mrf.mxu1 }
 0x281   : > { %v2811_v9 = vadd.f32 %v2810_v39, %v5930_v62  ;;  %v5959_v26 = vadd.f32 %v2969_v5, %v2809_v32 }
 0x282   : > { %v2812_v51 = vpop.f32.mrf.mxu0  ;;  %v2973_v47 = vpop.f32.mrf.mxu1 }
 0x283   : > { %v2813_v16 = vadd.f32 %v2812_v51, %v5932_v29  ;;  %v5962_v10 = vadd.f32 %v2971_v6, %v2811_v9 }
 0x284   : > { %3217 = vmatmul.mubr.bf16.gmra.mxu0 %v6597_v30  ;;  %v2816_v24 = vpop.f32.mrf.mxu0  ;;  %v2977_v56 = vpop.f32.mrf.mxu1 }
 0x285   : > { %3378 = vmatmul.mubr.bf16.gmra.mxu1 %v6598_v42  ;;  %3226 = vmatprep.mubr.bf16.mxu0 %v6599_v27  ;;  %v2817_v34 = vadd.f32 %v2816_v24, %v5930_v62  ;;  %v5968_v43 = vadd.f32 %v2973_v47, %v2813_v16 }
 0x286   : > { %3387 = vmatprep.mubr.bf16.mxu1 %v6600_v61  ;;  %v2818_v53 = vpop.f32.mrf.mxu0  ;;  %v2979_v58 = vpop.f32.mrf.mxu1 }
 0x287   : > { %v2819_v33 = vadd.f32 %v2818_v53, %v5932_v29  ;;  %v5972_v63 = vadd.f32 %v2977_v56, %v2817_v34 }
 0x288   : > { %v2820_v40 = vpop.f32.mrf.mxu0  ;;  %v2981_v17 = vpop.f32.mrf.mxu1 }
 0x289   : > { %v2821_v8 = vadd.f32 %v2820_v40, %v5930_v62  ;;  %v5975_v38 = vadd.f32 %v2979_v58, %v2819_v33 }
 0x28a   : > { %v2822_v46 = vpop.f32.mrf.mxu0  ;;  %v2983_v23 = vpop.f32.mrf.mxu1 }
 0x28b   : > { %v2823_v22 = vadd.f32 %v2822_v46, %v5932_v29  ;;  %v5978_v20 = vadd.f32 %v2981_v17, %v2821_v8 }
 0x28c   : > { %3227 = vmatmul.mubr.bf16.gmra.mxu0 %v6601_v50  ;;  %v2826_v54 = vpop.f32.mrf.mxu0  ;;  %v2987_v45 = vpop.f32.mrf.mxu1 }
 0x28d   : > { %3388 = vmatmul.mubr.bf16.gmra.mxu1 %v6602_v12  ;;  %3236 = vmatprep.mubr.bf16.mxu0 %v6603_v28  ;;  %v2827_v35 = vadd.f32 %v2826_v54, %v5930_v62  ;;  %v5984_v36 = vadd.f32 %v2983_v23, %v2823_v22 }
 0x28e   : > { %3397 = vmatprep.mubr.bf16.mxu1 %v6604_v4  ;;  %v2828_v57 = vpop.f32.mrf.mxu0  ;;  %v2989_v14 = vpop.f32.mrf.mxu1 }
 0x28f   : > { %v2829_v21 = vadd.f32 %v2828_v57, %v5932_v29  ;;  %v5988_v59 = vadd.f32 %v2987_v45, %v2827_v35 }
 0x290   : > { %v2830_v0 = vpop.f32.mrf.mxu0  ;;  %v2991_v37 = vpop.f32.mrf.mxu1 }
 0x291   : > { %v2831_v48 = vadd.f32 %v2830_v0, %v5930_v62  ;;  %v5991_v11 = vadd.f32 %v2989_v14, %v2829_v21 }
 0x292   : > { %v2832_v49 = vpop.f32.mrf.mxu0  ;;  %v2993_v52 = vpop.f32.mrf.mxu1 }
 0x293   : > { %v2833_v1 = vadd.f32 %v2832_v49, %v5932_v29  ;;  %v5994_v18 = vadd.f32 %v2991_v37, %v2831_v48 }
 0x294   : > { %3237 = vmatmul.mubr.bf16.gmra.mxu0 %v6605_v55  ;;  %v2836_v19 = vpop.f32.mrf.mxu0  ;;  %v2997_v39 = vpop.f32.mrf.mxu1 }
 0x295   : > { %3398 = vmatmul.mubr.bf16.gmra.mxu1 %v6606_v44  ;;  %v2837_v32 = vadd.f32 %v2836_v19, %v5930_v62  ;;  %v5999_v5 = vadd.f32 %v2993_v52, %v2833_v1 }
 0x296   : > { %v2838_v9 = vpop.f32.mrf.mxu0  ;;  %v2999_v16 = vpop.f32.mrf.mxu1 }
 0x297   : > { %v2839_v6 = vadd.f32 %v2838_v9, %v5932_v29  ;;  %v6002_v51 = vadd.f32 %v2997_v39, %v2837_v32 }
 0x298   : > { %v2840_v47 = vpop.f32.mrf.mxu0  ;;  %v3001_v42 = vpop.f32.mrf.mxu1 }
 0x299   : > { %v2841_v30 = vadd.f32 %v2840_v47, %v5930_v62  ;;  %v6005_v24 = vadd.f32 %v2999_v16, %v2839_v6 }
 0x29a   : > { %v2842_v27 = vpop.f32.mrf.mxu0  ;;  %v3003_v61 = vpop.f32.mrf.mxu1 }
 0x29b   : > { %v2843_v34 = vadd.f32 %v2842_v27, %v5932_v29  ;;  %v6008_v56 = vadd.f32 %v3001_v42, %v2841_v30 }
 0x29c   : > { %v2846_v53 = vpop.f32.mrf.mxu0  ;;  %v3007_v40 = vpop.f32.mrf.mxu1 }
 0x29d   : > { %v2847_v33 = vadd.f32 %v2846_v53, %v5930_v62  ;;  %v6011_v58 = vadd.f32 %v3003_v61, %v2843_v34 }
 0x29e   : > { %v2848_v8 = vpop.f32.mrf.mxu0  ;;  %v3009_v22 = vpop.f32.mrf.mxu1 }
 0x29f   : > { %v2849_v17 = vadd.f32 %v2848_v8, %v5932_v29  ;;  %v6014_v46 = vadd.f32 %v3007_v40, %v2847_v33 }
 0x2a0   : > { %v2850_v23 = vpop.f32.mrf.mxu0  ;;  %v3011_v12 = vpop.f32.mrf.mxu1 }
 0x2a1   : > { %v2851_v50 = vadd.f32 %v2850_v23, %v5930_v62  ;;  %v6017_v54 = vadd.f32 %v3009_v22, %v2849_v17 }
 0x2a2   : > { %v2852_v28 = vpop.f32.mrf.mxu0  ;;  %v3013_v4 = vpop.f32.mrf.mxu1 }
 0x2a3   : > { %v2853_v35 = vadd.f32 %v2852_v28, %v5932_v29  ;;  %v6020_v45 = vadd.f32 %v3011_v12, %v2851_v50 }
 0x2a4   : > { %v2856_v57 = vpop.f32.mrf.mxu0  ;;  %v3017_v0 = vpop.f32.mrf.mxu1 }
 0x2a5   : > { %v2857_v21 = vadd.f32 %v2856_v57, %v5930_v62  ;;  %v6023_v14 = vadd.f32 %v3013_v4, %v2853_v35 }
 0x2a6   : > { %v2858_v48 = vpop.f32.mrf.mxu0  ;;  %v3019_v1 = vpop.f32.mrf.mxu1 }
 0x2a7   : > { %v2859_v37 = vadd.f32 %v2858_v48, %v5932_v29  ;;  %v6026_v49 = vadd.f32 %v3017_v0, %v2857_v21 }
 0x2a8   : > { %v2860_v52 = vpop.f32.mrf.mxu0  ;;  %v3021_v44 = vpop.f32.mrf.mxu1 }
 0x2a9   : > { %v2861_v55 = vadd.f32 %v2860_v52, %v5930_v62  ;;  %v6029_v19 = vadd.f32 %v3019_v1, %v2859_v37 }
 0x2aa   : > { %v2862_v32 = vpop.f32.mrf.mxu0  ;;  %v3023_v6 = vpop.f32.mrf.mxu1 }
 0x2ab   : > { %v2863_v39 = vadd.f32 %v2862_v32, %v5932_v29  ;;  %v6032_v9 = vadd.f32 %v3021_v44, %v2861_v55 }
 0x2ac   : > { %v2866_v16 = vpop.f32.mrf.mxu0  ;;  %v3027_v42 = vpop.f32.mrf.mxu1 }
 0x2ad   : > { %v2867_v47 = vadd.f32 %v2866_v16, %v5930_v62  ;;  %v6035_v30 = vadd.f32 %v3023_v6, %v2863_v39 }
 0x2ae   : > { %v2868_v27 = vpop.f32.mrf.mxu0  ;;  %v3029_v53 = vpop.f32.mrf.mxu1 }
 0x2af   : > { %v2869_v34 = vadd.f32 %v2868_v27, %v5932_v29  ;;  %v6038_v61 = vadd.f32 %v3027_v42, %v2867_v47 }
 0x2b0   : > { %v2870_v33 = vpop.f32.mrf.mxu0  ;;  %v3031_v17 = vpop.f32.mrf.mxu1 }
 0x2b1   : > { %v2871_v40 = vadd.f32 %v2870_v33, %v5930_v62  ;;  %v6041_v8 = vadd.f32 %v3029_v53, %v2869_v34 }
 0x2b2   : > { %v2872_v22 = vpop.f32.mrf.mxu0  ;;  %v3033_v12 = vpop.f32.mrf.mxu1 }
 0x2b3   : > { %v2873_v23 = vadd.f32 %v2872_v22, %v5932_v29  ;;  %v6044_v50 = vadd.f32 %v3031_v17, %v2871_v40 }
 0x2b4   : > { %v2876_v28 = vpop.f32.mrf.mxu0  ;;  %v3037_v57 = vpop.f32.mrf.mxu1 }
 0x2b5   : > { %v2877_v35 = vadd.f32 %v2876_v28, %v5930_v62  ;;  %v6047_v4 = vadd.f32 %v3033_v12, %v2873_v23 }
 0x2b6   : > { %v2878_v21 = vpop.f32.mrf.mxu0  ;;  %v3039_v37 = vpop.f32.mrf.mxu1 }
 0x2b7   : > { %v2879_v0 = vadd.f32 %v2878_v21, %v5932_v29  ;;  %v6050_v48 = vadd.f32 %v3037_v57, %v2877_v35 }
 0x2b8   : > { %v2880_v1 = vpop.f32.mrf.mxu0  ;;  %v3041_v44 = vpop.f32.mrf.mxu1 }
 0x2b9   : > { %v2881_v52 = vadd.f32 %v2880_v1, %v5930_v62  ;;  %v6053_v55 = vadd.f32 %v3039_v37, %v2879_v0 }
 0x2ba   : > { %v2882_v32 = vpop.f32.mrf.mxu0  ;;  %v3043_v16 = vpop.f32.mrf.mxu1 }
 0x2bb   : > { %v2883_v39 = vadd.f32 %v2882_v32, %v5932_v29  ;;  %v6056_v6 = vadd.f32 %v3041_v44, %v2881_v52 }
 0x2bc   : > { %v2886_v47 = vpop.f32.mrf.mxu0  ;;  %v3047_v34 = vpop.f32.mrf.mxu1 }
 0x2bd   : > { %v2887_v42 = vadd.f32 %v2886_v47, %v5930_v62  ;;  %v6059_v27 = vadd.f32 %v3043_v16, %v2883_v39 }
 0x2be   : > { %v2888_v53 = vpop.f32.mrf.mxu0  ;;  %v3049_v17 = vpop.f32.mrf.mxu1 }
 0x2bf   : > { %v2889_v33 = vadd.f32 %v2888_v53, %v5932_v29  ;;  %v6062_v40 = vadd.f32 %v3047_v34, %v2887_v42 }
 0x2c0   : > { %v2890_v22 = vpop.f32.mrf.mxu0  ;;  %v3051_v28 = vpop.f32.mrf.mxu1 }
 0x2c1   : > { %v2891_v23 = vadd.f32 %v2890_v22, %v5930_v62  ;;  %v6065_v12 = vadd.f32 %v3049_v17, %v2889_v33 }
 0x2c2   : > { %v2892_v35 = vpop.f32.mrf.mxu0  ;;  %v3053_v0 = vpop.f32.mrf.mxu1 }
 0x2c3   : > { %v2893_v57 = vadd.f32 %v2892_v35, %v5932_v29  ;;  %v6068_v21 = vadd.f32 %v3051_v28, %v2891_v23 }
 0x2c4   : > { %v2896_v37 = vpop.f32.mrf.mxu0  ;;  %v3057_v44 = vpop.f32.mrf.mxu1 }
 0x2c5   : > { %v2897_v1 = vadd.f32 %v2896_v37, %v5930_v62  ;;  %v6071_v52 = vadd.f32 %v3053_v0, %v2893_v57 }
 0x2c6   : > { %v2898_v32 = vpop.f32.mrf.mxu0  ;;  %v3059_v47 = vpop.f32.mrf.mxu1 }
 0x2c7   : > { %v2899_v39 = vadd.f32 %v2898_v32, %v5932_v29  ;;  %v6074_v16 = vadd.f32 %v3057_v44, %v2897_v1 }
 0x2c8   : > { %v2900_v42 = vpop.f32.mrf.mxu0  ;;  %v3061_v33 = vpop.f32.mrf.mxu1 }
 0x2c9   : > { %v2901_v34 = vadd.f32 %v2900_v42, %v5930_v62  ;;  %v6077_v53 = vadd.f32 %v3059_v47, %v2899_v39 }
 0x2ca   : > { %v2902_v17 = vpop.f32.mrf.mxu0  ;;  %v3063_v28 = vpop.f32.mrf.mxu1 }
 0x2cb   : > { %v2903_v22 = vadd.f32 %v2902_v17, %v5932_v29  ;;  %v6080_v23 = vadd.f32 %v3061_v33, %v2901_v34 }
 0x2cc   : > { %v2906_v35 = vpop.f32.mrf.mxu0  ;;  %v3067_v37 = vpop.f32.mrf.mxu1 }
 0x2cd   : > { %v2907_v57 = vadd.f32 %v2906_v35, %v5930_v62  ;;  %v6083_v0 = vadd.f32 %v3063_v28, %v2903_v22 }
 0x2ce   : > { %v2908_v1 = vpop.f32.mrf.mxu0  ;;  %v3069_v39 = vpop.f32.mrf.mxu1 }
 0x2cf   : > { %v2909_v44 = vadd.f32 %v2908_v1, %v5932_v29  ;;  %v6086_v32 = vadd.f32 %v3067_v37, %v2907_v57 }
 0x2d0   : > { %v2910_v47 = vpop.f32.mrf.mxu0  ;;  %v3071_v34 = vpop.f32.mrf.mxu1 }
 0x2d1   : > { %v2911_v42 = vadd.f32 %v2910_v47, %v5930_v62  ;;  %v6089_v13 = vadd.f32 %v3069_v39, %v2909_v44 }
 0x2d2   : > { %v2912_v33 = vpop.f32.mrf.mxu0  ;;  %v3073_v22 = vpop.f32.mrf.mxu1 }
 0x2d3   : > { %6607 = vst [vmem:[#allocation10_spill] sm:$0xff] %v6089_v13  ;;  %v2913_v17 = vadd.f32 %v2912_v33, %v5932_v29  ;;  %v6092_v2 = vadd.f32 %v3071_v34, %v2911_v42 }
 0x2d4   : > { %v2916_v28 = vpop.f32.mrf.mxu0  ;;  %v3077_v57 = vpop.f32.mrf.mxu1 }
 0x2d5   : > { %6608 = vst [vmem:[#allocation68_spill] sm:$0xff] %v6092_v2  ;;  %v2917_v35 = vadd.f32 %v2916_v28, %v5930_v62  ;;  %v6095_v25 = vadd.f32 %v3073_v22, %v2913_v17 }
 0x2d6   : > { %v2918_v37 = vpop.f32.mrf.mxu0  ;;  %v3079_v44 = vpop.f32.mrf.mxu1 }
 0x2d7   : > { %v2919_v1 = vadd.f32 %v2918_v37, %v5932_v29  ;;  %v6098_v7 = vadd.f32 %v3077_v57, %v2917_v35 }
 0x2d8   : > { %v2920_v39 = vpop.f32.mrf.mxu0  ;;  %v3081_v13 = vpop.f32.mrf.mxu1 }
 0x2d9   : > { %v6100_v47 = vadd.f32 %v3079_v44, %v2919_v1 }
 0x2da   : > { %v2921_v42 = vpop.f32.mrf.mxu0  ;;  %v3082_v34 = vpop.f32.mrf.mxu1 }
 0x2f4   : > { %v3118_v33 = vpop.f32.mrf.mxu0 }
 0x2f5   : > { %v3119_v2 = vadd.f32 %v3118_v33, %v5939_v3  ;;  %v3279_v62 = vpop.f32.mrf.mxu1 }
 0x2f6   : > { %v3120_v17 = vpop.f32.mrf.mxu0 }
 0x2f7   : > { %v3280_v22 = vadd.f32 %v3279_v62, %v3119_v2  ;;  %v3121_v28 = vadd.f32 %v3120_v17, %v5942_v31  ;;  %v3281_v29 = vpop.f32.mrf.mxu1 }
 0x2f8   : > { %v3122_v35 = vpop.f32.mrf.mxu0 }
 0x2f9   : > { %v3408_v57 = vmax.f32 %v3280_v22, 0.0  ;;  %v3282_v37 = vadd.f32 %v3281_v29, %v3121_v28  ;;  %v3123_v1 = vadd.f32 %v3122_v35, %v5945_v15  ;;  %v3283_v13 = vpop.f32.mrf.mxu1 }
 0x2fa   : > { %v3124_v44 = vpop.f32.mrf.mxu0 }
 0x2fb   : > { %3508 = vst [vmem:[%s5645_s26 + $0x10] sm:$0xff] %v3408_v57  ;;  %v3409_v39 = vmax.f32 %v3282_v37, 0.0  ;;  %v3284_v42 = vadd.f32 %v3283_v13, %v3123_v1  ;;  %v3125_v3 = vadd.f32 %v3124_v44, %v5949_v60  ;;  %v3285_v34 = vpop.f32.mrf.mxu1 }
 0x2fc   : > { %v3128_v33 = vpop.f32.mrf.mxu0 }
 0x2fd   : > { %3509 = vst [vmem:[%s5645_s26 + $0x18] sm:$0xff] %v3409_v39  ;;  %v3412_v2 = vmax.f32 %v3284_v42, 0.0  ;;  %v3286_v31 = vadd.f32 %v3285_v34, %v3125_v3  ;;  %v3129_v62 = vadd.f32 %v3128_v33, %v5956_v41  ;;  %v3289_v17 = vpop.f32.mrf.mxu1 }
 0x2fe   : > { %v3130_v22 = vpop.f32.mrf.mxu0 }
 0x2ff   : > { %3512 = vst [vmem:[%s5645_s26 + $0x30] sm:$0xff] %v3412_v2  ;;  %v3669_v15 = vadd.f32 %v3412_v2, %v3408_v57  ;;  %v3413_v28 = vmax.f32 %v3286_v31, 0.0  ;;  %v3290_v29 = vadd.f32 %v3289_v17, %v3129_v62  ;;  %v3131_v35 = vadd.f32 %v3130_v22, %v5959_v26  ;;  %v3291_v37 = vpop.f32.mrf.mxu1 }
 0x300   : > { %v3132_v60 = vpop.f32.mrf.mxu0 }
 0x301   : > { %3513 = vst [vmem:[%s5645_s26 + $0x38] sm:$0xff] %v3413_v28  ;;  %v3700_v1 = vadd.f32 %v3413_v28, %v3409_v39  ;;  %v3416_v13 = vmax.f32 %v3290_v29, 0.0  ;;  %v3292_v44 = vadd.f32 %v3291_v37, %v3131_v35  ;;  %v3133_v42 = vadd.f32 %v3132_v60, %v5962_v10  ;;  %v3293_v3 = vpop.f32.mrf.mxu1 }
 0x302   : > { %v3134_v41 = vpop.f32.mrf.mxu0 }
 0x303   : > { %3516 = vst [vmem:[%s5645_s26 + $0x50] sm:$0xff] %v3416_v13  ;;  %v3670_v34 = vadd.f32 %v3669_v15, %v3416_v13  ;;  %v3417_v33 = vmax.f32 %v3292_v44, 0.0  ;;  %v3294_v57 = vadd.f32 %v3293_v3, %v3133_v42  ;;  %v3135_v2 = vadd.f32 %v3134_v41, %v5968_v43  ;;  %v3295_v31 = vpop.f32.mrf.mxu1 }
 0x304   : > { %v3138_v26 = vpop.f32.mrf.mxu0 }
 0x305   : > { %3517 = vst [vmem:[%s5645_s26 + $0x58] sm:$0xff] %v3417_v33  ;;  %v3701_v62 = vadd.f32 %v3700_v1, %v3417_v33  ;;  %v3420_v17 = vmax.f32 %v3294_v57, 0.0  ;;  %v3296_v39 = vadd.f32 %v3295_v31, %v3135_v2  ;;  %v3139_v22 = vadd.f32 %v3138_v26, %v5972_v63  ;;  %v3299_v28 = vpop.f32.mrf.mxu1 }
 0x306   : > { %v3140_v10 = vpop.f32.mrf.mxu0 }
 0x307   : > { %3520 = vst [vmem:[%s5645_s26 + $0x70] sm:$0xff] %v3420_v17  ;;  %v3671_v29 = vadd.f32 %v3670_v34, %v3420_v17  ;;  %v3421_v35 = vmax.f32 %v3296_v39, 0.0  ;;  %v3300_v15 = vadd.f32 %v3299_v28, %v3139_v22  ;;  %v3141_v37 = vadd.f32 %v3140_v10, %v5975_v38  ;;  %v3301_v60 = vpop.f32.mrf.mxu1 }
 0x308   : > { %v3142_v43 = vpop.f32.mrf.mxu0 }
 0x309   : > { %3521 = vst [vmem:[%s5645_s26 + $0x78] sm:$0xff] %v3421_v35  ;;  %v3702_v13 = vadd.f32 %v3701_v62, %v3421_v35  ;;  %v3424_v44 = vmax.f32 %v3300_v15, 0.0  ;;  %v3302_v1 = vadd.f32 %v3301_v60, %v3141_v37  ;;  %v3143_v42 = vadd.f32 %v3142_v43, %v5978_v20  ;;  %v3303_v3 = vpop.f32.mrf.mxu1 }
 0x30a   : > { %v3144_v63 = vpop.f32.mrf.mxu0 }
 0x30b   : > { %3524 = vst [vmem:[%s5645_s26 + $0x90] sm:$0xff] %v3424_v44  ;;  %v3672_v41 = vadd.f32 %v3671_v29, %v3424_v44  ;;  %v3425_v33 = vmax.f32 %v3302_v1, 0.0  ;;  %v3304_v34 = vadd.f32 %v3303_v3, %v3143_v42  ;;  %v3145_v57 = vadd.f32 %v3144_v63, %v5984_v36  ;;  %v3305_v2 = vpop.f32.mrf.mxu1 }
 0x30c   : > { %v3148_v38 = vpop.f32.mrf.mxu0 }
 0x30d   : > { %3525 = vst [vmem:[%s5645_s26 + $0x98] sm:$0xff] %v3425_v33  ;;  %v3703_v31 = vadd.f32 %v3702_v13, %v3425_v33  ;;  %v3428_v26 = vmax.f32 %v3304_v34, 0.0  ;;  %v3306_v62 = vadd.f32 %v3305_v2, %v3145_v57  ;;  %v3149_v17 = vadd.f32 %v3148_v38, %v5988_v59  ;;  %v3309_v39 = vpop.f32.mrf.mxu1 }
 0x30e   : > { %v3150_v20 = vpop.f32.mrf.mxu0 }
 0x30f   : > { %3528 = vst [vmem:[%s5645_s26 + $0xb0] sm:$0xff] %v3428_v26  ;;  %v3673_v22 = vadd.f32 %v3672_v41, %v3428_v26  ;;  %v3429_v28 = vmax.f32 %v3306_v62, 0.0  ;;  %v3310_v10 = vadd.f32 %v3309_v39, %v3149_v17  ;;  %v3151_v29 = vadd.f32 %v3150_v20, %v5991_v11  ;;  %v3311_v35 = vpop.f32.mrf.mxu1 }
 0x310   : > { %v3152_v36 = vpop.f32.mrf.mxu0 }
 0x311   : > { %3529 = vst [vmem:[%s5645_s26 + $0xb8] sm:$0xff] %v3429_v28  ;;  %v3704_v15 = vadd.f32 %v3703_v31, %v3429_v28  ;;  %v3432_v37 = vmax.f32 %v3310_v10, 0.0  ;;  %v3312_v60 = vadd.f32 %v3311_v35, %v3151_v29  ;;  %v3153_v43 = vadd.f32 %v3152_v36, %v5994_v18  ;;  %v3313_v13 = vpop.f32.mrf.mxu1 }
 0x312   : > { %v3154_v59 = vpop.f32.mrf.mxu0 }
 0x313   : > { %3532 = vst [vmem:[%s5645_s26 + $0xd0] sm:$0xff] %v3432_v37  ;;  %v3674_v44 = vadd.f32 %v3673_v22, %v3432_v37  ;;  %v3433_v1 = vmax.f32 %v3312_v60, 0.0  ;;  %v3314_v42 = vadd.f32 %v3313_v13, %v3153_v43  ;;  %v3155_v3 = vadd.f32 %v3154_v59, %v5999_v5  ;;  %v3315_v63 = vpop.f32.mrf.mxu1 }
 0x314   : > { %v3158_v11 = vpop.f32.mrf.mxu0 }
 0x315   : > { %3533 = vst [vmem:[%s5645_s26 + $0xd8] sm:$0xff] %v3433_v1  ;;  %v3705_v41 = vadd.f32 %v3704_v15, %v3433_v1  ;;  %v3436_v33 = vmax.f32 %v3314_v42, 0.0  ;;  %v3316_v34 = vadd.f32 %v3315_v63, %v3155_v3  ;;  %v3159_v57 = vadd.f32 %v3158_v11, %v6002_v51  ;;  %v3319_v2 = vpop.f32.mrf.mxu1 }
 0x316   : > { %v3160_v18 = vpop.f32.mrf.mxu0 }
 0x317   : > { %3536 = vst [vmem:[%s5645_s26 + $0xf0] sm:$0xff] %v3436_v33  ;;  %v3675_v38 = vadd.f32 %v3674_v44, %v3436_v33  ;;  %v3437_v31 = vmax.f32 %v3316_v34, 0.0  ;;  %v3320_v26 = vadd.f32 %v3319_v2, %v3159_v57  ;;  %v3161_v62 = vadd.f32 %v3160_v18, %v6005_v24  ;;  %v3321_v17 = vpop.f32.mrf.mxu1 }
 0x318   : > { %v3162_v5 = vpop.f32.mrf.mxu0 }
 0x319   : > { %3537 = vst [vmem:[%s5645_s26 + $0xf8] sm:$0xff] %v3437_v31  ;;  %v3706_v39 = vadd.f32 %v3705_v41, %v3437_v31  ;;  %v3440_v20 = vmax.f32 %v3320_v26, 0.0  ;;  %v3322_v22 = vadd.f32 %v3321_v17, %v3161_v62  ;;  %v3163_v28 = vadd.f32 %v3162_v5, %v6008_v56  ;;  %v3323_v10 = vpop.f32.mrf.mxu1 }
 0x31a   : > { %v3164_v51 = vpop.f32.mrf.mxu0 }
 0x31b   : > { %3540 = vst [vmem:[%s5645_s26 + $0x110] sm:$0xff] %v3440_v20  ;;  %v3676_v29 = vadd.f32 %v3675_v38, %v3440_v20  ;;  %v3441_v35 = vmax.f32 %v3322_v22, 0.0  ;;  %v3324_v36 = vadd.f32 %v3323_v10, %v3163_v28  ;;  %v3165_v15 = vadd.f32 %v3164_v51, %v6011_v58  ;;  %v3325_v37 = vpop.f32.mrf.mxu1 }
 0x31c   : > { %v3168_v24 = vpop.f32.mrf.mxu0 }
 0x31d   : > { %3541 = vst [vmem:[%s5645_s26 + $0x118] sm:$0xff] %v3441_v35  ;;  %v3707_v60 = vadd.f32 %v3706_v39, %v3441_v35  ;;  %v3444_v43 = vmax.f32 %v3324_v36, 0.0  ;;  %v3326_v13 = vadd.f32 %v3325_v37, %v3165_v15  ;;  %v3169_v59 = vadd.f32 %v3168_v24, %v6014_v46  ;;  %v3329_v44 = vpop.f32.mrf.mxu1 }
 0x31e   : > { %v3170_v56 = vpop.f32.mrf.mxu0 }
 0x31f   : > { %3544 = vst [vmem:[%s5645_s26 + $0x130] sm:$0xff] %v3444_v43  ;;  %v3677_v1 = vadd.f32 %v3676_v29, %v3444_v43  ;;  %v3445_v42 = vmax.f32 %v3326_v13, 0.0  ;;  %v3330_v3 = vadd.f32 %v3329_v44, %v3169_v59  ;;  %v3171_v63 = vadd.f32 %v3170_v56, %v6017_v54  ;;  %v3331_v11 = vpop.f32.mrf.mxu1 }
 0x320   : > { %v3172_v58 = vpop.f32.mrf.mxu0 }
 0x321   : > { %3545 = vst [vmem:[%s5645_s26 + $0x138] sm:$0xff] %v3445_v42  ;;  %v3708_v41 = vadd.f32 %v3707_v60, %v3445_v42  ;;  %v3448_v33 = vmax.f32 %v3330_v3, 0.0  ;;  %v3332_v34 = vadd.f32 %v3331_v11, %v3171_v63  ;;  %v3173_v57 = vadd.f32 %v3172_v58, %v6020_v45  ;;  %v3333_v2 = vpop.f32.mrf.mxu1 }
 0x322   : > { %v3174_v46 = vpop.f32.mrf.mxu0 }
 0x323   : > { %3548 = vst [vmem:[%s5645_s26 + $0x150] sm:$0xff] %v3448_v33  ;;  %v3678_v18 = vadd.f32 %v3677_v1, %v3448_v33  ;;  %v3449_v38 = vmax.f32 %v3332_v34, 0.0  ;;  %v3334_v31 = vadd.f32 %v3333_v2, %v3173_v57  ;;  %v3175_v26 = vadd.f32 %v3174_v46, %v6023_v14  ;;  %v3335_v62 = vpop.f32.mrf.mxu1 }
 0x324   : > { %v3178_v54 = vpop.f32.mrf.mxu0 }
 0x325   : > { %3549 = vst [vmem:[%s5645_s26 + $0x158] sm:$0xff] %v3449_v38  ;;  %v3709_v17 = vadd.f32 %v3708_v41, %v3449_v38  ;;  %v3452_v5 = vmax.f32 %v3334_v31, 0.0  ;;  %v3336_v39 = vadd.f32 %v3335_v62, %v3175_v26  ;;  %v3179_v20 = vadd.f32 %v3178_v54, %v6026_v49  ;;  %v3339_v22 = vpop.f32.mrf.mxu1 }
 0x326   : > { %v3180_v45 = vpop.f32.mrf.mxu0 }
 0x327   : > { %3552 = vst [vmem:[%s5645_s26 + $0x170] sm:$0xff] %v3452_v5  ;;  %v3679_v28 = vadd.f32 %v3678_v18, %v3452_v5  ;;  %v3453_v10 = vmax.f32 %v3336_v39, 0.0  ;;  %v3340_v51 = vadd.f32 %v3339_v22, %v3179_v20  ;;  %v3181_v29 = vadd.f32 %v3180_v45, %v6029_v19  ;;  %v3341_v35 = vpop.f32.mrf.mxu1 }
 0x328   : > { %v3182_v14 = vpop.f32.mrf.mxu0 }
 0x329   : > { %3553 = vst [vmem:[%s5645_s26 + $0x178] sm:$0xff] %v3453_v10  ;;  %v3710_v36 = vadd.f32 %v3709_v17, %v3453_v10  ;;  %v3456_v15 = vmax.f32 %v3340_v51, 0.0  ;;  %v3342_v37 = vadd.f32 %v3341_v35, %v3181_v29  ;;  %v3183_v24 = vadd.f32 %v3182_v14, %v6032_v9  ;;  %v3343_v60 = vpop.f32.mrf.mxu1 }
 0x32a   : > { %v3184_v49 = vpop.f32.mrf.mxu0 }
 0x32b   : > { %3556 = vst [vmem:[%s5645_s26 + $0x190] sm:$0xff] %v3456_v15  ;;  %v3680_v43 = vadd.f32 %v3679_v28, %v3456_v15  ;;  %v3457_v13 = vmax.f32 %v3342_v37, 0.0  ;;  %v3344_v59 = vadd.f32 %v3343_v60, %v3183_v24  ;;  %v3185_v44 = vadd.f32 %v3184_v49, %v6035_v30  ;;  %v3345_v56 = vpop.f32.mrf.mxu1 }
 0x32c   : > { %v3188_v19 = vpop.f32.mrf.mxu0 }
 0x32d   : > { %3557 = vst [vmem:[%s5645_s26 + $0x198] sm:$0xff] %v3457_v13  ;;  %v3711_v1 = vadd.f32 %v3710_v36, %v3457_v13  ;;  %v3460_v42 = vmax.f32 %v3344_v59, 0.0  ;;  %v3346_v3 = vadd.f32 %v3345_v56, %v3185_v44  ;;  %v3189_v63 = vadd.f32 %v3188_v19, %v6038_v61  ;;  %v3349_v11 = vpop.f32.mrf.mxu1 }
 0x32e   : > { %v3190_v9 = vpop.f32.mrf.mxu0 }
 0x32f   : > { %3560 = vst [vmem:[%s5645_s26 + $0x1b0] sm:$0xff] %v3460_v42  ;;  %v3681_v58 = vadd.f32 %v3680_v43, %v3460_v42  ;;  %v3461_v41 = vmax.f32 %v3346_v3, 0.0  ;;  %v3350_v33 = vadd.f32 %v3349_v11, %v3189_v63  ;;  %v3191_v34 = vadd.f32 %v3190_v9, %v6041_v8  ;;  %v3351_v57 = vpop.f32.mrf.mxu1 }
 0x330   : > { %v3192_v30 = vpop.f32.mrf.mxu0 }
 0x331   : > { %3561 = vst [vmem:[%s5645_s26 + $0x1b8] sm:$0xff] %v3461_v41  ;;  %v3712_v2 = vadd.f32 %v3711_v1, %v3461_v41  ;;  %v3464_v46 = vmax.f32 %v3350_v33, 0.0  ;;  %v3352_v18 = vadd.f32 %v3351_v57, %v3191_v34  ;;  %v3193_v38 = vadd.f32 %v3192_v30, %v6044_v50  ;;  %v3353_v31 = vpop.f32.mrf.mxu1 }
 0x332   : > { %v3194_v61 = vpop.f32.mrf.mxu0 }
 0x333   : > { %3564 = vst [vmem:[%s5645_s26 + $0x1d0] sm:$0xff] %v3464_v46  ;;  %v3682_v26 = vadd.f32 %v3681_v58, %v3464_v46  ;;  %v3465_v62 = vmax.f32 %v3352_v18, 0.0  ;;  %v3354_v54 = vadd.f32 %v3353_v31, %v3193_v38  ;;  %v3195_v17 = vadd.f32 %v3194_v61, %v6047_v4  ;;  %v3355_v5 = vpop.f32.mrf.mxu1 }
 0x334   : > { %v3198_v8 = vpop.f32.mrf.mxu0 }
 0x335   : > { %3565 = vst [vmem:[%s5645_s26 + $0x1d8] sm:$0xff] %v3465_v62  ;;  %v3713_v39 = vadd.f32 %v3712_v2, %v3465_v62  ;;  %v3468_v20 = vmax.f32 %v3354_v54, 0.0  ;;  %v3356_v22 = vadd.f32 %v3355_v5, %v3195_v17  ;;  %v3199_v45 = vadd.f32 %v3198_v8, %v6050_v48  ;;  %v3359_v28 = vpop.f32.mrf.mxu1 }
 0x336   : > { %v3200_v50 = vpop.f32.mrf.mxu0 }
 0x337   : > { %3568 = vst [vmem:[%s5645_s26 + $0x1f0] sm:$0xff] %v3468_v20  ;;  %v3683_v10 = vadd.f32 %v3682_v26, %v3468_v20  ;;  %v3469_v51 = vmax.f32 %v3356_v22, 0.0  ;;  %v3360_v29 = vadd.f32 %v3359_v28, %v3199_v45  ;;  %v3201_v35 = vadd.f32 %v3200_v50, %v6053_v55  ;;  %v3361_v14 = vpop.f32.mrf.mxu1 }
 0x338   : > { %v3202_v4 = vpop.f32.mrf.mxu0 }
 0x339   : > { %3569 = vst [vmem:[%s5645_s26 + $0x1f8] sm:$0xff] %v3469_v51  ;;  %v3714_v36 = vadd.f32 %v3713_v39, %v3469_v51  ;;  %v3472_v15 = vmax.f32 %v3360_v29, 0.0  ;;  %v3362_v37 = vadd.f32 %v3361_v14, %v3201_v35  ;;  %v3203_v24 = vadd.f32 %v3202_v4, %v6056_v6  ;;  %v3363_v60 = vpop.f32.mrf.mxu1 }
 0x33a   : > { %v3204_v48 = vpop.f32.mrf.mxu0 }
 0x33b   : > { %3572 = vst [vmem:[%s5645_s26 + $0x210] sm:$0xff] %v3472_v15  ;;  %v3684_v49 = vadd.f32 %v3683_v10, %v3472_v15  ;;  %v3473_v43 = vmax.f32 %v3362_v37, 0.0  ;;  %v3364_v13 = vadd.f32 %v3363_v60, %v3203_v24  ;;  %v3205_v59 = vadd.f32 %v3204_v48, %v6059_v27  ;;  %v3365_v44 = vpop.f32.mrf.mxu1 }
 0x33c   : > { %v3208_v55 = vpop.f32.mrf.mxu0 }
 0x33d   : > { %3573 = vst [vmem:[%s5645_s26 + $0x218] sm:$0xff] %v3473_v43  ;;  %v3715_v56 = vadd.f32 %v3714_v36, %v3473_v43  ;;  %v3476_v19 = vmax.f32 %v3364_v13, 0.0  ;;  %v3366_v1 = vadd.f32 %v3365_v44, %v3205_v59  ;;  %v3209_v42 = vadd.f32 %v3208_v55, %v6062_v40  ;;  %v3369_v3 = vpop.f32.mrf.mxu1  ;;  %v6609_v44 = vld [vmem:[#allocation10_spill] sm:$0xff] }
 0x33e   : > { %v3210_v6 = vpop.f32.mrf.mxu0 }
 0x33f   : > { %3576 = vst [vmem:[%s5645_s26 + $0x230] sm:$0xff] %v3476_v19  ;;  %v3685_v63 = vadd.f32 %v3684_v49, %v3476_v19  ;;  %v3477_v11 = vmax.f32 %v3366_v1, 0.0  ;;  %v3370_v9 = vadd.f32 %v3369_v3, %v3209_v42  ;;  %v3211_v58 = vadd.f32 %v3210_v6, %v6065_v12  ;;  %v3371_v41 = vpop.f32.mrf.mxu1  ;;  %v6610_v3 = vld [vmem:[#allocation68_spill] sm:$0xff] }
 0x340   : > { %v3212_v27 = vpop.f32.mrf.mxu0 }
 0x341   : > { %3577 = vst [vmem:[%s5645_s26 + $0x238] sm:$0xff] %v3477_v11  ;;  %v3716_v33 = vadd.f32 %v3715_v56, %v3477_v11  ;;  %v3480_v34 = vmax.f32 %v3370_v9, 0.0  ;;  %v3372_v57 = vadd.f32 %v3371_v41, %v3211_v58  ;;  %v3213_v30 = vadd.f32 %v3212_v27, %v6068_v21  ;;  %v3373_v2 = vpop.f32.mrf.mxu1 }
 0x342   : > { %v3214_v40 = vpop.f32.mrf.mxu0 }
 0x343   : > { %3580 = vst [vmem:[%s5645_s26 + $0x250] sm:$0xff] %v3480_v34  ;;  %v3686_v46 = vadd.f32 %v3685_v63, %v3480_v34  ;;  %v3481_v18 = vmax.f32 %v3372_v57, 0.0  ;;  %v3374_v38 = vadd.f32 %v3373_v2, %v3213_v30  ;;  %v3215_v31 = vadd.f32 %v3214_v40, %v6071_v52  ;;  %v3375_v61 = vpop.f32.mrf.mxu1 }
 0x344   : > { %v3218_v12 = vpop.f32.mrf.mxu0 }
 0x345   : > { %3581 = vst [vmem:[%s5645_s26 + $0x258] sm:$0xff] %v3481_v18  ;;  %v3717_v26 = vadd.f32 %v3716_v33, %v3481_v18  ;;  %v3484_v62 = vmax.f32 %v3374_v38, 0.0  ;;  %v3376_v54 = vadd.f32 %v3375_v61, %v3215_v31  ;;  %v3219_v17 = vadd.f32 %v3218_v12, %v6074_v16  ;;  %v3379_v5 = vpop.f32.mrf.mxu1 }
 0x346   : > { %v3220_v21 = vpop.f32.mrf.mxu0 }
 0x347   : > { %3584 = vst [vmem:[%s5645_s26 + $0x270] sm:$0xff] %v3484_v62  ;;  %v3687_v8 = vadd.f32 %v3686_v46, %v3484_v62  ;;  %v3485_v39 = vmax.f32 %v3376_v54, 0.0  ;;  %v3380_v20 = vadd.f32 %v3379_v5, %v3219_v17  ;;  %v3221_v22 = vadd.f32 %v3220_v21, %v6077_v53  ;;  %v3381_v45 = vpop.f32.mrf.mxu1 }
 0x348   : > { %v3222_v52 = vpop.f32.mrf.mxu0 }
 0x349   : > { %3585 = vst [vmem:[%s5645_s26 + $0x278] sm:$0xff] %v3485_v39  ;;  %v3718_v28 = vadd.f32 %v3717_v26, %v3485_v39  ;;  %v3488_v50 = vmax.f32 %v3380_v20, 0.0  ;;  %v3382_v10 = vadd.f32 %v3381_v45, %v3221_v22  ;;  %v3223_v51 = vadd.f32 %v3222_v52, %v6080_v23  ;;  %v3383_v29 = vpop.f32.mrf.mxu1 }
 0x34a   : > { %v3224_v16 = vpop.f32.mrf.mxu0 }
 0x34b   : > { %3588 = vst [vmem:[%s5645_s26 + $0x290] sm:$0xff] %v3488_v50  ;;  %v3688_v35 = vadd.f32 %v3687_v8, %v3488_v50  ;;  %v3489_v14 = vmax.f32 %v3382_v10, 0.0  ;;  %v3384_v4 = vadd.f32 %v3383_v29, %v3223_v51  ;;  %v3225_v36 = vadd.f32 %v3224_v16, %v6083_v0  ;;  %v3385_v15 = vpop.f32.mrf.mxu1 }
 0x34c   : > { %v3228_v53 = vpop.f32.mrf.mxu0 }
 0x34d   : > { %3589 = vst [vmem:[%s5645_s26 + $0x298] sm:$0xff] %v3489_v14  ;;  %v3719_v37 = vadd.f32 %v3718_v28, %v3489_v14  ;;  %v3492_v24 = vmax.f32 %v3384_v4, 0.0  ;;  %v3386_v60 = vadd.f32 %v3385_v15, %v3225_v36  ;;  %v3229_v48 = vadd.f32 %v3228_v53, %v6086_v32  ;;  %v3389_v23 = vpop.f32.mrf.mxu1 }
 0x34e   : > { %v3230_v49 = vpop.f32.mrf.mxu0 }
 0x34f   : > { %3592 = vst [vmem:[%s5645_s26 + $0x2b0] sm:$0xff] %v3492_v24  ;;  %v3689_v43 = vadd.f32 %v3688_v35, %v3492_v24  ;;  %v3493_v13 = vmax.f32 %v3386_v60, 0.0  ;;  %v3390_v59 = vadd.f32 %v3389_v23, %v3229_v48  ;;  %v3231_v55 = vadd.f32 %v3230_v49, %v6609_v44  ;;  %v3391_v0 = vpop.f32.mrf.mxu1 }
 0x350   : > { %v3232_v56 = vpop.f32.mrf.mxu0 }
 0x351   : > { %3593 = vst [vmem:[%s5645_s26 + $0x2b8] sm:$0xff] %v3493_v13  ;;  %v3720_v19 = vadd.f32 %v3719_v37, %v3493_v13  ;;  %v3496_v1 = vmax.f32 %v3390_v59, 0.0  ;;  %v3392_v42 = vadd.f32 %v3391_v0, %v3231_v55  ;;  %v3233_v32 = vadd.f32 %v3232_v56, %v6610_v3  ;;  %v3393_v6 = vpop.f32.mrf.mxu1 }
 0x352   : > { %v3234_v63 = vpop.f32.mrf.mxu0 }
 0x353   : > { %3596 = vst [vmem:[%s5645_s26 + $0x2d0] sm:$0xff] %v3496_v1  ;;  %v3690_v11 = vadd.f32 %v3689_v43, %v3496_v1  ;;  %v3497_v9 = vmax.f32 %v3392_v42, 0.0  ;;  %v3394_v58 = vadd.f32 %v3393_v6, %v3233_v32  ;;  %v3235_v41 = vadd.f32 %v3234_v63, %v6095_v25  ;;  %v3395_v27 = vpop.f32.mrf.mxu1 }
 0x354   : > { %v3238_v33 = vpop.f32.mrf.mxu0 }
 0x355   : > { %3597 = vst [vmem:[%s5645_s26 + $0x2d8] sm:$0xff] %v3497_v9  ;;  %v3721_v34 = vadd.f32 %v3720_v19, %v3497_v9  ;;  %v3500_v57 = vmax.f32 %v3394_v58, 0.0  ;;  %v3396_v30 = vadd.f32 %v3395_v27, %v3235_v41  ;;  %v3239_v2 = vadd.f32 %v3238_v33, %v6098_v7  ;;  %v3399_v40 = vpop.f32.mrf.mxu1 }
 0x356   : > { %v3240_v46 = vpop.f32.mrf.mxu0 }
 0x357   : > { %3600 = vst [vmem:[%s5645_s26 + $0x2f0] sm:$0xff] %v3500_v57  ;;  %v3691_v18 = vadd.f32 %v3690_v11, %v3500_v57  ;;  %v3501_v38 = vmax.f32 %v3396_v30, 0.0  ;;  %v3400_v31 = vadd.f32 %v3399_v40, %v3239_v2  ;;  %v3241_v25 = vadd.f32 %v3240_v46, %v6100_v47  ;;  %v3401_v61 = vpop.f32.mrf.mxu1 }
 0x358   : > { %v3242_v12 = vpop.f32.mrf.mxu0 }
 0x359   : > { %3601 = vst [vmem:[%s5645_s26 + $0x2f8] sm:$0xff] %v3501_v38  ;;  %v3722_v26 = vadd.f32 %v3721_v34, %v3501_v38  ;;  %v3504_v62 = vmax.f32 %v3400_v31, 0.0  ;;  %v3402_v54 = vadd.f32 %v3401_v61, %v3241_v25  ;;  %v3403_v7 = vpop.f32.mrf.mxu1 }
 0x35a   : > { %v3243_v17 = vpop.f32.mrf.mxu0 }
 0x35b   : > { %3604 = vst [vmem:[%s5645_s26 + $0x310] sm:$0xf] %v3504_v62  ;;  %v3692_v47 = vsel %vm3629_vm0, %v3504_v62, 0.0  ;;  %v3505_v5 = vmax.f32 %v3402_v54, 0.0  ;;  %v3404_v21 = vpop.f32.mrf.mxu1 }
 0x35c   : > { %v3693_v8 = vadd.f32 %v3692_v47, %v3691_v18 }
 0x35d   : > { %3605 = vst [vmem:[%s5645_s26 + $0x318] sm:$0xf] %v3505_v5  ;;  %v3723_v39 = vsel %vm3629_vm0, %v3505_v5, 0.0 }
 0x35e   : > { %v3694_v20 = vrot.slane %v3693_v8, 4  ;;  %v3724_v22 = vadd.f32 %v3723_v39, %v3722_v26 }
 0x35f   : > { %4328 = shalt.err (!%p4325_p13)
}
 0x360   : > { %s4329_s9 = scalar_lea.hbm %s6208_s13, 12800  ;;  %s4333_s27 = scalar_lea.hbm %s6305_s3, 51200 }
 0x361   : > { %p4330_p2 = scmp.ne.s32.totalorder %s6208_s13, %s4329_s9  ;;  %p4334_p5 = scmp.lt.s32.totalorder %s6208_s13, %s6305_s3 }
 0x362   : > { %p4335_p8 = scmp.lt.s32.totalorder %s4333_s27, %s4329_s9 }
 0x363   : > { %p4331_p4 = pnand %p4330_p2, %p4576_p6 }
 0x364   : > { %p4336_p9 = por %p4335_p8, %p4334_p5 }
 0x365   : > { %p4332_p3 = pneg %p4331_p4 }
 0x367   : > { %p4337_p10 = pnand %p4336_p9, %p4332_p3 }
 0x369   : > { %4340 = shalt.err (!%p4337_p10)
}
 0x36a   : > { %s4464_s8 = smov 512   ;;  %s4465_s22 = smov 2048   ;;  %v3695_v45 = vadd.f32 %v3694_v20, %v3693_v8  ;;  %v3725_v52 = vrot.slane %v3724_v22, 4  ;;  %v4467_v29 = vmov 1966171168   ;;  %v6611_v60 = vld [vmem:[#allocation59_spill] sm:$0xff]  ;;  %v6615_v0 = vlaneseq }
 0x36b   : > { %s4466_s7 = smov 32   ;;  %v3743_v16 = vunpack.c.l.s4 %v4467_v29  ;;  %s234_s0 = sand.u32 1, %s4425_s16   ;;  %v6612_v49 = vld [vmem:[#allocation70_spill] sm:$0xff] }
 0x36c   : > { %4210 = dma.vmem_to_hbm [thread:$0]  (%p4576_p6), %s6203_s6, 12800, %s6208_s13, %s6216_s14, %s4464_s8, %s4465_s22, %s4466_s7   ;;  %v3696_v28 = vrot.slane %v3695_v45, 2  ;;  %v3726_v50 = vadd.f32 %v3725_v52, %v3724_v22  ;;  %v6613_v43 = vld [vmem:[#allocation66_spill] sm:$0xff]  ;;  %vm3767_vm1 = vcmp.lt.s32.totalorder %v6615_v0, 512 }
 0x36d   : > { %v3744_v15 = vunpack.c.0.s8 %v3743_v16  ;;  %s3935_s1 = sshll.u32 %s234_s0, 2  ;;  %s4202_s10 = sshll.u32 %s4445_s21, 3  ;;  %v6614_v13 = vcombine.low %v6612_v49, %v6613_v43 }
 0x36e   : > { %v3697_v10 = vadd.f32 %v3696_v28, %v3695_v45  ;;  %v3727_v51 = vrot.slane %v3726_v50, 2  ;;  %s3806_s6 = sadd.s32 %s4202_s10, %s5183_s30  ;;  %s236_s14 = scalar_lea.vmem [#allocation4], %s3935_s1 }
 0x36f   : > { %v3747_v48 = vsub.s32 %v3744_v15, %v6611_v60  ;;  %s4203_s13 = sshll.u32 %s3806_s6, 4  ;;  %s3810_s9 = sshll.u32 %s236_s14, 4  ;;  %s3811_s9 = int_to_ptr.vmem [resolvable:$true] %s3810_s9 }
 0x370   : > { %v3698_v35 = vrot.slane %v3697_v10, 1  ;;  %v3728_v14 = vadd.f32 %v3727_v51, %v3726_v50  ;;  %s6616_s12 = sld [smem:[#allocation115_spill]]  ;;  %s3776_s8 = scalar_lea.sflag [#allocation5], %s234_s0 }
 0x371   : > { %v3748_v59 = vrot.slane %v6614_v13, %v3747_v48  ;;  %s4341_s30 = scalar_lea.vmem %s3811_s9, 64  ;;  %s4468_s22 = smov [#allocation4]  }
 0x372   : > { %v3699_v4 = vadd.f32 %v3698_v35, %v3697_v10  ;;  %v3729_v36 = vrot.slane %v3728_v14, 1  ;;  %p4342_p6 = scmp.ne.s32.totalorder %s3811_s9, %s4341_s30  ;;  %s4345_s7 = sshll.u32 %s4468_s22, 4  ;;  %s4346_s7 = int_to_ptr.vmem [resolvable:$false] %s4345_s7 }
 0x373   : > { %s4347_s1 = scalar_lea.vmem %s4346_s7, 128  ;;  %p4348_p13 = scmp.lt.s32.totalorder %s3811_s9, %s4346_s7 }
 0x374   : > { %v3730_v53 = vadd.f32 %v3729_v36, %v3728_v14  ;;  %v3734_v37 = vmul.f32 0.0051020407, %v3699_v4  ;;  %p4343_p11 = pnand %p4342_p6, %p4606_p0  ;;  %p4349_p2 = scmp.lt.s32.totalorder %s4347_s1, %s4341_s30 }
 0x376   : > { %v3735_v24 = vmul.f32 0.0051020407, %v3730_v53  ;;  %s3808_s27 = scalar_lea.hbm %s6616_s12, %s4203_s13  ;;  %p4344_p12 = pneg %p4343_p11 }
 0x377   : > { %p4350_p4 = por %p4349_p2, %p4348_p13 }
 0x378   : > { %v3741_v23 = vcombine.low %v3734_v37, %v3735_v24 }
 0x379   : > { %p4351_p3 = pnand %p4350_p4, %p4344_p12 }
 0x37a   : > { %v3755_v44 = vrot.slane %v3741_v23, %v3747_v48 }
 0x37c   : > { %v3756_v55 = vcombine.low %v3748_v59, %v3755_v44 }
 0x37e   : > { %v3763_v56 = vrot.slane %v3756_v55, %v3747_v48 }
 0x380   : > { %3769 = vst.msk [vmem:[%s236_s14] sm:$0xf] %vm3767_vm1, %v3763_v56 }
 0x381   : > { %4354 = shalt.err (!%p4351_p3)
}
 0x382   : > { %s4355_s10 = scalar_lea.hbm %s3808_s27, 64  ;;  %s4359_s13 = scalar_lea.hbm %s6616_s12, 256 }
 0x383   : > { %p4356_p5 = scmp.ne.s32.totalorder %s3808_s27, %s4355_s10  ;;  %p4360_p10 = scmp.lt.s32.totalorder %s3808_s27, %s6616_s12 }
 0x384   : > { %p4361_p6 = scmp.lt.s32.totalorder %s4359_s13, %s4355_s10 }
 0x385   : > { %p4357_p8 = pnand %p4356_p5, %p4606_p0 }
 0x386   : > { %p4362_p11 = por %p4361_p6, %p4360_p10 }
 0x387   : > { %p4358_p9 = pneg %p4357_p8 }
 0x389   : > { %p4363_p1 = pnand %p4362_p11, %p4358_p9 }
 0x38b   : > { %4366 = shalt.err (!%p4363_p1)
}
 0x38c   : > { %4211 = dma.vmem_to_hbm [thread:$0]  (%p4606_p0), %s3811_s9, 64, %s3808_s27, %s3776_s8  }
 0x38d PF: > { %s6617_s26 = sld [smem:[#allocation8_spill]]  ;;  %p4221_p12 = scmp.ge.s32.totalorder %s4461_s25, 2 }
 0x38f   : > { %p4215_p13 = pnand %p4221_p12, %p4582_p7 }
 0x391   : > { %p4216_p2 = pneg %p4215_p13 }
 0x393   : > { %s3822_s22 = sand.u32 1, %s6617_s26  }
 0x394   : > { %s3823_s7 = scalar_lea.sflag [#allocation3], %s3822_s22 }
 0x395   : > { %4412 = dma.done.wait (%p4216_p2), %s3823_s7, 12800  }
 0x396   : > { %4414 = vsyncadd (%p4216_p2), %s3823_s7, 4294954496  ;;  %s3831_s1 = sand.u32 1, %s4421_s15   ;;  %p6619_p4 = scmp.ne.s32.totalorder %s6395_s5, 0 }
 0x397   : > { %s3832_s11 = scalar_lea.sflag [#allocation5], %s3831_s1 }
 0x398   : > { %p4218_p1 = pnand %p4221_p12, %p6619_p4 }
 0x39a   : > { %p4219_p3 = pneg %p4218_p1 }
 0x39c   : > { %4416 = dma.done.wait (%p4219_p3), %s3832_s11, 64  }
 0x39d   : > { %4418 = vsyncadd (%p4219_p3), %s3832_s11, 4294967232  ;;  %s21_s25 = sadd.s32 1, %s4461_s25   ;;  %s6620_s9 = smov %s4593_s18 }
 0x39e   : > { %p18_p0 = scmp.ge.s32.totalorder %s21_s25, 6   ;;  %s6621_s15 = smov %s4425_s16 }
 0x39f   : > { %s6622_s16 = smov %s4429_s17  ;;  %s6623_s17 = smov %s4596_s4 }
 0x3a0   : > { %s6624_s18 = smov %s4437_s19  ;;  %s6625_s19 = smov %s4441_s20 }
 0x3a1   : > { %s6626_s20 = smov %s6620_s9  ;;  %s6627_s21 = smov %s4453_s23 }
 0x3a2   : > { %s6628_s22 = smov %s4457_s24  ;;  %s6629_s23 = smov %s6632_s28 }
 0x3a3   : > { %s6630_s24 = smov %s6636_s29  ;;  %20 = sbr.rel (!%p18_p0) target bundleno = 13 (0xd), region = 88 }
 0x3a8   :  { %3837 = vsyncpa [#allocation3], 1 }
 0x3a9   :  { %3839 = vsyncpa [#allocation3 + $0x1], 1 }
 0x3aa   :  { %3840 = vsyncpa [#allocation5], 1 }
 0x3ab   :  { %3842 = vsyncpa [#allocation5 + $0x1], 1 }

</bundles_post_ra>
